<compile_context>
chip_gen: v7x
topology: tpu7x:2x2x1
jax: 0.10.0
libtpu: 0.0.40
codegen_flags: <defaults>
</compile_context>

<pallas_src>
import functools
import math

import jax
import jax.numpy as jnp
from jax.experimental import pallas as pl
from jax.experimental.pallas import tpu as pltpu


# --------------------------------------------------------------------------- #
# VMEM budget / tile targets derived from the actual part (v5e/v6e: 128 MiB,
# v7x: 64 MiB physical).
# --------------------------------------------------------------------------- #
def _vmem_limit_bytes():
    cap = 64 * 1024 * 1024
    try:
        info = pltpu.get_tpu_info()
        for name in ("vmem_capacity_bytes", "vmem_size_bytes", "vmem_bytes"):
            v = getattr(info, name, None)
            if v:
                cap = int(v)
                break
    except Exception:
        pass
    return min(int(cap * 3 // 4), 100 * 1024 * 1024)


VMEM_LIMIT = _vmem_limit_bytes()
_BIG_VMEM = VMEM_LIMIT > 64 * 1024 * 1024          # 128 MiB parts (v5e / v6e)
_TM_TARGET = 512 if _BIG_VMEM else 256
_TN_TARGET = 512 if _BIG_VMEM else 256
_TK_TARGET = 1024 if _BIG_VMEM else 512


def _pick_tile(dim, target, align):
    """Largest tile <= target that divides dim and is align-multiple; else full dim."""
    if dim <= target:
        return dim
    t = (target // align) * align
    while t >= align:
        if dim % t == 0:
            return t
        t -= align
    return dim


def _gelu(x):
    # TODO(synk): torch nn.GELU defaults to exact erf; tanh-approx used here (EUP).
    return jax.nn.gelu(x, approximate=True)


# --------------------------------------------------------------------------- #
# Kernel 1: fused LayerNorm + matmul (+ optional GELU), 2-D lane-dense output.
# LN of the row-block is computed once (n == 0) into bf16 VMEM scratch and
# reused for every output-column tile (grid iterates n innermost).
# NOTE: uses a full-K weight block; for very large d_model on v7x split the K
# axis (or shrink tn) to stay inside the 64 MiB VMEM.
# --------------------------------------------------------------------------- #
def _ln_matmul_kernel(x_ref, g_ref, bt_ref, w_ref, b_ref, o_ref, h_ref, *, activation):
    @pl.when(pl.program_id(1) == 0)
    def _():
        x = x_ref[...].astype(jnp.float32)
        mean = jnp.mean(x, axis=-1, keepdims=True)
        xc = x - mean
        var = jnp.mean(xc * xc, axis=-1, keepdims=True)
        h = xc * jax.lax.rsqrt(var + 1e-5) * g_ref[...] + bt_ref[...]
        h_ref[...] = h.astype(jnp.bfloat16)

    out = jnp.dot(h_ref[...], w_ref[...], preferred_element_type=jnp.float32) + b_ref[...]
    if activation == "gelu":
        out = _gelu(out)
    o_ref[...] = out.astype(o_ref.dtype)


def ln_matmul(x, gamma, beta, w, b, activation=None, out_dtype=jnp.bfloat16):
    """LayerNorm(x) @ w + b.  x: (M, K) bf16, w: (K, N) bf16, b: (N,) f32."""
    M, K = x.shape
    N = w.shape[1]
    tm = _pick_tile(M, _TM_TARGET, 16)
    tn = _pick_tile(N, _TN_TARGET, 128)
    return pl.pallas_call(
        functools.partial(_ln_matmul_kernel, activation=activation),
        out_shape=jax.ShapeDtypeStruct((M, N), out_dtype),
        grid=(M // tm, N // tn),
        in_specs=[
            pl.BlockSpec((tm, K), lambda m, n: (m, 0)),
            pl.BlockSpec((1, K), lambda m, n: (0, 0)),
            pl.BlockSpec((1, K), lambda m, n: (0, 0)),
            pl.BlockSpec((K, tn), lambda m, n: (0, n)),
            pl.BlockSpec((1, tn), lambda m, n: (0, n)),
        ],
        out_specs=pl.BlockSpec((tm, tn), lambda m, n: (m, n)),
        scratch_shapes=[pltpu.VMEM((tm, K), jnp.bfloat16)],
        compiler_params=pltpu.CompilerParams(
            dimension_semantics=("parallel", "arbitrary"),
            vmem_limit_bytes=VMEM_LIMIT,
        ),
    )(x, gamma.reshape(1, K), beta.reshape(1, K), w, b.reshape(1, N))


# --------------------------------------------------------------------------- #
# Kernel 2: fused LayerNorm + projection with HEAD-MAJOR output.
# Weight is stored head-major (num_chunks, K, hd); the output is written
# directly as (num_chunks, M, hd) via the out_spec -> no XLA head-split
# transpose downstream.
# --------------------------------------------------------------------------- #
def _ln_matmul_heads_kernel(x_ref, g_ref, bt_ref, w_ref, b_ref, o_ref, h_ref):
    @pl.when(pl.program_id(1) == 0)
    def _():
        x = x_ref[...].astype(jnp.float32)
        mean = jnp.mean(x, axis=-1, keepdims=True)
        xc = x - mean
        var = jnp.mean(xc * xc, axis=-1, keepdims=True)
        h = xc * jax.lax.rsqrt(var + 1e-5) * g_ref[...] + bt_ref[...]
        h_ref[...] = h.astype(jnp.bfloat16)

    o_ref[...] = (
        jnp.dot(h_ref[...], w_ref[...], preferred_element_type=jnp.float32) + b_ref[...]
    ).astype(o_ref.dtype)


def ln_matmul_heads(x, gamma, beta, w_heads, b_heads):
    """LayerNorm(x) projected per head chunk.

    x: (M, K) bf16; w_heads: (NH, K, hd) bf16; b_heads: (NH, 1, hd) f32.
    Returns head-major (NH, M, hd) bf16.
    """
    M, K = x.shape
    nh, _, hd = w_heads.shape
    tm = _pick_tile(M, _TM_TARGET, 16)
    return pl.pallas_call(
        _ln_matmul_heads_kernel,
        out_shape=jax.ShapeDtypeStruct((nh, M, hd), jnp.bfloat16),
        grid=(M // tm, nh),
        in_specs=[
            pl.BlockSpec((tm, K), lambda m, n: (m, 0)),
            pl.BlockSpec((1, K), lambda m, n: (0, 0)),
            pl.BlockSpec((1, K), lambda m, n: (0, 0)),
            pl.BlockSpec((pl.Squeezed(), K, hd), lambda m, n: (n, 0, 0)),
            pl.BlockSpec((pl.Squeezed(), 1, hd), lambda m, n: (n, 0, 0)),
        ],
        out_specs=pl.BlockSpec((pl.Squeezed(), tm, hd), lambda m, n: (n, m, 0)),
        scratch_shapes=[pltpu.VMEM((tm, K), jnp.bfloat16)],
        compiler_params=pltpu.CompilerParams(
            dimension_semantics=("parallel", "arbitrary"),
            vmem_limit_bytes=VMEM_LIMIT,
        ),
    )(x, gamma.reshape(1, K), beta.reshape(1, K), w_heads, b_heads)


# --------------------------------------------------------------------------- #
# Kernel 3: attention on a (B, H) grid.  q/k/v are read straight from the
# head-major projection slabs (pl.Squeezed leading dims), the pad-key bias is
# per batch element (B,1,Tk), the causal mask is built in-kernel, the softmax
# scale is folded into q and the denominator is applied after the PV matmul.
# --------------------------------------------------------------------------- #
def _attn_kernel(q_ref, k_ref, v_ref, bias_ref, o_ref, *, scale, causal):
    q = (q_ref[...].astype(jnp.float32) * scale).astype(jnp.bfloat16)   # (Tq, hd)
    k = k_ref[...]                                                      # (Tk, hd)
    v = v_ref[...]                                                      # (Tk, hd)
    s = jax.lax.dot_general(                                            # (Tq, Tk) f32
        q, k, (((1,), (1,)), ((), ())), preferred_element_type=jnp.float32)
    s = s + bias_ref[...]                                               # (1, Tk) pad-key bias
    if causal:
        Tq, Tk = s.shape
        qi = jax.lax.broadcasted_iota(jnp.int32, (Tq, Tk), 0)
        ki = jax.lax.broadcasted_iota(jnp.int32, (Tq, Tk), 1)
        s = jnp.where(ki <= qi, s, -1e9)
    m = jnp.max(s, axis=-1, keepdims=True)
    p = jnp.exp(s - m)                                                  # f32 softmax numerics
    denom = jnp.sum(p, axis=-1, keepdims=True)
    o = jnp.dot(p.astype(jnp.bfloat16), v, preferred_element_type=jnp.float32)
    o_ref[...] = (o * pl.reciprocal(denom, approx=True)).astype(o_ref.dtype)


def attention(q_heads, kv_heads, key_bias, *, num_heads, batch,
              q_head_offset, k_head_offset, v_head_offset, causal, scale):
    """q_heads: (_, B*Tq, hd), kv_heads: (_, B*Tk, hd), key_bias: (B, 1, Tk).
    Returns head-major (H, B*Tq, hd) bf16."""
    _, MQ, hd = q_heads.shape
    _, MK, _ = kv_heads.shape
    Tq = MQ // batch
    Tk = MK // batch
    qo, ko, vo = q_head_offset, k_head_offset, v_head_offset
    return pl.pallas_call(
        functools.partial(_attn_kernel, scale=scale, causal=causal),
        out_shape=jax.ShapeDtypeStruct((num_heads, MQ, hd), jnp.bfloat16),
        grid=(batch, num_heads),
        in_specs=[
            pl.BlockSpec((pl.Squeezed(), Tq, hd), lambda b, h: (qo + h, b, 0)),
            pl.BlockSpec((pl.Squeezed(), Tk, hd), lambda b, h: (ko + h, b, 0)),
            pl.BlockSpec((pl.Squeezed(), Tk, hd), lambda b, h: (vo + h, b, 0)),
            pl.BlockSpec((pl.Squeezed(), 1, Tk), lambda b, h: (b, 0, 0)),
        ],
        out_specs=pl.BlockSpec((pl.Squeezed(), Tq, hd), lambda b, h: (h, b, 0)),
        compiler_params=pltpu.CompilerParams(
            dimension_semantics=("parallel", "parallel"),
            vmem_limit_bytes=VMEM_LIMIT,
        ),
    )(q_heads, kv_heads, kv_heads, key_bias)
    # TODO(synk): for long sequences convert to a KV-tiled online-softmax (flash)
    # kernel with causal tile skipping; dense (Tq,Tk) scores are fine at T=8.


# --------------------------------------------------------------------------- #
# Kernel 4: K-tiled matmul with f32 accumulator; bias + residual fused into the
# flush.  Shared body for (a) the attention output projection, whose K axis
# runs over heads of the head-major attention output (no merge transpose),
# and (b) FFN fc2 + residual.
# --------------------------------------------------------------------------- #
def _matmul_resid_kernel(x_ref, w_ref, b_ref, r_ref, o_ref, acc_ref):
    @pl.when(pl.program_id(2) == 0)
    def _():
        acc_ref[...] = jnp.zeros_like(acc_ref)

    acc_ref[...] += jnp.dot(x_ref[...], w_ref[...], preferred_element_type=jnp.float32)

    @pl.when(pl.program_id(2) == pl.num_programs(2) - 1)
    def _():
        o_ref[...] = (
            acc_ref[...] + b_ref[...] + r_ref[...].astype(jnp.float32)
        ).astype(o_ref.dtype)


def head_proj_residual(attn, w_heads, b, residual):
    """residual + concat_heads(attn) @ Wo + b, contracting head-by-head.

    attn: (H, M, hd) bf16; w_heads: (H, hd, D) bf16; b: (D,) f32; residual: (M, D) bf16.
    """
    H, M, hd = attn.shape
    D = w_heads.shape[2]
    tm = _pick_tile(M, _TM_TARGET, 16)
    tn = _pick_tile(D, _TN_TARGET, 128)
    return pl.pallas_call(
        _matmul_resid_kernel,
        out_shape=jax.ShapeDtypeStruct((M, D), jnp.bfloat16),
        grid=(M // tm, D // tn, H),
        in_specs=[
            pl.BlockSpec((pl.Squeezed(), tm, hd), lambda m, n, k: (k, m, 0)),
            pl.BlockSpec((pl.Squeezed(), hd, tn), lambda m, n, k: (k, 0, n)),
            pl.BlockSpec((1, tn), lambda m, n, k: (0, n)),
            pl.BlockSpec((tm, tn), lambda m, n, k: (m, n)),
        ],
        out_specs=pl.BlockSpec((tm, tn), lambda m, n, k: (m, n)),
        scratch_shapes=[pltpu.VMEM((tm, tn), jnp.float32)],
        compiler_params=pltpu.CompilerParams(
            dimension_semantics=("parallel", "parallel", "arbitrary"),
            vmem_limit_bytes=VMEM_LIMIT,
        ),
    )(attn, w_heads, b.reshape(1, D), residual)


def matmul_residual(x, w, b, residual):
    """residual + x @ w + b.  x: (M, K) bf16, w: (K, N) bf16, b: (N,) f32."""
    M, K = x.shape
    N = w.shape[1]
    tm = _pick_tile(M, _TM_TARGET, 16)
    tn = _pick_tile(N, _TN_TARGET, 128)
    tk = _pick_tile(K, _TK_TARGET, 128)
    return pl.pallas_call(
        _matmul_resid_kernel,
        out_shape=jax.ShapeDtypeStruct((M, N), jnp.bfloat16),
        grid=(M // tm, N // tn, K // tk),
        in_specs=[
            pl.BlockSpec((tm, tk), lambda m, n, k: (m, k)),
            pl.BlockSpec((tk, tn), lambda m, n, k: (k, n)),
            pl.BlockSpec((1, tn), lambda m, n, k: (0, n)),
            pl.BlockSpec((tm, tn), lambda m, n, k: (m, n)),
        ],
        out_specs=pl.BlockSpec((tm, tn), lambda m, n, k: (m, n)),
        scratch_shapes=[pltpu.VMEM((tm, tn), jnp.float32)],
        compiler_params=pltpu.CompilerParams(
            dimension_semantics=("parallel", "parallel", "arbitrary"),
            vmem_limit_bytes=VMEM_LIMIT,
        ),
    )(x, w, b.reshape(1, N), residual)


# --------------------------------------------------------------------------- #
# Model glue (plain JAX: embedding gathers, mask construction; no transposes)
# --------------------------------------------------------------------------- #
def _key_bias(pad_mask):                              # bool (B,T) -> f32 (B,1,T)
    return jnp.where(pad_mask, 0.0, -1e9).astype(jnp.float32)[:, None, :]


def encoder_forward(tokens, pad_mask, p, n_heads):
    B, T = tokens.shape
    D = p["tok_emb"].shape[1]
    hd = D // n_heads
    scale = 1.0 / math.sqrt(hd)
    x = (p["tok_emb"][tokens] + p["pos_emb"][:T][None]).reshape(B * T, D)   # bf16
    kb = _key_bias(pad_mask)
    for lp in p["layers"]:
        qkv = ln_matmul_heads(x, lp["ln1"]["g"], lp["ln1"]["b"],
                              lp["attn"]["wqkv"], lp["attn"]["bqkv"])       # (3H, M, hd)
        o = attention(qkv, qkv, kb, num_heads=n_heads, batch=B,
                      q_head_offset=0, k_head_offset=n_heads,
                      v_head_offset=2 * n_heads, causal=False, scale=scale)
        x = head_proj_residual(o, lp["attn"]["wo"], lp["attn"]["bo"], x)
        h = ln_matmul(x, lp["ln2"]["g"], lp["ln2"]["b"],
                      lp["ffn"]["w1"], lp["ffn"]["b1"], activation="gelu")
        x = matmul_residual(h, lp["ffn"]["w2"], lp["ffn"]["b2"], x)
    # The encoder's final LayerNorm (ln_f) is fused into each decoder layer's
    # cross-attention K/V projection -> return the pre-ln_f activations.
    return x.reshape(B, T, D)


def decoder_forward(tokens, enc_pre, enc_lnf, input_pad_mask, output_pad_mask, p, n_heads):
    B, T = tokens.shape
    Tk = enc_pre.shape[1]
    D = enc_pre.shape[2]
    H = n_heads
    hd = D // H
    scale = 1.0 / math.sqrt(hd)
    x = (p["tok_emb"][tokens] + p["pos_emb"][:T][None]).reshape(B * T, D)
    # NOTE: key-pad mask built from UNshifted targets, applied to the shifted
    # decoder input -- mirrors the torch reference's forward().
    self_kb = _key_bias(output_pad_mask)
    cross_kb = _key_bias(input_pad_mask)
    enc2 = enc_pre.reshape(B * Tk, D)

    for lp in p["layers"]:
        # causal self-attention
        qkv = ln_matmul_heads(x, lp["ln1"]["g"], lp["ln1"]["b"],
                              lp["self_attn"]["wqkv"], lp["self_attn"]["bqkv"])
        o = attention(qkv, qkv, self_kb, num_heads=H, batch=B,
                      q_head_offset=0, k_head_offset=H, v_head_offset=2 * H,
                      causal=True, scale=scale)
        x = head_proj_residual(o, lp["self_attn"]["wo"], lp["self_attn"]["bo"], x)
        # cross-attention (queries from decoder state; K/V from encoder output,
        # with the encoder's final LayerNorm fused into the K/V projection)
        q = ln_matmul_heads(x, lp["ln2"]["g"], lp["ln2"]["b"],
                            lp["cross_attn"]["wq"], lp["cross_attn"]["bq"])
        kv = ln_matmul_heads(enc2, enc_lnf["g"], enc_lnf["b"],
                             lp["cross_attn"]["wkv"], lp["cross_attn"]["bkv"])
        o = attention(q, kv, cross_kb, num_heads=H, batch=B,
                      q_head_offset=0, k_head_offset=0, v_head_offset=H,
                      causal=False, scale=scale)
        x = head_proj_residual(o, lp["cross_attn"]["wo"], lp["cross_attn"]["bo"], x)
        # feed-forward
        h = ln_matmul(x, lp["ln3"]["g"], lp["ln3"]["b"],
                      lp["ffn"]["w1"], lp["ffn"]["b1"], activation="gelu")
        x = matmul_residual(h, lp["ffn"]["w2"], lp["ffn"]["b2"], x)

    # final LN fused with the weight-tied lm_head; lm_head_w is a one-time bf16
    # (D, V) transposed copy of the decoder token embedding (no per-tile XLU).
    logits = ln_matmul(x, p["ln_f"]["g"], p["ln_f"]["b"],
                       p["lm_head_w"], p["lm_head_b"], out_dtype=jnp.float32)
    return logits.reshape(B, T, -1)


def encoder_decoder_forward(x_tokens, targets, params, *, n_heads, sos_id, pad_id):
    input_pad_mask = x_tokens != pad_id
    output_pad_mask = targets != pad_id               # on UNshifted targets (matches torch)
    enc_pre = encoder_forward(x_tokens, input_pad_mask, params["encoder"], n_heads)
    B = x_tokens.shape[0]
    sos = jnp.full((B, 1), sos_id, dtype=targets.dtype)
    dec_in = jnp.concatenate([sos, targets[:, :-1]], axis=1)
    return decoder_forward(dec_in, enc_pre, params["encoder"]["ln_f"],
                           input_pad_mask, output_pad_mask,
                           params["decoder"], n_heads)
    # TODO(synk): dropout (p=0.0) and the autoregressive `generate` sampling
    # loop (torch.multinomial) are not part of the trained forward pass.


# --------------------------------------------------------------------------- #
# Deterministic parameter init: bf16 weights (head-major attention layouts),
# f32 biases / LayerNorm params.
# --------------------------------------------------------------------------- #
def init_params(key, *, vocab, d_model, n_layers, d_ff, block_size, n_heads):
    keys = iter(jax.random.split(key, 4096))
    hd = d_model // n_heads

    def w(shape):
        return (0.02 * jax.random.normal(next(keys), shape, jnp.float32)).astype(jnp.bfloat16)

    def zeros(shape):
        return jnp.zeros(shape, jnp.float32)

    def ln():
        return {"g": jnp.ones((d_model,), jnp.float32), "b": zeros((d_model,))}

    def self_attn():
        return {"wqkv": w((3 * n_heads, d_model, hd)), "bqkv": zeros((3 * n_heads, 1, hd)),
                "wo": w((n_heads, hd, d_model)), "bo": zeros((d_model,))}

    def cross_attn():
        return {"wq": w((n_heads, d_model, hd)), "bq": zeros((n_heads, 1, hd)),
                "wkv": w((2 * n_heads, d_model, hd)), "bkv": zeros((2 * n_heads, 1, hd)),
                "wo": w((n_heads, hd, d_model)), "bo": zeros((d_model,))}

    def ffn():
        return {"w1": w((d_model, d_ff)), "b1": zeros((d_ff,)),
                "w2": w((d_ff, d_model)), "b2": zeros((d_model,))}

    def enc_layer():
        return {"ln1": ln(), "attn": self_attn(), "ln2": ln(), "ffn": ffn()}

    def dec_layer():
        return {"ln1": ln(), "self_attn": self_attn(), "ln2": ln(),
                "cross_attn": cross_attn(), "ln3": ln(), "ffn": ffn()}

    dec_tok = w((vocab, d_model))
    return {
        "encoder": {"tok_emb": w((vocab, d_model)), "pos_emb": w((block_size, d_model)),
                    "layers": [enc_layer() for _ in range(n_layers)], "ln_f": ln()},
        "decoder": {"tok_emb": dec_tok, "pos_emb": w((block_size, d_model)),
                    "layers": [dec_layer() for _ in range(n_layers)], "ln_f": ln(),
                    # weight tying: lm_head uses the same values as tok_emb,
                    # pre-transposed once to a lane-friendly (D, V) layout.
                    "lm_head_w": dec_tok.T,
                    "lm_head_b": zeros((vocab,))},
    }


# --------------------------------------------------------------------------- #
if __name__ == "__main__":
    VOCAB = 128          # 128-multiple -> lane-dense logits
    D_MODEL = 256
    N_HEADS = 2          # head_dim = 128 -> lane-dense head-major tiles
    N_LAYERS = 2
    BLOCK = 8
    D_FF = 512
    BATCH = 2
    SEQ = 8
    PAD_ID, SOS_ID, EOS_ID = 0, 1, 2

    root = jax.random.PRNGKey(0)
    kp, kx, kt = jax.random.split(root, 3)
    params = init_params(kp, vocab=VOCAB, d_model=D_MODEL, n_layers=N_LAYERS,
                         d_ff=D_FF, block_size=BLOCK, n_heads=N_HEADS)

    x_tokens = jax.random.randint(kx, (BATCH, SEQ), 3, VOCAB, dtype=jnp.int32)
    targets = jax.random.randint(kt, (BATCH, SEQ), 3, VOCAB, dtype=jnp.int32)
    # put some padding at the tail of the second sequence (never at position 0)
    x_tokens = x_tokens.at[1, -2:].set(PAD_ID)
    targets = targets.at[1, -2:].set(PAD_ID)

    fwd = jax.jit(
        functools.partial(encoder_decoder_forward, n_heads=N_HEADS,
                          sos_id=SOS_ID, pad_id=PAD_ID)
    )
    logits = fwd(x_tokens, targets, params)
    logits = jax.block_until_ready(logits)

    assert logits.shape == (BATCH, SEQ, VOCAB), logits.shape
    assert logits.dtype == jnp.float32
    assert bool(jnp.all(jnp.isfinite(logits)))
    print("KERNEL_OK")
</pallas_src>

<mosaic_0001>
module attributes {stable_mosaic.version = 11 : i64} {
  func.func @_ln_matmul_heads_kernel(%arg0: i32, %arg1: i32, %arg2: memref<16x256xbf16, #tpu.memory_space<vmem>>, %arg3: memref<1x256xf32, #tpu.memory_space<vmem>>, %arg4: memref<1x256xf32, #tpu.memory_space<vmem>>, %arg5: memref<1x256x128xbf16, #tpu.memory_space<vmem>>, %arg6: memref<1x1x128xf32, #tpu.memory_space<vmem>>, %arg7: memref<1x16x128xbf16, #tpu.memory_space<vmem>>, %arg8: memref<16x256xbf16, #tpu.memory_space<vmem>>) attributes {dimension_semantics = [#tpu.dimension_semantics<parallel>, #tpu.dimension_semantics<arbitrary>], iteration_bounds = array<i64: 1, 6>, scalar_prefetch = 0 : i64, scratch_operands = 1 : i64, tpu.core_type = #tpu.core_type<tc>, window_params = [{transform_indices = @transform_0, window_bounds = array<i64: 16, 256>}, {pipeline_mode = #tpu.pipeline_mode<synchronous>, transform_indices = @transform_1, window_bounds = array<i64: 1, 256>}, {pipeline_mode = #tpu.pipeline_mode<synchronous>, transform_indices = @transform_2, window_bounds = array<i64: 1, 256>}, {transform_indices = @transform_3, window_bounds = array<i64: 1, 256, 128>}, {transform_indices = @transform_4, window_bounds = array<i64: 1, 1, 128>}, {transform_indices = @transform_5, window_bounds = array<i64: 1, 16, 128>}]} {
    %c0_i32 = arith.constant 0 : i32
    %0 = arith.cmpi eq, %arg1, %c0_i32 : i32
    %1 = arith.extui %0 : i1 to i32
    %c0_i32_0 = arith.constant 0 : i32
    %2 = arith.cmpi ne, %1, %c0_i32_0 : i32
    scf.if %2 {
      %c0_11 = arith.constant 0 : index
      %c0_12 = arith.constant 0 : index
      %15 = vector.load %arg2[%c0_11, %c0_12] : memref<16x256xbf16, #tpu.memory_space<vmem>>, vector<16x256xbf16>
      %16 = arith.extf %15 : vector<16x256xbf16> to vector<16x256xf32>
      %cst_13 = arith.constant dense<0.000000e+00> : vector<16xf32>
      %17 = vector.multi_reduction <add>, %16, %cst_13 [1] : vector<16x256xf32> to vector<16xf32>
      %18 = vector.shape_cast %17 : vector<16xf32> to vector<16x1xf32>
      %cst_14 = arith.constant 2.560000e+02 : f32
      %19 = vector.broadcast %cst_14 : f32 to vector<16x1xf32>
      %20 = arith.divf %18, %19 : vector<16x1xf32>
      %21 = vector.broadcast %20 : vector<16x1xf32> to vector<16x256xf32>
      %22 = arith.subf %16, %21 : vector<16x256xf32>
      %23 = arith.mulf %22, %22 : vector<16x256xf32>
      %cst_15 = arith.constant dense<0.000000e+00> : vector<16xf32>
      %24 = vector.multi_reduction <add>, %23, %cst_15 [1] : vector<16x256xf32> to vector<16xf32>
      %25 = vector.shape_cast %24 : vector<16xf32> to vector<16x1xf32>
      %cst_16 = arith.constant 2.560000e+02 : f32
      %26 = vector.broadcast %cst_16 : f32 to vector<16x1xf32>
      %27 = arith.divf %25, %26 : vector<16x1xf32>
      %cst_17 = arith.constant 9.99999974E-6 : f32
      %28 = vector.broadcast %cst_17 : f32 to vector<16x1xf32>
      %29 = arith.addf %27, %28 : vector<16x1xf32>
      %30 = math.rsqrt %29 : vector<16x1xf32>
      %31 = vector.broadcast %30 : vector<16x1xf32> to vector<16x256xf32>
      %32 = arith.mulf %22, %31 : vector<16x256xf32>
      %c0_18 = arith.constant 0 : index
      %c0_19 = arith.constant 0 : index
      %33 = vector.load %arg3[%c0_18, %c0_19] : memref<1x256xf32, #tpu.memory_space<vmem>>, vector<1x256xf32>
      %34 = vector.broadcast %33 : vector<1x256xf32> to vector<16x256xf32>
      %35 = arith.mulf %32, %34 : vector<16x256xf32>
      %c0_20 = arith.constant 0 : index
      %c0_21 = arith.constant 0 : index
      %36 = vector.load %arg4[%c0_20, %c0_21] : memref<1x256xf32, #tpu.memory_space<vmem>>, vector<1x256xf32>
      %37 = vector.broadcast %36 : vector<1x256xf32> to vector<16x256xf32>
      %38 = arith.addf %35, %37 : vector<16x256xf32>
      %39 = arith.truncf %38 : vector<16x256xf32> to vector<16x256xbf16>
      %c0_22 = arith.constant 0 : index
      %c0_23 = arith.constant 0 : index
      %40 = vector.load %arg8[%c0_22, %c0_23] : memref<16x256xbf16, #tpu.memory_space<vmem>>, vector<16x256xbf16>
      tpu.vector_store %arg8[%c0_22, %c0_23], %39 {strides = array<i32>} : memref<16x256xbf16, #tpu.memory_space<vmem>>, vector<16x256xbf16>,
    } else {
    }
    %c0 = arith.constant 0 : index
    %c0_1 = arith.constant 0 : index
    %3 = vector.load %arg8[%c0, %c0_1] : memref<16x256xbf16, #tpu.memory_space<vmem>>, vector<16x256xbf16>
    %c0_2 = arith.constant 0 : index
    %c0_3 = arith.constant 0 : index
    %c0_4 = arith.constant 0 : index
    %4 = vector.load %arg5[%c0_2, %c0_3, %c0_4] : memref<1x256x128xbf16, #tpu.memory_space<vmem>>, vector<1x256x128xbf16>
    %5 = vector.shape_cast %4 : vector<1x256x128xbf16> to vector<256x128xbf16>
    %cst = arith.constant dense<0.000000e+00> : vector<16x128xf32>
    %6 = tpu.matmul %3, %5, %cst {dimension_numbers = #tpu.dot_dimension_numbers<[1], [0], [0], [1], [0, 0, 1, 1], [], []>} : vector<16x256xbf16>, vector<256x128xbf16>, vector<16x128xf32> -> vector<16x128xf32>
    %c0_5 = arith.constant 0 : index
    %c0_6 = arith.constant 0 : index
    %c0_7 = arith.constant 0 : index
    %7 = vector.load %arg6[%c0_5, %c0_6, %c0_7] : memref<1x1x128xf32, #tpu.memory_space<vmem>>, vector<1x1x128xf32>
    %8 = vector.shape_cast %7 : vector<1x1x128xf32> to vector<1x128xf32>
    %9 = vector.broadcast %8 : vector<1x128xf32> to vector<16x128xf32>
    %10 = arith.addf %6, %9 : vector<16x128xf32>
    %11 = arith.truncf %10 : vector<16x128xf32> to vector<16x128xbf16>
    %c0_8 = arith.constant 0 : index
    %c0_9 = arith.constant 0 : index
    %c0_10 = arith.constant 0 : index
    %12 = vector.load %arg7[%c0_8, %c0_9, %c0_10] : memref<1x16x128xbf16, #tpu.memory_space<vmem>>, vector<1x16x128xbf16>
    %13 = vector.shape_cast %12 : vector<1x16x128xbf16> to vector<16x128xbf16>
    %14 = vector.shape_cast %11 : vector<16x128xbf16> to vector<1x16x128xbf16>
    tpu.vector_store %arg7[%c0_8, %c0_9, %c0_10], %14 {strides = array<i32>} : memref<1x16x128xbf16, #tpu.memory_space<vmem>>, vector<1x16x128xbf16>,
    return
  }
  func.func @transform_0(%arg0: i32, %arg1: i32) -> (i32, i32) {
    %c0_i32 = arith.constant 0 : i32
    %c0_i32_0 = arith.constant 0 : i32
    return %arg0, %c0_i32 : i32, i32
  }
  func.func @transform_1(%arg0: i32, %arg1: i32) -> (i32, i32) {
    %c0_i32 = arith.constant 0 : i32
    %c0_i32_0 = arith.constant 0 : i32
    %c0_i32_1 = arith.constant 0 : i32
    return %c0_i32, %c0_i32_0 : i32, i32
  }
  func.func @transform_2(%arg0: i32, %arg1: i32) -> (i32, i32) {
    %c0_i32 = arith.constant 0 : i32
    %c0_i32_0 = arith.constant 0 : i32
    %c0_i32_1 = arith.constant 0 : i32
    return %c0_i32, %c0_i32_0 : i32, i32
  }
  func.func @transform_3(%arg0: i32, %arg1: i32) -> (i32, i32, i32) {
    %c0_i32 = arith.constant 0 : i32
    %c0_i32_0 = arith.constant 0 : i32
    %c0_i32_1 = arith.constant 0 : i32
    return %arg1, %c0_i32, %c0_i32_0 : i32, i32, i32
  }
  func.func @transform_4(%arg0: i32, %arg1: i32) -> (i32, i32, i32) {
    %c0_i32 = arith.constant 0 : i32
    %c0_i32_0 = arith.constant 0 : i32
    %c0_i32_1 = arith.constant 0 : i32
    return %arg1, %c0_i32, %c0_i32_0 : i32, i32, i32
  }
  func.func @transform_5(%arg0: i32, %arg1: i32) -> (i32, i32, i32) {
    %c0_i32 = arith.constant 0 : i32
    %c0_i32_0 = arith.constant 0 : i32
    return %arg1, %arg0, %c0_i32 : i32, i32, i32
  }
}

module attributes {stable_mosaic.version = 11 : i64} {
  func.func @_matmul_resid_kernel(%arg0: i32, %arg1: i32, %arg2: i32, %arg3: memref<1x16x128xbf16, #tpu.memory_space<vmem>>, %arg4: memref<1x128x256xbf16, #tpu.memory_space<vmem>>, %arg5: memref<1x256xf32, #tpu.memory_space<vmem>>, %arg6: memref<16x256xbf16, #tpu.memory_space<vmem>>, %arg7: memref<16x256xbf16, #tpu.memory_space<vmem>>, %arg8: memref<16x256xf32, #tpu.memory_space<vmem>>) attributes {dimension_semantics = [#tpu.dimension_semantics<parallel>, #tpu.dimension_semantics<parallel>, #tpu.dimension_semantics<arbitrary>], iteration_bounds = array<i64: 1, 1, 2>, scalar_prefetch = 0 : i64, scratch_operands = 1 : i64, tpu.core_type = #tpu.core_type<tc>, window_params = [{transform_indices = @transform_0, window_bounds = array<i64: 1, 16, 128>}, {transform_indices = @transform_1, window_bounds = array<i64: 1, 128, 256>}, {transform_indices = @transform_2, window_bounds = array<i64: 1, 256>}, {transform_indices = @transform_3, window_bounds = array<i64: 16, 256>}, {transform_indices = @transform_4, window_bounds = array<i64: 16, 256>}]} {
    %c0_i32 = arith.constant 0 : i32
    %0 = arith.cmpi eq, %arg2, %c0_i32 : i32
    %1 = arith.extui %0 : i1 to i32
    %c0_i32_0 = arith.constant 0 : i32
    %2 = arith.cmpi ne, %1, %c0_i32_0 : i32
    scf.if %2 {
      %cst_11 = arith.constant 0.000000e+00 : f32
      %14 = vector.broadcast %cst_11 : f32 to vector<16x256xf32>
      %c0_12 = arith.constant 0 : index
      %c0_13 = arith.constant 0 : index
      %15 = vector.load %arg8[%c0_12, %c0_13] : memref<16x256xf32, #tpu.memory_space<vmem>>, vector<16x256xf32>
      tpu.vector_store %arg8[%c0_12, %c0_13], %14 {strides = array<i32>} : memref<16x256xf32, #tpu.memory_space<vmem>>, vector<16x256xf32>,
    } else {
    }
    %c0 = arith.constant 0 : index
    %c0_1 = arith.constant 0 : index
    %3 = vector.load %arg8[%c0, %c0_1] : memref<16x256xf32, #tpu.memory_space<vmem>>, vector<16x256xf32>
    %c0_2 = arith.constant 0 : index
    %c0_3 = arith.constant 0 : index
    %c0_4 = arith.constant 0 : index
    %4 = vector.load %arg3[%c0_2, %c0_3, %c0_4] : memref<1x16x128xbf16, #tpu.memory_space<vmem>>, vector<1x16x128xbf16>
    %5 = vector.shape_cast %4 : vector<1x16x128xbf16> to vector<16x128xbf16>
    %c0_5 = arith.constant 0 : index
    %c0_6 = arith.constant 0 : index
    %c0_7 = arith.constant 0 : index
    %6 = vector.load %arg4[%c0_5, %c0_6, %c0_7] : memref<1x128x256xbf16, #tpu.memory_space<vmem>>, vector<1x128x256xbf16>
    %7 = vector.shape_cast %6 : vector<1x128x256xbf16> to vector<128x256xbf16>
    %cst = arith.constant dense<0.000000e+00> : vector<16x256xf32>
    %8 = tpu.matmul %5, %7, %cst {dimension_numbers = #tpu.dot_dimension_numbers<[1], [0], [0], [1], [0, 0, 1, 1], [], []>} : vector<16x128xbf16>, vector<128x256xbf16>, vector<16x256xf32> -> vector<16x256xf32>
    %9 = arith.addf %3, %8 : vector<16x256xf32>
    %c0_8 = arith.constant 0 : index
    %c0_9 = arith.constant 0 : index
    %10 = vector.load %arg8[%c0_8, %c0_9] : memref<16x256xf32, #tpu.memory_space<vmem>>, vector<16x256xf32>
    tpu.vector_store %arg8[%c0_8, %c0_9], %9 {strides = array<i32>} : memref<16x256xf32, #tpu.memory_space<vmem>>, vector<16x256xf32>,
    %c1_i32 = arith.constant 1 : i32
    %11 = arith.cmpi eq, %arg2, %c1_i32 : i32
    %12 = arith.extui %11 : i1 to i32
    %c0_i32_10 = arith.constant 0 : i32
    %13 = arith.cmpi ne, %12, %c0_i32_10 : i32
    scf.if %13 {
      %c0_11 = arith.constant 0 : index
      %c0_12 = arith.constant 0 : index
      %14 = vector.load %arg8[%c0_11, %c0_12] : memref<16x256xf32, #tpu.memory_space<vmem>>, vector<16x256xf32>
      %c0_13 = arith.constant 0 : index
      %c0_14 = arith.constant 0 : index
      %15 = vector.load %arg5[%c0_13, %c0_14] : memref<1x256xf32, #tpu.memory_space<vmem>>, vector<1x256xf32>
      %16 = vector.broadcast %15 : vector<1x256xf32> to vector<16x256xf32>
      %17 = arith.addf %14, %16 : vector<16x256xf32>
      %c0_15 = arith.constant 0 : index
      %c0_16 = arith.constant 0 : index
      %18 = vector.load %arg6[%c0_15, %c0_16] : memref<16x256xbf16, #tpu.memory_space<vmem>>, vector<16x256xbf16>
      %19 = arith.extf %18 : vector<16x256xbf16> to vector<16x256xf32>
      %20 = arith.addf %17, %19 : vector<16x256xf32>
      %21 = arith.truncf %20 : vector<16x256xf32> to vector<16x256xbf16>
      %c0_17 = arith.constant 0 : index
      %c0_18 = arith.constant 0 : index
      %22 = vector.load %arg7[%c0_17, %c0_18] : memref<16x256xbf16, #tpu.memory_space<vmem>>, vector<16x256xbf16>
      tpu.vector_store %arg7[%c0_17, %c0_18], %21 {strides = array<i32>} : memref<16x256xbf16, #tpu.memory_space<vmem>>, vector<16x256xbf16>,
    } else {
    }
    return
  }
  func.func @transform_0(%arg0: i32, %arg1: i32, %arg2: i32) -> (i32, i32, i32) {
    %c0_i32 = arith.constant 0 : i32
    %c0_i32_0 = arith.constant 0 : i32
    return %arg2, %arg0, %c0_i32 : i32, i32, i32
  }
  func.func @transform_1(%arg0: i32, %arg1: i32, %arg2: i32) -> (i32, i32, i32) {
    %c0_i32 = arith.constant 0 : i32
    %c0_i32_0 = arith.constant 0 : i32
    return %arg2, %c0_i32, %arg1 : i32, i32, i32
  }
  func.func @transform_2(%arg0: i32, %arg1: i32, %arg2: i32) -> (i32, i32) {
    %c0_i32 = arith.constant 0 : i32
    %c0_i32_0 = arith.constant 0 : i32
    return %c0_i32, %arg1 : i32, i32
  }
  func.func @transform_3(%arg0: i32, %arg1: i32, %arg2: i32) -> (i32, i32) {
    %c0_i32 = arith.constant 0 : i32
    return %arg0, %arg1 : i32, i32
  }
  func.func @transform_4(%arg0: i32, %arg1: i32, %arg2: i32) -> (i32, i32) {
    %c0_i32 = arith.constant 0 : i32
    return %arg0, %arg1 : i32, i32
  }
}

module attributes {stable_mosaic.version = 11 : i64} {
  func.func @_attn_kernel(%arg0: i32, %arg1: i32, %arg2: memref<1x8x128xbf16, #tpu.memory_space<vmem>>, %arg3: memref<1x8x128xbf16, #tpu.memory_space<vmem>>, %arg4: memref<1x8x128xbf16, #tpu.memory_space<vmem>>, %arg5: memref<1x1x8xf32, #tpu.memory_space<vmem>>, %arg6: memref<1x8x128xbf16, #tpu.memory_space<vmem>>) attributes {dimension_semantics = [#tpu.dimension_semantics<parallel>, #tpu.dimension_semantics<parallel>], iteration_bounds = array<i64: 2, 2>, scalar_prefetch = 0 : i64, scratch_operands = 0 : i64, tpu.core_type = #tpu.core_type<tc>, window_params = [{transform_indices = @transform_0, window_bounds = array<i64: 1, 8, 128>}, {transform_indices = @transform_1, window_bounds = array<i64: 1, 8, 128>}, {transform_indices = @transform_2, window_bounds = array<i64: 1, 8, 128>}, {transform_indices = @transform_3, window_bounds = array<i64: 1, 1, 8>}, {transform_indices = @transform_4, window_bounds = array<i64: 1, 8, 128>}]} {
    %c0 = arith.constant 0 : index
    %c0_0 = arith.constant 0 : index
    %c0_1 = arith.constant 0 : index
    %0 = vector.load %arg2[%c0, %c0_0, %c0_1] : memref<1x8x128xbf16, #tpu.memory_space<vmem>>, vector<1x8x128xbf16>
    %1 = vector.shape_cast %0 : vector<1x8x128xbf16> to vector<8x128xbf16>
    %2 = arith.extf %1 : vector<8x128xbf16> to vector<8x128xf32>
    %cst = arith.constant 0.0883883461 : f32
    %3 = vector.broadcast %cst : f32 to vector<8x128xf32>
    %4 = arith.mulf %2, %3 : vector<8x128xf32>
    %5 = arith.truncf %4 : vector<8x128xf32> to vector<8x128xbf16>
    %c0_2 = arith.constant 0 : index
    %c0_3 = arith.constant 0 : index
    %c0_4 = arith.constant 0 : index
    %6 = vector.load %arg3[%c0_2, %c0_3, %c0_4] : memref<1x8x128xbf16, #tpu.memory_space<vmem>>, vector<1x8x128xbf16>
    %7 = vector.shape_cast %6 : vector<1x8x128xbf16> to vector<8x128xbf16>
    %c0_5 = arith.constant 0 : index
    %c0_6 = arith.constant 0 : index
    %c0_7 = arith.constant 0 : index
    %8 = vector.load %arg4[%c0_5, %c0_6, %c0_7] : memref<1x8x128xbf16, #tpu.memory_space<vmem>>, vector<1x8x128xbf16>
    %9 = vector.shape_cast %8 : vector<1x8x128xbf16> to vector<8x128xbf16>
    %cst_8 = arith.constant dense<0.000000e+00> : vector<8x8xf32>
    %10 = tpu.matmul %5, %7, %cst_8 {dimension_numbers = #tpu.dot_dimension_numbers<[1], [1], [0], [0], [0, 0, 1, 0], [], []>} : vector<8x128xbf16>, vector<8x128xbf16>, vector<8x8xf32> -> vector<8x8xf32>
    %c0_9 = arith.constant 0 : index
    %c0_10 = arith.constant 0 : index
    %c0_11 = arith.constant 0 : index
    %11 = vector.load %arg5[%c0_9, %c0_10, %c0_11] : memref<1x1x8xf32, #tpu.memory_space<vmem>>, vector<1x1x8xf32>
    %12 = vector.shape_cast %11 : vector<1x1x8xf32> to vector<1x8xf32>
    %13 = vector.broadcast %12 : vector<1x8xf32> to vector<8x8xf32>
    %14 = arith.addf %10, %13 : vector<8x8xf32>
    %15 = tpu.iota {dimensions = array<i32: 0>} : vector<8x8xi32>
    %16 = tpu.iota {dimensions = array<i32: 1>} : vector<8x8xi32>
    %17 = arith.cmpi sle, %16, %15 : vector<8x8xi32>
    %cst_12 = arith.constant -1.000000e+09 : f32
    %18 = vector.broadcast %cst_12 : f32 to vector<8x8xf32>
    %19 = arith.select %17, %14, %18 : vector<8x8xi1>, vector<8x8xf32>
    %cst_13 = arith.constant dense<0xFF800000> : vector<8xf32>
    %20 = vector.multi_reduction <maximumf>, %19, %cst_13 [1] : vector<8x8xf32> to vector<8xf32>
    %21 = vector.shape_cast %20 : vector<8xf32> to vector<8x1xf32>
    %22 = vector.broadcast %21 : vector<8x1xf32> to vector<8x8xf32>
    %23 = arith.subf %19, %22 : vector<8x8xf32>
    %24 = math.exp %23 : vector<8x8xf32>
    %cst_14 = arith.constant dense<0.000000e+00> : vector<8xf32>
    %25 = vector.multi_reduction <add>, %24, %cst_14 [1] : vector<8x8xf32> to vector<8xf32>
    %26 = vector.shape_cast %25 : vector<8xf32> to vector<8x1xf32>
    %27 = arith.truncf %24 : vector<8x8xf32> to vector<8x8xbf16>
    %cst_15 = arith.constant dense<0.000000e+00> : vector<8x128xf32>
    %28 = tpu.matmul %27, %9, %cst_15 {dimension_numbers = #tpu.dot_dimension_numbers<[1], [0], [0], [1], [0, 0, 1, 1], [], []>} : vector<8x8xbf16>, vector<8x128xbf16>, vector<8x128xf32> -> vector<8x128xf32>
    %29 = tpu.reciprocal %26 {approx = true} : vector<8x1xf32> -> vector<8x1xf32>
    %30 = vector.broadcast %29 : vector<8x1xf32> to vector<8x128xf32>
    %31 = arith.mulf %28, %30 : vector<8x128xf32>
    %32 = arith.truncf %31 : vector<8x128xf32> to vector<8x128xbf16>
    %c0_16 = arith.constant 0 : index
    %c0_17 = arith.constant 0 : index
    %c0_18 = arith.constant 0 : index
    %33 = vector.load %arg6[%c0_16, %c0_17, %c0_18] : memref<1x8x128xbf16, #tpu.memory_space<vmem>>, vector<1x8x128xbf16>
    %34 = vector.shape_cast %33 : vector<1x8x128xbf16> to vector<8x128xbf16>
    %35 = vector.shape_cast %32 : vector<8x128xbf16> to vector<1x8x128xbf16>
    tpu.vector_store %arg6[%c0_16, %c0_17, %c0_18], %35 {strides = array<i32>} : memref<1x8x128xbf16, #tpu.memory_space<vmem>>, vector<1x8x128xbf16>,
    return
  }
  func.func @transform_0(%arg0: i32, %arg1: i32) -> (i32, i32, i32) {
    %c0_i32 = arith.constant 0 : i32
    %0 = arith.addi %c0_i32, %arg1 : i32
    %c0_i32_0 = arith.constant 0 : i32
    %c0_i32_1 = arith.constant 0 : i32
    return %0, %arg0, %c0_i32_0 : i32, i32, i32
  }
  func.func @transform_1(%arg0: i32, %arg1: i32) -> (i32, i32, i32) {
    %c2_i32 = arith.constant 2 : i32
    %0 = arith.addi %c2_i32, %arg1 : i32
    %c0_i32 = arith.constant 0 : i32
    %c0_i32_0 = arith.constant 0 : i32
    return %0, %arg0, %c0_i32 : i32, i32, i32
  }
  func.func @transform_2(%arg0: i32, %arg1: i32) -> (i32, i32, i32) {
    %c4_i32 = arith.constant 4 : i32
    %0 = arith.addi %c4_i32, %arg1 : i32
    %c0_i32 = arith.constant 0 : i32
    %c0_i32_0 = arith.constant 0 : i32
    return %0, %arg0, %c0_i32 : i32, i32, i32
  }
  func.func @transform_3(%arg0: i32, %arg1: i32) -> (i32, i32, i32) {
    %c0_i32 = arith.constant 0 : i32
    %c0_i32_0 = arith.constant 0 : i32
    %c0_i32_1 = arith.constant 0 : i32
    return %arg0, %c0_i32, %c0_i32_0 : i32, i32, i32
  }
  func.func @transform_4(%arg0: i32, %arg1: i32) -> (i32, i32, i32) {
    %c0_i32 = arith.constant 0 : i32
    %c0_i32_0 = arith.constant 0 : i32
    return %arg1, %arg0, %c0_i32 : i32, i32, i32
  }
}

module attributes {stable_mosaic.version = 11 : i64} {
  func.func @_ln_matmul_heads_kernel(%arg0: i32, %arg1: i32, %arg2: memref<16x256xbf16, #tpu.memory_space<vmem>>, %arg3: memref<1x256xf32, #tpu.memory_space<vmem>>, %arg4: memref<1x256xf32, #tpu.memory_space<vmem>>, %arg5: memref<1x256x128xbf16, #tpu.memory_space<vmem>>, %arg6: memref<1x1x128xf32, #tpu.memory_space<vmem>>, %arg7: memref<1x16x128xbf16, #tpu.memory_space<vmem>>, %arg8: memref<16x256xbf16, #tpu.memory_space<vmem>>) attributes {dimension_semantics = [#tpu.dimension_semantics<parallel>, #tpu.dimension_semantics<arbitrary>], iteration_bounds = array<i64: 1, 2>, scalar_prefetch = 0 : i64, scratch_operands = 1 : i64, tpu.core_type = #tpu.core_type<tc>, window_params = [{transform_indices = @transform_0, window_bounds = array<i64: 16, 256>}, {pipeline_mode = #tpu.pipeline_mode<synchronous>, transform_indices = @transform_1, window_bounds = array<i64: 1, 256>}, {pipeline_mode = #tpu.pipeline_mode<synchronous>, transform_indices = @transform_2, window_bounds = array<i64: 1, 256>}, {transform_indices = @transform_3, window_bounds = array<i64: 1, 256, 128>}, {transform_indices = @transform_4, window_bounds = array<i64: 1, 1, 128>}, {transform_indices = @transform_5, window_bounds = array<i64: 1, 16, 128>}]} {
    %c0_i32 = arith.constant 0 : i32
    %0 = arith.cmpi eq, %arg1, %c0_i32 : i32
    %1 = arith.extui %0 : i1 to i32
    %c0_i32_0 = arith.constant 0 : i32
    %2 = arith.cmpi ne, %1, %c0_i32_0 : i32
    scf.if %2 {
      %c0_11 = arith.constant 0 : index
      %c0_12 = arith.constant 0 : index
      %15 = vector.load %arg2[%c0_11, %c0_12] : memref<16x256xbf16, #tpu.memory_space<vmem>>, vector<16x256xbf16>
      %16 = arith.extf %15 : vector<16x256xbf16> to vector<16x256xf32>
      %cst_13 = arith.constant dense<0.000000e+00> : vector<16xf32>
      %17 = vector.multi_reduction <add>, %16, %cst_13 [1] : vector<16x256xf32> to vector<16xf32>
      %18 = vector.shape_cast %17 : vector<16xf32> to vector<16x1xf32>
      %cst_14 = arith.constant 2.560000e+02 : f32
      %19 = vector.broadcast %cst_14 : f32 to vector<16x1xf32>
      %20 = arith.divf %18, %19 : vector<16x1xf32>
      %21 = vector.broadcast %20 : vector<16x1xf32> to vector<16x256xf32>
      %22 = arith.subf %16, %21 : vector<16x256xf32>
      %23 = arith.mulf %22, %22 : vector<16x256xf32>
      %cst_15 = arith.constant dense<0.000000e+00> : vector<16xf32>
      %24 = vector.multi_reduction <add>, %23, %cst_15 [1] : vector<16x256xf32> to vector<16xf32>
      %25 = vector.shape_cast %24 : vector<16xf32> to vector<16x1xf32>
      %cst_16 = arith.constant 2.560000e+02 : f32
      %26 = vector.broadcast %cst_16 : f32 to vector<16x1xf32>
      %27 = arith.divf %25, %26 : vector<16x1xf32>
      %cst_17 = arith.constant 9.99999974E-6 : f32
      %28 = vector.broadcast %cst_17 : f32 to vector<16x1xf32>
      %29 = arith.addf %27, %28 : vector<16x1xf32>
      %30 = math.rsqrt %29 : vector<16x1xf32>
      %31 = vector.broadcast %30 : vector<16x1xf32> to vector<16x256xf32>
      %32 = arith.mulf %22, %31 : vector<16x256xf32>
      %c0_18 = arith.constant 0 : index
      %c0_19 = arith.constant 0 : index
      %33 = vector.load %arg3[%c0_18, %c0_19] : memref<1x256xf32, #tpu.memory_space<vmem>>, vector<1x256xf32>
      %34 = vector.broadcast %33 : vector<1x256xf32> to vector<16x256xf32>
      %35 = arith.mulf %32, %34 : vector<16x256xf32>
      %c0_20 = arith.constant 0 : index
      %c0_21 = arith.constant 0 : index
      %36 = vector.load %arg4[%c0_20, %c0_21] : memref<1x256xf32, #tpu.memory_space<vmem>>, vector<1x256xf32>
      %37 = vector.broadcast %36 : vector<1x256xf32> to vector<16x256xf32>
      %38 = arith.addf %35, %37 : vector<16x256xf32>
      %39 = arith.truncf %38 : vector<16x256xf32> to vector<16x256xbf16>
      %c0_22 = arith.constant 0 : index
      %c0_23 = arith.constant 0 : index
      %40 = vector.load %arg8[%c0_22, %c0_23] : memref<16x256xbf16, #tpu.memory_space<vmem>>, vector<16x256xbf16>
      tpu.vector_store %arg8[%c0_22, %c0_23], %39 {strides = array<i32>} : memref<16x256xbf16, #tpu.memory_space<vmem>>, vector<16x256xbf16>,
    } else {
    }
    %c0 = arith.constant 0 : index
    %c0_1 = arith.constant 0 : index
    %3 = vector.load %arg8[%c0, %c0_1] : memref<16x256xbf16, #tpu.memory_space<vmem>>, vector<16x256xbf16>
    %c0_2 = arith.constant 0 : index
    %c0_3 = arith.constant 0 : index
    %c0_4 = arith.constant 0 : index
    %4 = vector.load %arg5[%c0_2, %c0_3, %c0_4] : memref<1x256x128xbf16, #tpu.memory_space<vmem>>, vector<1x256x128xbf16>
    %5 = vector.shape_cast %4 : vector<1x256x128xbf16> to vector<256x128xbf16>
    %cst = arith.constant dense<0.000000e+00> : vector<16x128xf32>
    %6 = tpu.matmul %3, %5, %cst {dimension_numbers = #tpu.dot_dimension_numbers<[1], [0], [0], [1], [0, 0, 1, 1], [], []>} : vector<16x256xbf16>, vector<256x128xbf16>, vector<16x128xf32> -> vector<16x128xf32>
    %c0_5 = arith.constant 0 : index
    %c0_6 = arith.constant 0 : index
    %c0_7 = arith.constant 0 : index
    %7 = vector.load %arg6[%c0_5, %c0_6, %c0_7] : memref<1x1x128xf32, #tpu.memory_space<vmem>>, vector<1x1x128xf32>
    %8 = vector.shape_cast %7 : vector<1x1x128xf32> to vector<1x128xf32>
    %9 = vector.broadcast %8 : vector<1x128xf32> to vector<16x128xf32>
    %10 = arith.addf %6, %9 : vector<16x128xf32>
    %11 = arith.truncf %10 : vector<16x128xf32> to vector<16x128xbf16>
    %c0_8 = arith.constant 0 : index
    %c0_9 = arith.constant 0 : index
    %c0_10 = arith.constant 0 : index
    %12 = vector.load %arg7[%c0_8, %c0_9, %c0_10] : memref<1x16x128xbf16, #tpu.memory_space<vmem>>, vector<1x16x128xbf16>
    %13 = vector.shape_cast %12 : vector<1x16x128xbf16> to vector<16x128xbf16>
    %14 = vector.shape_cast %11 : vector<16x128xbf16> to vector<1x16x128xbf16>
    tpu.vector_store %arg7[%c0_8, %c0_9, %c0_10], %14 {strides = array<i32>} : memref<1x16x128xbf16, #tpu.memory_space<vmem>>, vector<1x16x128xbf16>,
    return
  }
  func.func @transform_0(%arg0: i32, %arg1: i32) -> (i32, i32) {
    %c0_i32 = arith.constant 0 : i32
    %c0_i32_0 = arith.constant 0 : i32
    return %arg0, %c0_i32 : i32, i32
  }
  func.func @transform_1(%arg0: i32, %arg1: i32) -> (i32, i32) {
    %c0_i32 = arith.constant 0 : i32
    %c0_i32_0 = arith.constant 0 : i32
    %c0_i32_1 = arith.constant 0 : i32
    return %c0_i32, %c0_i32_0 : i32, i32
  }
  func.func @transform_2(%arg0: i32, %arg1: i32) -> (i32, i32) {
    %c0_i32 = arith.constant 0 : i32
    %c0_i32_0 = arith.constant 0 : i32
    %c0_i32_1 = arith.constant 0 : i32
    return %c0_i32, %c0_i32_0 : i32, i32
  }
  func.func @transform_3(%arg0: i32, %arg1: i32) -> (i32, i32, i32) {
    %c0_i32 = arith.constant 0 : i32
    %c0_i32_0 = arith.constant 0 : i32
    %c0_i32_1 = arith.constant 0 : i32
    return %arg1, %c0_i32, %c0_i32_0 : i32, i32, i32
  }
  func.func @transform_4(%arg0: i32, %arg1: i32) -> (i32, i32, i32) {
    %c0_i32 = arith.constant 0 : i32
    %c0_i32_0 = arith.constant 0 : i32
    %c0_i32_1 = arith.constant 0 : i32
    return %arg1, %c0_i32, %c0_i32_0 : i32, i32, i32
  }
  func.func @transform_5(%arg0: i32, %arg1: i32) -> (i32, i32, i32) {
    %c0_i32 = arith.constant 0 : i32
    %c0_i32_0 = arith.constant 0 : i32
    return %arg1, %arg0, %c0_i32 : i32, i32, i32
  }
}

module attributes {stable_mosaic.version = 11 : i64} {
  func.func @_matmul_resid_kernel(%arg0: i32, %arg1: i32, %arg2: i32, %arg3: memref<16x512xbf16, #tpu.memory_space<vmem>>, %arg4: memref<512x256xbf16, #tpu.memory_space<vmem>>, %arg5: memref<1x256xf32, #tpu.memory_space<vmem>>, %arg6: memref<16x256xbf16, #tpu.memory_space<vmem>>, %arg7: memref<16x256xbf16, #tpu.memory_space<vmem>>, %arg8: memref<16x256xf32, #tpu.memory_space<vmem>>) attributes {dimension_semantics = [#tpu.dimension_semantics<parallel>, #tpu.dimension_semantics<parallel>, #tpu.dimension_semantics<arbitrary>], iteration_bounds = array<i64: 1, 1, 1>, scalar_prefetch = 0 : i64, scratch_operands = 1 : i64, tpu.core_type = #tpu.core_type<tc>, window_params = [{transform_indices = @transform_0, window_bounds = array<i64: 16, 512>}, {transform_indices = @transform_1, window_bounds = array<i64: 512, 256>}, {transform_indices = @transform_2, window_bounds = array<i64: 1, 256>}, {transform_indices = @transform_3, window_bounds = array<i64: 16, 256>}, {transform_indices = @transform_4, window_bounds = array<i64: 16, 256>}]} {
    %c0_i32 = arith.constant 0 : i32
    %0 = arith.cmpi eq, %arg2, %c0_i32 : i32
    %1 = arith.extui %0 : i1 to i32
    %c0_i32_0 = arith.constant 0 : i32
    %2 = arith.cmpi ne, %1, %c0_i32_0 : i32
    scf.if %2 {
      %cst_10 = arith.constant 0.000000e+00 : f32
      %12 = vector.broadcast %cst_10 : f32 to vector<16x256xf32>
      %c0_11 = arith.constant 0 : index
      %c0_12 = arith.constant 0 : index
      %13 = vector.load %arg8[%c0_11, %c0_12] : memref<16x256xf32, #tpu.memory_space<vmem>>, vector<16x256xf32>
      tpu.vector_store %arg8[%c0_11, %c0_12], %12 {strides = array<i32>} : memref<16x256xf32, #tpu.memory_space<vmem>>, vector<16x256xf32>,
    } else {
    }
    %c0 = arith.constant 0 : index
    %c0_1 = arith.constant 0 : index
    %3 = vector.load %arg8[%c0, %c0_1] : memref<16x256xf32, #tpu.memory_space<vmem>>, vector<16x256xf32>
    %c0_2 = arith.constant 0 : index
    %c0_3 = arith.constant 0 : index
    %4 = vector.load %arg3[%c0_2, %c0_3] : memref<16x512xbf16, #tpu.memory_space<vmem>>, vector<16x512xbf16>
    %c0_4 = arith.constant 0 : index
    %c0_5 = arith.constant 0 : index
    %5 = vector.load %arg4[%c0_4, %c0_5] : memref<512x256xbf16, #tpu.memory_space<vmem>>, vector<512x256xbf16>
    %cst = arith.constant dense<0.000000e+00> : vector<16x256xf32>
    %6 = tpu.matmul %4, %5, %cst {dimension_numbers = #tpu.dot_dimension_numbers<[1], [0], [0], [1], [0, 0, 1, 1], [], []>} : vector<16x512xbf16>, vector<512x256xbf16>, vector<16x256xf32> -> vector<16x256xf32>
    %7 = arith.addf %3, %6 : vector<16x256xf32>
    %c0_6 = arith.constant 0 : index
    %c0_7 = arith.constant 0 : index
    %8 = vector.load %arg8[%c0_6, %c0_7] : memref<16x256xf32, #tpu.memory_space<vmem>>, vector<16x256xf32>
    tpu.vector_store %arg8[%c0_6, %c0_7], %7 {strides = array<i32>} : memref<16x256xf32, #tpu.memory_space<vmem>>, vector<16x256xf32>,
    %c0_i32_8 = arith.constant 0 : i32
    %9 = arith.cmpi eq, %arg2, %c0_i32_8 : i32
    %10 = arith.extui %9 : i1 to i32
    %c0_i32_9 = arith.constant 0 : i32
    %11 = arith.cmpi ne, %10, %c0_i32_9 : i32
    scf.if %11 {
      %c0_10 = arith.constant 0 : index
      %c0_11 = arith.constant 0 : index
      %12 = vector.load %arg8[%c0_10, %c0_11] : memref<16x256xf32, #tpu.memory_space<vmem>>, vector<16x256xf32>
      %c0_12 = arith.constant 0 : index
      %c0_13 = arith.constant 0 : index
      %13 = vector.load %arg5[%c0_12, %c0_13] : memref<1x256xf32, #tpu.memory_space<vmem>>, vector<1x256xf32>
      %14 = vector.broadcast %13 : vector<1x256xf32> to vector<16x256xf32>
      %15 = arith.addf %12, %14 : vector<16x256xf32>
      %c0_14 = arith.constant 0 : index
      %c0_15 = arith.constant 0 : index
      %16 = vector.load %arg6[%c0_14, %c0_15] : memref<16x256xbf16, #tpu.memory_space<vmem>>, vector<16x256xbf16>
      %17 = arith.extf %16 : vector<16x256xbf16> to vector<16x256xf32>
      %18 = arith.addf %15, %17 : vector<16x256xf32>
      %19 = arith.truncf %18 : vector<16x256xf32> to vector<16x256xbf16>
      %c0_16 = arith.constant 0 : index
      %c0_17 = arith.constant 0 : index
      %20 = vector.load %arg7[%c0_16, %c0_17] : memref<16x256xbf16, #tpu.memory_space<vmem>>, vector<16x256xbf16>
      tpu.vector_store %arg7[%c0_16, %c0_17], %19 {strides = array<i32>} : memref<16x256xbf16, #tpu.memory_space<vmem>>, vector<16x256xbf16>,
    } else {
    }
    return
  }
  func.func @transform_0(%arg0: i32, %arg1: i32, %arg2: i32) -> (i32, i32) {
    %c0_i32 = arith.constant 0 : i32
    return %arg0, %arg2 : i32, i32
  }
  func.func @transform_1(%arg0: i32, %arg1: i32, %arg2: i32) -> (i32, i32) {
    %c0_i32 = arith.constant 0 : i32
    return %arg2, %arg1 : i32, i32
  }
  func.func @transform_2(%arg0: i32, %arg1: i32, %arg2: i32) -> (i32, i32) {
    %c0_i32 = arith.constant 0 : i32
    %c0_i32_0 = arith.constant 0 : i32
    return %c0_i32, %arg1 : i32, i32
  }
  func.func @transform_3(%arg0: i32, %arg1: i32, %arg2: i32) -> (i32, i32) {
    %c0_i32 = arith.constant 0 : i32
    return %arg0, %arg1 : i32, i32
  }
  func.func @transform_4(%arg0: i32, %arg1: i32, %arg2: i32) -> (i32, i32) {
    %c0_i32 = arith.constant 0 : i32
    return %arg0, %arg1 : i32, i32
  }
}

module attributes {stable_mosaic.version = 11 : i64} {
  func.func @_ln_matmul_heads_kernel(%arg0: i32, %arg1: i32, %arg2: memref<16x256xbf16, #tpu.memory_space<vmem>>, %arg3: memref<1x256xf32, #tpu.memory_space<vmem>>, %arg4: memref<1x256xf32, #tpu.memory_space<vmem>>, %arg5: memref<1x256x128xbf16, #tpu.memory_space<vmem>>, %arg6: memref<1x1x128xf32, #tpu.memory_space<vmem>>, %arg7: memref<1x16x128xbf16, #tpu.memory_space<vmem>>, %arg8: memref<16x256xbf16, #tpu.memory_space<vmem>>) attributes {dimension_semantics = [#tpu.dimension_semantics<parallel>, #tpu.dimension_semantics<arbitrary>], iteration_bounds = array<i64: 1, 6>, scalar_prefetch = 0 : i64, scratch_operands = 1 : i64, tpu.core_type = #tpu.core_type<tc>, window_params = [{transform_indices = @transform_0, window_bounds = array<i64: 16, 256>}, {pipeline_mode = #tpu.pipeline_mode<synchronous>, transform_indices = @transform_1, window_bounds = array<i64: 1, 256>}, {pipeline_mode = #tpu.pipeline_mode<synchronous>, transform_indices = @transform_2, window_bounds = array<i64: 1, 256>}, {transform_indices = @transform_3, window_bounds = array<i64: 1, 256, 128>}, {transform_indices = @transform_4, window_bounds = array<i64: 1, 1, 128>}, {transform_indices = @transform_5, window_bounds = array<i64: 1, 16, 128>}]} {
    %c0_i32 = arith.constant 0 : i32
    %0 = arith.cmpi eq, %arg1, %c0_i32 : i32
    %1 = arith.extui %0 : i1 to i32
    %c0_i32_0 = arith.constant 0 : i32
    %2 = arith.cmpi ne, %1, %c0_i32_0 : i32
    scf.if %2 {
      %c0_11 = arith.constant 0 : index
      %c0_12 = arith.constant 0 : index
      %15 = vector.load %arg2[%c0_11, %c0_12] : memref<16x256xbf16, #tpu.memory_space<vmem>>, vector<16x256xbf16>
      %16 = arith.extf %15 : vector<16x256xbf16> to vector<16x256xf32>
      %cst_13 = arith.constant dense<0.000000e+00> : vector<16xf32>
      %17 = vector.multi_reduction <add>, %16, %cst_13 [1] : vector<16x256xf32> to vector<16xf32>
      %18 = vector.shape_cast %17 : vector<16xf32> to vector<16x1xf32>
      %cst_14 = arith.constant 2.560000e+02 : f32
      %19 = vector.broadcast %cst_14 : f32 to vector<16x1xf32>
      %20 = arith.divf %18, %19 : vector<16x1xf32>
      %21 = vector.broadcast %20 : vector<16x1xf32> to vector<16x256xf32>
      %22 = arith.subf %16, %21 : vector<16x256xf32>
      %23 = arith.mulf %22, %22 : vector<16x256xf32>
      %cst_15 = arith.constant dense<0.000000e+00> : vector<16xf32>
      %24 = vector.multi_reduction <add>, %23, %cst_15 [1] : vector<16x256xf32> to vector<16xf32>
      %25 = vector.shape_cast %24 : vector<16xf32> to vector<16x1xf32>
      %cst_16 = arith.constant 2.560000e+02 : f32
      %26 = vector.broadcast %cst_16 : f32 to vector<16x1xf32>
      %27 = arith.divf %25, %26 : vector<16x1xf32>
      %cst_17 = arith.constant 9.99999974E-6 : f32
      %28 = vector.broadcast %cst_17 : f32 to vector<16x1xf32>
      %29 = arith.addf %27, %28 : vector<16x1xf32>
      %30 = math.rsqrt %29 : vector<16x1xf32>
      %31 = vector.broadcast %30 : vector<16x1xf32> to vector<16x256xf32>
      %32 = arith.mulf %22, %31 : vector<16x256xf32>
      %c0_18 = arith.constant 0 : index
      %c0_19 = arith.constant 0 : index
      %33 = vector.load %arg3[%c0_18, %c0_19] : memref<1x256xf32, #tpu.memory_space<vmem>>, vector<1x256xf32>
      %34 = vector.broadcast %33 : vector<1x256xf32> to vector<16x256xf32>
      %35 = arith.mulf %32, %34 : vector<16x256xf32>
      %c0_20 = arith.constant 0 : index
      %c0_21 = arith.constant 0 : index
      %36 = vector.load %arg4[%c0_20, %c0_21] : memref<1x256xf32, #tpu.memory_space<vmem>>, vector<1x256xf32>
      %37 = vector.broadcast %36 : vector<1x256xf32> to vector<16x256xf32>
      %38 = arith.addf %35, %37 : vector<16x256xf32>
      %39 = arith.truncf %38 : vector<16x256xf32> to vector<16x256xbf16>
      %c0_22 = arith.constant 0 : index
      %c0_23 = arith.constant 0 : index
      %40 = vector.load %arg8[%c0_22, %c0_23] : memref<16x256xbf16, #tpu.memory_space<vmem>>, vector<16x256xbf16>
      tpu.vector_store %arg8[%c0_22, %c0_23], %39 {strides = array<i32>} : memref<16x256xbf16, #tpu.memory_space<vmem>>, vector<16x256xbf16>,
    } else {
    }
    %c0 = arith.constant 0 : index
    %c0_1 = arith.constant 0 : index
    %3 = vector.load %arg8[%c0, %c0_1] : memref<16x256xbf16, #tpu.memory_space<vmem>>, vector<16x256xbf16>
    %c0_2 = arith.constant 0 : index
    %c0_3 = arith.constant 0 : index
    %c0_4 = arith.constant 0 : index
    %4 = vector.load %arg5[%c0_2, %c0_3, %c0_4] : memref<1x256x128xbf16, #tpu.memory_space<vmem>>, vector<1x256x128xbf16>
    %5 = vector.shape_cast %4 : vector<1x256x128xbf16> to vector<256x128xbf16>
    %cst = arith.constant dense<0.000000e+00> : vector<16x128xf32>
    %6 = tpu.matmul %3, %5, %cst {dimension_numbers = #tpu.dot_dimension_numbers<[1], [0], [0], [1], [0, 0, 1, 1], [], []>} : vector<16x256xbf16>, vector<256x128xbf16>, vector<16x128xf32> -> vector<16x128xf32>
    %c0_5 = arith.constant 0 : index
    %c0_6 = arith.constant 0 : index
    %c0_7 = arith.constant 0 : index
    %7 = vector.load %arg6[%c0_5, %c0_6, %c0_7] : memref<1x1x128xf32, #tpu.memory_space<vmem>>, vector<1x1x128xf32>
    %8 = vector.shape_cast %7 : vector<1x1x128xf32> to vector<1x128xf32>
    %9 = vector.broadcast %8 : vector<1x128xf32> to vector<16x128xf32>
    %10 = arith.addf %6, %9 : vector<16x128xf32>
    %11 = arith.truncf %10 : vector<16x128xf32> to vector<16x128xbf16>
    %c0_8 = arith.constant 0 : index
    %c0_9 = arith.constant 0 : index
    %c0_10 = arith.constant 0 : index
    %12 = vector.load %arg7[%c0_8, %c0_9, %c0_10] : memref<1x16x128xbf16, #tpu.memory_space<vmem>>, vector<1x16x128xbf16>
    %13 = vector.shape_cast %12 : vector<1x16x128xbf16> to vector<16x128xbf16>
    %14 = vector.shape_cast %11 : vector<16x128xbf16> to vector<1x16x128xbf16>
    tpu.vector_store %arg7[%c0_8, %c0_9, %c0_10], %14 {strides = array<i32>} : memref<1x16x128xbf16, #tpu.memory_space<vmem>>, vector<1x16x128xbf16>,
    return
  }
  func.func @transform_0(%arg0: i32, %arg1: i32) -> (i32, i32) {
    %c0_i32 = arith.constant 0 : i32
    %c0_i32_0 = arith.constant 0 : i32
    return %arg0, %c0_i32 : i32, i32
  }
  func.func @transform_1(%arg0: i32, %arg1: i32) -> (i32, i32) {
    %c0_i32 = arith.constant 0 : i32
    %c0_i32_0 = arith.constant 0 : i32
    %c0_i32_1 = arith.constant 0 : i32
    return %c0_i32, %c0_i32_0 : i32, i32
  }
  func.func @transform_2(%arg0: i32, %arg1: i32) -> (i32, i32) {
    %c0_i32 = arith.constant 0 : i32
    %c0_i32_0 = arith.constant 0 : i32
    %c0_i32_1 = arith.constant 0 : i32
    return %c0_i32, %c0_i32_0 : i32, i32
  }
  func.func @transform_3(%arg0: i32, %arg1: i32) -> (i32, i32, i32) {
    %c0_i32 = arith.constant 0 : i32
    %c0_i32_0 = arith.constant 0 : i32
    %c0_i32_1 = arith.constant 0 : i32
    return %arg1, %c0_i32, %c0_i32_0 : i32, i32, i32
  }
  func.func @transform_4(%arg0: i32, %arg1: i32) -> (i32, i32, i32) {
    %c0_i32 = arith.constant 0 : i32
    %c0_i32_0 = arith.constant 0 : i32
    %c0_i32_1 = arith.constant 0 : i32
    return %arg1, %c0_i32, %c0_i32_0 : i32, i32, i32
  }
  func.func @transform_5(%arg0: i32, %arg1: i32) -> (i32, i32, i32) {
    %c0_i32 = arith.constant 0 : i32
    %c0_i32_0 = arith.constant 0 : i32
    return %arg1, %arg0, %c0_i32 : i32, i32, i32
  }
}

module attributes {stable_mosaic.version = 11 : i64} {
  func.func @_attn_kernel(%arg0: i32, %arg1: i32, %arg2: memref<1x8x128xbf16, #tpu.memory_space<vmem>>, %arg3: memref<1x8x128xbf16, #tpu.memory_space<vmem>>, %arg4: memref<1x8x128xbf16, #tpu.memory_space<vmem>>, %arg5: memref<1x1x8xf32, #tpu.memory_space<vmem>>, %arg6: memref<1x8x128xbf16, #tpu.memory_space<vmem>>) attributes {dimension_semantics = [#tpu.dimension_semantics<parallel>, #tpu.dimension_semantics<parallel>], iteration_bounds = array<i64: 2, 2>, scalar_prefetch = 0 : i64, scratch_operands = 0 : i64, tpu.core_type = #tpu.core_type<tc>, window_params = [{transform_indices = @transform_0, window_bounds = array<i64: 1, 8, 128>}, {transform_indices = @transform_1, window_bounds = array<i64: 1, 8, 128>}, {transform_indices = @transform_2, window_bounds = array<i64: 1, 8, 128>}, {transform_indices = @transform_3, window_bounds = array<i64: 1, 1, 8>}, {transform_indices = @transform_4, window_bounds = array<i64: 1, 8, 128>}]} {
    %c0 = arith.constant 0 : index
    %c0_0 = arith.constant 0 : index
    %c0_1 = arith.constant 0 : index
    %0 = vector.load %arg2[%c0, %c0_0, %c0_1] : memref<1x8x128xbf16, #tpu.memory_space<vmem>>, vector<1x8x128xbf16>
    %1 = vector.shape_cast %0 : vector<1x8x128xbf16> to vector<8x128xbf16>
    %2 = arith.extf %1 : vector<8x128xbf16> to vector<8x128xf32>
    %cst = arith.constant 0.0883883461 : f32
    %3 = vector.broadcast %cst : f32 to vector<8x128xf32>
    %4 = arith.mulf %2, %3 : vector<8x128xf32>
    %5 = arith.truncf %4 : vector<8x128xf32> to vector<8x128xbf16>
    %c0_2 = arith.constant 0 : index
    %c0_3 = arith.constant 0 : index
    %c0_4 = arith.constant 0 : index
    %6 = vector.load %arg3[%c0_2, %c0_3, %c0_4] : memref<1x8x128xbf16, #tpu.memory_space<vmem>>, vector<1x8x128xbf16>
    %7 = vector.shape_cast %6 : vector<1x8x128xbf16> to vector<8x128xbf16>
    %c0_5 = arith.constant 0 : index
    %c0_6 = arith.constant 0 : index
    %c0_7 = arith.constant 0 : index
    %8 = vector.load %arg4[%c0_5, %c0_6, %c0_7] : memref<1x8x128xbf16, #tpu.memory_space<vmem>>, vector<1x8x128xbf16>
    %9 = vector.shape_cast %8 : vector<1x8x128xbf16> to vector<8x128xbf16>
    %cst_8 = arith.constant dense<0.000000e+00> : vector<8x8xf32>
    %10 = tpu.matmul %5, %7, %cst_8 {dimension_numbers = #tpu.dot_dimension_numbers<[1], [1], [0], [0], [0, 0, 1, 0], [], []>} : vector<8x128xbf16>, vector<8x128xbf16>, vector<8x8xf32> -> vector<8x8xf32>
    %c0_9 = arith.constant 0 : index
    %c0_10 = arith.constant 0 : index
    %c0_11 = arith.constant 0 : index
    %11 = vector.load %arg5[%c0_9, %c0_10, %c0_11] : memref<1x1x8xf32, #tpu.memory_space<vmem>>, vector<1x1x8xf32>
    %12 = vector.shape_cast %11 : vector<1x1x8xf32> to vector<1x8xf32>
    %13 = vector.broadcast %12 : vector<1x8xf32> to vector<8x8xf32>
    %14 = arith.addf %10, %13 : vector<8x8xf32>
    %cst_12 = arith.constant dense<0xFF800000> : vector<8xf32>
    %15 = vector.multi_reduction <maximumf>, %14, %cst_12 [1] : vector<8x8xf32> to vector<8xf32>
    %16 = vector.shape_cast %15 : vector<8xf32> to vector<8x1xf32>
    %17 = vector.broadcast %16 : vector<8x1xf32> to vector<8x8xf32>
    %18 = arith.subf %14, %17 : vector<8x8xf32>
    %19 = math.exp %18 : vector<8x8xf32>
    %cst_13 = arith.constant dense<0.000000e+00> : vector<8xf32>
    %20 = vector.multi_reduction <add>, %19, %cst_13 [1] : vector<8x8xf32> to vector<8xf32>
    %21 = vector.shape_cast %20 : vector<8xf32> to vector<8x1xf32>
    %22 = arith.truncf %19 : vector<8x8xf32> to vector<8x8xbf16>
    %cst_14 = arith.constant dense<0.000000e+00> : vector<8x128xf32>
    %23 = tpu.matmul %22, %9, %cst_14 {dimension_numbers = #tpu.dot_dimension_numbers<[1], [0], [0], [1], [0, 0, 1, 1], [], []>} : vector<8x8xbf16>, vector<8x128xbf16>, vector<8x128xf32> -> vector<8x128xf32>
    %24 = tpu.reciprocal %21 {approx = true} : vector<8x1xf32> -> vector<8x1xf32>
    %25 = vector.broadcast %24 : vector<8x1xf32> to vector<8x128xf32>
    %26 = arith.mulf %23, %25 : vector<8x128xf32>
    %27 = arith.truncf %26 : vector<8x128xf32> to vector<8x128xbf16>
    %c0_15 = arith.constant 0 : index
    %c0_16 = arith.constant 0 : index
    %c0_17 = arith.constant 0 : index
    %28 = vector.load %arg6[%c0_15, %c0_16, %c0_17] : memref<1x8x128xbf16, #tpu.memory_space<vmem>>, vector<1x8x128xbf16>
    %29 = vector.shape_cast %28 : vector<1x8x128xbf16> to vector<8x128xbf16>
    %30 = vector.shape_cast %27 : vector<8x128xbf16> to vector<1x8x128xbf16>
    tpu.vector_store %arg6[%c0_15, %c0_16, %c0_17], %30 {strides = array<i32>} : memref<1x8x128xbf16, #tpu.memory_space<vmem>>, vector<1x8x128xbf16>,
    return
  }
  func.func @transform_0(%arg0: i32, %arg1: i32) -> (i32, i32, i32) {
    %c0_i32 = arith.constant 0 : i32
    %0 = arith.addi %c0_i32, %arg1 : i32
    %c0_i32_0 = arith.constant 0 : i32
    %c0_i32_1 = arith.constant 0 : i32
    return %0, %arg0, %c0_i32_0 : i32, i32, i32
  }
  func.func @transform_1(%arg0: i32, %arg1: i32) -> (i32, i32, i32) {
    %c2_i32 = arith.constant 2 : i32
    %0 = arith.addi %c2_i32, %arg1 : i32
    %c0_i32 = arith.constant 0 : i32
    %c0_i32_0 = arith.constant 0 : i32
    return %0, %arg0, %c0_i32 : i32, i32, i32
  }
  func.func @transform_2(%arg0: i32, %arg1: i32) -> (i32, i32, i32) {
    %c4_i32 = arith.constant 4 : i32
    %0 = arith.addi %c4_i32, %arg1 : i32
    %c0_i32 = arith.constant 0 : i32
    %c0_i32_0 = arith.constant 0 : i32
    return %0, %arg0, %c0_i32 : i32, i32, i32
  }
  func.func @transform_3(%arg0: i32, %arg1: i32) -> (i32, i32, i32) {
    %c0_i32 = arith.constant 0 : i32
    %c0_i32_0 = arith.constant 0 : i32
    %c0_i32_1 = arith.constant 0 : i32
    return %arg0, %c0_i32, %c0_i32_0 : i32, i32, i32
  }
  func.func @transform_4(%arg0: i32, %arg1: i32) -> (i32, i32, i32) {
    %c0_i32 = arith.constant 0 : i32
    %c0_i32_0 = arith.constant 0 : i32
    return %arg1, %arg0, %c0_i32 : i32, i32, i32
  }
}

module attributes {stable_mosaic.version = 11 : i64} {
  func.func @_ln_matmul_kernel(%arg0: i32, %arg1: i32, %arg2: memref<16x256xbf16, #tpu.memory_space<vmem>>, %arg3: memref<1x256xf32, #tpu.memory_space<vmem>>, %arg4: memref<1x256xf32, #tpu.memory_space<vmem>>, %arg5: memref<256x256xbf16, #tpu.memory_space<vmem>>, %arg6: memref<1x256xf32, #tpu.memory_space<vmem>>, %arg7: memref<16x256xbf16, #tpu.memory_space<vmem>>, %arg8: memref<16x256xbf16, #tpu.memory_space<vmem>>) attributes {dimension_semantics = [#tpu.dimension_semantics<parallel>, #tpu.dimension_semantics<arbitrary>], iteration_bounds = array<i64: 1, 2>, scalar_prefetch = 0 : i64, scratch_operands = 1 : i64, tpu.core_type = #tpu.core_type<tc>, window_params = [{transform_indices = @transform_0, window_bounds = array<i64: 16, 256>}, {pipeline_mode = #tpu.pipeline_mode<synchronous>, transform_indices = @transform_1, window_bounds = array<i64: 1, 256>}, {pipeline_mode = #tpu.pipeline_mode<synchronous>, transform_indices = @transform_2, window_bounds = array<i64: 1, 256>}, {transform_indices = @transform_3, window_bounds = array<i64: 256, 256>}, {transform_indices = @transform_4, window_bounds = array<i64: 1, 256>}, {transform_indices = @transform_5, window_bounds = array<i64: 16, 256>}]} {
    %c0_i32 = arith.constant 0 : i32
    %0 = arith.cmpi eq, %arg1, %c0_i32 : i32
    %1 = arith.extui %0 : i1 to i32
    %c0_i32_0 = arith.constant 0 : i32
    %2 = arith.cmpi ne, %1, %c0_i32_0 : i32
    scf.if %2 {
      %c0_12 = arith.constant 0 : index
      %c0_13 = arith.constant 0 : index
      %24 = vector.load %arg2[%c0_12, %c0_13] : memref<16x256xbf16, #tpu.memory_space<vmem>>, vector<16x256xbf16>
      %25 = arith.extf %24 : vector<16x256xbf16> to vector<16x256xf32>
      %cst_14 = arith.constant dense<0.000000e+00> : vector<16xf32>
      %26 = vector.multi_reduction <add>, %25, %cst_14 [1] : vector<16x256xf32> to vector<16xf32>
      %27 = vector.shape_cast %26 : vector<16xf32> to vector<16x1xf32>
      %cst_15 = arith.constant 2.560000e+02 : f32
      %28 = vector.broadcast %cst_15 : f32 to vector<16x1xf32>
      %29 = arith.divf %27, %28 : vector<16x1xf32>
      %30 = vector.broadcast %29 : vector<16x1xf32> to vector<16x256xf32>
      %31 = arith.subf %25, %30 : vector<16x256xf32>
      %32 = arith.mulf %31, %31 : vector<16x256xf32>
      %cst_16 = arith.constant dense<0.000000e+00> : vector<16xf32>
      %33 = vector.multi_reduction <add>, %32, %cst_16 [1] : vector<16x256xf32> to vector<16xf32>
      %34 = vector.shape_cast %33 : vector<16xf32> to vector<16x1xf32>
      %cst_17 = arith.constant 2.560000e+02 : f32
      %35 = vector.broadcast %cst_17 : f32 to vector<16x1xf32>
      %36 = arith.divf %34, %35 : vector<16x1xf32>
      %cst_18 = arith.constant 9.99999974E-6 : f32
      %37 = vector.broadcast %cst_18 : f32 to vector<16x1xf32>
      %38 = arith.addf %36, %37 : vector<16x1xf32>
      %39 = math.rsqrt %38 : vector<16x1xf32>
      %40 = vector.broadcast %39 : vector<16x1xf32> to vector<16x256xf32>
      %41 = arith.mulf %31, %40 : vector<16x256xf32>
      %c0_19 = arith.constant 0 : index
      %c0_20 = arith.constant 0 : index
      %42 = vector.load %arg3[%c0_19, %c0_20] : memref<1x256xf32, #tpu.memory_space<vmem>>, vector<1x256xf32>
      %43 = vector.broadcast %42 : vector<1x256xf32> to vector<16x256xf32>
      %44 = arith.mulf %41, %43 : vector<16x256xf32>
      %c0_21 = arith.constant 0 : index
      %c0_22 = arith.constant 0 : index
      %45 = vector.load %arg4[%c0_21, %c0_22] : memref<1x256xf32, #tpu.memory_space<vmem>>, vector<1x256xf32>
      %46 = vector.broadcast %45 : vector<1x256xf32> to vector<16x256xf32>
      %47 = arith.addf %44, %46 : vector<16x256xf32>
      %48 = arith.truncf %47 : vector<16x256xf32> to vector<16x256xbf16>
      %c0_23 = arith.constant 0 : index
      %c0_24 = arith.constant 0 : index
      %49 = vector.load %arg8[%c0_23, %c0_24] : memref<16x256xbf16, #tpu.memory_space<vmem>>, vector<16x256xbf16>
      tpu.vector_store %arg8[%c0_23, %c0_24], %48 {strides = array<i32>} : memref<16x256xbf16, #tpu.memory_space<vmem>>, vector<16x256xbf16>,
    } else {
    }
    %c0 = arith.constant 0 : index
    %c0_1 = arith.constant 0 : index
    %3 = vector.load %arg8[%c0, %c0_1] : memref<16x256xbf16, #tpu.memory_space<vmem>>, vector<16x256xbf16>
    %c0_2 = arith.constant 0 : index
    %c0_3 = arith.constant 0 : index
    %4 = vector.load %arg5[%c0_2, %c0_3] : memref<256x256xbf16, #tpu.memory_space<vmem>>, vector<256x256xbf16>
    %cst = arith.constant dense<0.000000e+00> : vector<16x256xf32>
    %5 = tpu.matmul %3, %4, %cst {dimension_numbers = #tpu.dot_dimension_numbers<[1], [0], [0], [1], [0, 0, 1, 1], [], []>} : vector<16x256xbf16>, vector<256x256xbf16>, vector<16x256xf32> -> vector<16x256xf32>
    %c0_4 = arith.constant 0 : index
    %c0_5 = arith.constant 0 : index
    %6 = vector.load %arg6[%c0_4, %c0_5] : memref<1x256xf32, #tpu.memory_space<vmem>>, vector<1x256xf32>
    %7 = vector.broadcast %6 : vector<1x256xf32> to vector<16x256xf32>
    %8 = arith.addf %5, %7 : vector<16x256xf32>
    %9 = arith.mulf %8, %8 : vector<16x256xf32>
    %10 = arith.mulf %8, %9 : vector<16x256xf32>
    %cst_6 = arith.constant 4.471500e-02 : f32
    %11 = vector.broadcast %cst_6 : f32 to vector<16x256xf32>
    %12 = arith.mulf %11, %10 : vector<16x256xf32>
    %13 = arith.addf %8, %12 : vector<16x256xf32>
    %cst_7 = arith.constant 0.797884583 : f32
    %14 = vector.broadcast %cst_7 : f32 to vector<16x256xf32>
    %15 = arith.mulf %14, %13 : vector<16x256xf32>
    %16 = math.tanh %15 : vector<16x256xf32>
    %cst_8 = arith.constant 1.000000e+00 : f32
    %17 = vector.broadcast %cst_8 : f32 to vector<16x256xf32>
    %18 = arith.addf %17, %16 : vector<16x256xf32>
    %cst_9 = arith.constant 5.000000e-01 : f32
    %19 = vector.broadcast %cst_9 : f32 to vector<16x256xf32>
    %20 = arith.mulf %19, %18 : vector<16x256xf32>
    %21 = arith.mulf %8, %20 : vector<16x256xf32>
    %22 = arith.truncf %21 : vector<16x256xf32> to vector<16x256xbf16>
    %c0_10 = arith.constant 0 : index
    %c0_11 = arith.constant 0 : index
    %23 = vector.load %arg7[%c0_10, %c0_11] : memref<16x256xbf16, #tpu.memory_space<vmem>>, vector<16x256xbf16>
    tpu.vector_store %arg7[%c0_10, %c0_11], %22 {strides = array<i32>} : memref<16x256xbf16, #tpu.memory_space<vmem>>, vector<16x256xbf16>,
    return
  }
  func.func @transform_0(%arg0: i32, %arg1: i32) -> (i32, i32) {
    %c0_i32 = arith.constant 0 : i32
    %c0_i32_0 = arith.constant 0 : i32
    return %arg0, %c0_i32 : i32, i32
  }
  func.func @transform_1(%arg0: i32, %arg1: i32) -> (i32, i32) {
    %c0_i32 = arith.constant 0 : i32
    %c0_i32_0 = arith.constant 0 : i32
    %c0_i32_1 = arith.constant 0 : i32
    return %c0_i32, %c0_i32_0 : i32, i32
  }
  func.func @transform_2(%arg0: i32, %arg1: i32) -> (i32, i32) {
    %c0_i32 = arith.constant 0 : i32
    %c0_i32_0 = arith.constant 0 : i32
    %c0_i32_1 = arith.constant 0 : i32
    return %c0_i32, %c0_i32_0 : i32, i32
  }
  func.func @transform_3(%arg0: i32, %arg1: i32) -> (i32, i32) {
    %c0_i32 = arith.constant 0 : i32
    %c0_i32_0 = arith.constant 0 : i32
    return %c0_i32, %arg1 : i32, i32
  }
  func.func @transform_4(%arg0: i32, %arg1: i32) -> (i32, i32) {
    %c0_i32 = arith.constant 0 : i32
    %c0_i32_0 = arith.constant 0 : i32
    return %c0_i32, %arg1 : i32, i32
  }
  func.func @transform_5(%arg0: i32, %arg1: i32) -> (i32, i32) {
    %c0_i32 = arith.constant 0 : i32
    return %arg0, %arg1 : i32, i32
  }
}

module attributes {stable_mosaic.version = 11 : i64} {
  func.func @_ln_matmul_heads_kernel(%arg0: i32, %arg1: i32, %arg2: memref<16x256xbf16, #tpu.memory_space<vmem>>, %arg3: memref<1x256xf32, #tpu.memory_space<vmem>>, %arg4: memref<1x256xf32, #tpu.memory_space<vmem>>, %arg5: memref<1x256x128xbf16, #tpu.memory_space<vmem>>, %arg6: memref<1x1x128xf32, #tpu.memory_space<vmem>>, %arg7: memref<1x16x128xbf16, #tpu.memory_space<vmem>>, %arg8: memref<16x256xbf16, #tpu.memory_space<vmem>>) attributes {dimension_semantics = [#tpu.dimension_semantics<parallel>, #tpu.dimension_semantics<arbitrary>], iteration_bounds = array<i64: 1, 4>, scalar_prefetch = 0 : i64, scratch_operands = 1 : i64, tpu.core_type = #tpu.core_type<tc>, window_params = [{transform_indices = @transform_0, window_bounds = array<i64: 16, 256>}, {pipeline_mode = #tpu.pipeline_mode<synchronous>, transform_indices = @transform_1, window_bounds = array<i64: 1, 256>}, {pipeline_mode = #tpu.pipeline_mode<synchronous>, transform_indices = @transform_2, window_bounds = array<i64: 1, 256>}, {transform_indices = @transform_3, window_bounds = array<i64: 1, 256, 128>}, {transform_indices = @transform_4, window_bounds = array<i64: 1, 1, 128>}, {transform_indices = @transform_5, window_bounds = array<i64: 1, 16, 128>}]} {
    %c0_i32 = arith.constant 0 : i32
    %0 = arith.cmpi eq, %arg1, %c0_i32 : i32
    %1 = arith.extui %0 : i1 to i32
    %c0_i32_0 = arith.constant 0 : i32
    %2 = arith.cmpi ne, %1, %c0_i32_0 : i32
    scf.if %2 {
      %c0_11 = arith.constant 0 : index
      %c0_12 = arith.constant 0 : index
      %15 = vector.load %arg2[%c0_11, %c0_12] : memref<16x256xbf16, #tpu.memory_space<vmem>>, vector<16x256xbf16>
      %16 = arith.extf %15 : vector<16x256xbf16> to vector<16x256xf32>
      %cst_13 = arith.constant dense<0.000000e+00> : vector<16xf32>
      %17 = vector.multi_reduction <add>, %16, %cst_13 [1] : vector<16x256xf32> to vector<16xf32>
      %18 = vector.shape_cast %17 : vector<16xf32> to vector<16x1xf32>
      %cst_14 = arith.constant 2.560000e+02 : f32
      %19 = vector.broadcast %cst_14 : f32 to vector<16x1xf32>
      %20 = arith.divf %18, %19 : vector<16x1xf32>
      %21 = vector.broadcast %20 : vector<16x1xf32> to vector<16x256xf32>
      %22 = arith.subf %16, %21 : vector<16x256xf32>
      %23 = arith.mulf %22, %22 : vector<16x256xf32>
      %cst_15 = arith.constant dense<0.000000e+00> : vector<16xf32>
      %24 = vector.multi_reduction <add>, %23, %cst_15 [1] : vector<16x256xf32> to vector<16xf32>
      %25 = vector.shape_cast %24 : vector<16xf32> to vector<16x1xf32>
      %cst_16 = arith.constant 2.560000e+02 : f32
      %26 = vector.broadcast %cst_16 : f32 to vector<16x1xf32>
      %27 = arith.divf %25, %26 : vector<16x1xf32>
      %cst_17 = arith.constant 9.99999974E-6 : f32
      %28 = vector.broadcast %cst_17 : f32 to vector<16x1xf32>
      %29 = arith.addf %27, %28 : vector<16x1xf32>
      %30 = math.rsqrt %29 : vector<16x1xf32>
      %31 = vector.broadcast %30 : vector<16x1xf32> to vector<16x256xf32>
      %32 = arith.mulf %22, %31 : vector<16x256xf32>
      %c0_18 = arith.constant 0 : index
      %c0_19 = arith.constant 0 : index
      %33 = vector.load %arg3[%c0_18, %c0_19] : memref<1x256xf32, #tpu.memory_space<vmem>>, vector<1x256xf32>
      %34 = vector.broadcast %33 : vector<1x256xf32> to vector<16x256xf32>
      %35 = arith.mulf %32, %34 : vector<16x256xf32>
      %c0_20 = arith.constant 0 : index
      %c0_21 = arith.constant 0 : index
      %36 = vector.load %arg4[%c0_20, %c0_21] : memref<1x256xf32, #tpu.memory_space<vmem>>, vector<1x256xf32>
      %37 = vector.broadcast %36 : vector<1x256xf32> to vector<16x256xf32>
      %38 = arith.addf %35, %37 : vector<16x256xf32>
      %39 = arith.truncf %38 : vector<16x256xf32> to vector<16x256xbf16>
      %c0_22 = arith.constant 0 : index
      %c0_23 = arith.constant 0 : index
      %40 = vector.load %arg8[%c0_22, %c0_23] : memref<16x256xbf16, #tpu.memory_space<vmem>>, vector<16x256xbf16>
      tpu.vector_store %arg8[%c0_22, %c0_23], %39 {strides = array<i32>} : memref<16x256xbf16, #tpu.memory_space<vmem>>, vector<16x256xbf16>,
    } else {
    }
    %c0 = arith.constant 0 : index
    %c0_1 = arith.constant 0 : index
    %3 = vector.load %arg8[%c0, %c0_1] : memref<16x256xbf16, #tpu.memory_space<vmem>>, vector<16x256xbf16>
    %c0_2 = arith.constant 0 : index
    %c0_3 = arith.constant 0 : index
    %c0_4 = arith.constant 0 : index
    %4 = vector.load %arg5[%c0_2, %c0_3, %c0_4] : memref<1x256x128xbf16, #tpu.memory_space<vmem>>, vector<1x256x128xbf16>
    %5 = vector.shape_cast %4 : vector<1x256x128xbf16> to vector<256x128xbf16>
    %cst = arith.constant dense<0.000000e+00> : vector<16x128xf32>
    %6 = tpu.matmul %3, %5, %cst {dimension_numbers = #tpu.dot_dimension_numbers<[1], [0], [0], [1], [0, 0, 1, 1], [], []>} : vector<16x256xbf16>, vector<256x128xbf16>, vector<16x128xf32> -> vector<16x128xf32>
    %c0_5 = arith.constant 0 : index
    %c0_6 = arith.constant 0 : index
    %c0_7 = arith.constant 0 : index
    %7 = vector.load %arg6[%c0_5, %c0_6, %c0_7] : memref<1x1x128xf32, #tpu.memory_space<vmem>>, vector<1x1x128xf32>
    %8 = vector.shape_cast %7 : vector<1x1x128xf32> to vector<1x128xf32>
    %9 = vector.broadcast %8 : vector<1x128xf32> to vector<16x128xf32>
    %10 = arith.addf %6, %9 : vector<16x128xf32>
    %11 = arith.truncf %10 : vector<16x128xf32> to vector<16x128xbf16>
    %c0_8 = arith.constant 0 : index
    %c0_9 = arith.constant 0 : index
    %c0_10 = arith.constant 0 : index
    %12 = vector.load %arg7[%c0_8, %c0_9, %c0_10] : memref<1x16x128xbf16, #tpu.memory_space<vmem>>, vector<1x16x128xbf16>
    %13 = vector.shape_cast %12 : vector<1x16x128xbf16> to vector<16x128xbf16>
    %14 = vector.shape_cast %11 : vector<16x128xbf16> to vector<1x16x128xbf16>
    tpu.vector_store %arg7[%c0_8, %c0_9, %c0_10], %14 {strides = array<i32>} : memref<1x16x128xbf16, #tpu.memory_space<vmem>>, vector<1x16x128xbf16>,
    return
  }
  func.func @transform_0(%arg0: i32, %arg1: i32) -> (i32, i32) {
    %c0_i32 = arith.constant 0 : i32
    %c0_i32_0 = arith.constant 0 : i32
    return %arg0, %c0_i32 : i32, i32
  }
  func.func @transform_1(%arg0: i32, %arg1: i32) -> (i32, i32) {
    %c0_i32 = arith.constant 0 : i32
    %c0_i32_0 = arith.constant 0 : i32
    %c0_i32_1 = arith.constant 0 : i32
    return %c0_i32, %c0_i32_0 : i32, i32
  }
  func.func @transform_2(%arg0: i32, %arg1: i32) -> (i32, i32) {
    %c0_i32 = arith.constant 0 : i32
    %c0_i32_0 = arith.constant 0 : i32
    %c0_i32_1 = arith.constant 0 : i32
    return %c0_i32, %c0_i32_0 : i32, i32
  }
  func.func @transform_3(%arg0: i32, %arg1: i32) -> (i32, i32, i32) {
    %c0_i32 = arith.constant 0 : i32
    %c0_i32_0 = arith.constant 0 : i32
    %c0_i32_1 = arith.constant 0 : i32
    return %arg1, %c0_i32, %c0_i32_0 : i32, i32, i32
  }
  func.func @transform_4(%arg0: i32, %arg1: i32) -> (i32, i32, i32) {
    %c0_i32 = arith.constant 0 : i32
    %c0_i32_0 = arith.constant 0 : i32
    %c0_i32_1 = arith.constant 0 : i32
    return %arg1, %c0_i32, %c0_i32_0 : i32, i32, i32
  }
  func.func @transform_5(%arg0: i32, %arg1: i32) -> (i32, i32, i32) {
    %c0_i32 = arith.constant 0 : i32
    %c0_i32_0 = arith.constant 0 : i32
    return %arg1, %arg0, %c0_i32 : i32, i32, i32
  }
}

module attributes {stable_mosaic.version = 11 : i64} {
  func.func @_attn_kernel(%arg0: i32, %arg1: i32, %arg2: memref<1x8x128xbf16, #tpu.memory_space<vmem>>, %arg3: memref<1x8x128xbf16, #tpu.memory_space<vmem>>, %arg4: memref<1x8x128xbf16, #tpu.memory_space<vmem>>, %arg5: memref<1x1x8xf32, #tpu.memory_space<vmem>>, %arg6: memref<1x8x128xbf16, #tpu.memory_space<vmem>>) attributes {dimension_semantics = [#tpu.dimension_semantics<parallel>, #tpu.dimension_semantics<parallel>], iteration_bounds = array<i64: 2, 2>, scalar_prefetch = 0 : i64, scratch_operands = 0 : i64, tpu.core_type = #tpu.core_type<tc>, window_params = [{transform_indices = @transform_0, window_bounds = array<i64: 1, 8, 128>}, {transform_indices = @transform_1, window_bounds = array<i64: 1, 8, 128>}, {transform_indices = @transform_2, window_bounds = array<i64: 1, 8, 128>}, {transform_indices = @transform_3, window_bounds = array<i64: 1, 1, 8>}, {transform_indices = @transform_4, window_bounds = array<i64: 1, 8, 128>}]} {
    %c0 = arith.constant 0 : index
    %c0_0 = arith.constant 0 : index
    %c0_1 = arith.constant 0 : index
    %0 = vector.load %arg2[%c0, %c0_0, %c0_1] : memref<1x8x128xbf16, #tpu.memory_space<vmem>>, vector<1x8x128xbf16>
    %1 = vector.shape_cast %0 : vector<1x8x128xbf16> to vector<8x128xbf16>
    %2 = arith.extf %1 : vector<8x128xbf16> to vector<8x128xf32>
    %cst = arith.constant 0.0883883461 : f32
    %3 = vector.broadcast %cst : f32 to vector<8x128xf32>
    %4 = arith.mulf %2, %3 : vector<8x128xf32>
    %5 = arith.truncf %4 : vector<8x128xf32> to vector<8x128xbf16>
    %c0_2 = arith.constant 0 : index
    %c0_3 = arith.constant 0 : index
    %c0_4 = arith.constant 0 : index
    %6 = vector.load %arg3[%c0_2, %c0_3, %c0_4] : memref<1x8x128xbf16, #tpu.memory_space<vmem>>, vector<1x8x128xbf16>
    %7 = vector.shape_cast %6 : vector<1x8x128xbf16> to vector<8x128xbf16>
    %c0_5 = arith.constant 0 : index
    %c0_6 = arith.constant 0 : index
    %c0_7 = arith.constant 0 : index
    %8 = vector.load %arg4[%c0_5, %c0_6, %c0_7] : memref<1x8x128xbf16, #tpu.memory_space<vmem>>, vector<1x8x128xbf16>
    %9 = vector.shape_cast %8 : vector<1x8x128xbf16> to vector<8x128xbf16>
    %cst_8 = arith.constant dense<0.000000e+00> : vector<8x8xf32>
    %10 = tpu.matmul %5, %7, %cst_8 {dimension_numbers = #tpu.dot_dimension_numbers<[1], [1], [0], [0], [0, 0, 1, 0], [], []>} : vector<8x128xbf16>, vector<8x128xbf16>, vector<8x8xf32> -> vector<8x8xf32>
    %c0_9 = arith.constant 0 : index
    %c0_10 = arith.constant 0 : index
    %c0_11 = arith.constant 0 : index
    %11 = vector.load %arg5[%c0_9, %c0_10, %c0_11] : memref<1x1x8xf32, #tpu.memory_space<vmem>>, vector<1x1x8xf32>
    %12 = vector.shape_cast %11 : vector<1x1x8xf32> to vector<1x8xf32>
    %13 = vector.broadcast %12 : vector<1x8xf32> to vector<8x8xf32>
    %14 = arith.addf %10, %13 : vector<8x8xf32>
    %cst_12 = arith.constant dense<0xFF800000> : vector<8xf32>
    %15 = vector.multi_reduction <maximumf>, %14, %cst_12 [1] : vector<8x8xf32> to vector<8xf32>
    %16 = vector.shape_cast %15 : vector<8xf32> to vector<8x1xf32>
    %17 = vector.broadcast %16 : vector<8x1xf32> to vector<8x8xf32>
    %18 = arith.subf %14, %17 : vector<8x8xf32>
    %19 = math.exp %18 : vector<8x8xf32>
    %cst_13 = arith.constant dense<0.000000e+00> : vector<8xf32>
    %20 = vector.multi_reduction <add>, %19, %cst_13 [1] : vector<8x8xf32> to vector<8xf32>
    %21 = vector.shape_cast %20 : vector<8xf32> to vector<8x1xf32>
    %22 = arith.truncf %19 : vector<8x8xf32> to vector<8x8xbf16>
    %cst_14 = arith.constant dense<0.000000e+00> : vector<8x128xf32>
    %23 = tpu.matmul %22, %9, %cst_14 {dimension_numbers = #tpu.dot_dimension_numbers<[1], [0], [0], [1], [0, 0, 1, 1], [], []>} : vector<8x8xbf16>, vector<8x128xbf16>, vector<8x128xf32> -> vector<8x128xf32>
    %24 = tpu.reciprocal %21 {approx = true} : vector<8x1xf32> -> vector<8x1xf32>
    %25 = vector.broadcast %24 : vector<8x1xf32> to vector<8x128xf32>
    %26 = arith.mulf %23, %25 : vector<8x128xf32>
    %27 = arith.truncf %26 : vector<8x128xf32> to vector<8x128xbf16>
    %c0_15 = arith.constant 0 : index
    %c0_16 = arith.constant 0 : index
    %c0_17 = arith.constant 0 : index
    %28 = vector.load %arg6[%c0_15, %c0_16, %c0_17] : memref<1x8x128xbf16, #tpu.memory_space<vmem>>, vector<1x8x128xbf16>
    %29 = vector.shape_cast %28 : vector<1x8x128xbf16> to vector<8x128xbf16>
    %30 = vector.shape_cast %27 : vector<8x128xbf16> to vector<1x8x128xbf16>
    tpu.vector_store %arg6[%c0_15, %c0_16, %c0_17], %30 {strides = array<i32>} : memref<1x8x128xbf16, #tpu.memory_space<vmem>>, vector<1x8x128xbf16>,
    return
  }
  func.func @transform_0(%arg0: i32, %arg1: i32) -> (i32, i32, i32) {
    %c0_i32 = arith.constant 0 : i32
    %0 = arith.addi %c0_i32, %arg1 : i32
    %c0_i32_0 = arith.constant 0 : i32
    %c0_i32_1 = arith.constant 0 : i32
    return %0, %arg0, %c0_i32_0 : i32, i32, i32
  }
  func.func @transform_1(%arg0: i32, %arg1: i32) -> (i32, i32, i32) {
    %c0_i32 = arith.constant 0 : i32
    %0 = arith.addi %c0_i32, %arg1 : i32
    %c0_i32_0 = arith.constant 0 : i32
    %c0_i32_1 = arith.constant 0 : i32
    return %0, %arg0, %c0_i32_0 : i32, i32, i32
  }
  func.func @transform_2(%arg0: i32, %arg1: i32) -> (i32, i32, i32) {
    %c2_i32 = arith.constant 2 : i32
    %0 = arith.addi %c2_i32, %arg1 : i32
    %c0_i32 = arith.constant 0 : i32
    %c0_i32_0 = arith.constant 0 : i32
    return %0, %arg0, %c0_i32 : i32, i32, i32
  }
  func.func @transform_3(%arg0: i32, %arg1: i32) -> (i32, i32, i32) {
    %c0_i32 = arith.constant 0 : i32
    %c0_i32_0 = arith.constant 0 : i32
    %c0_i32_1 = arith.constant 0 : i32
    return %arg0, %c0_i32, %c0_i32_0 : i32, i32, i32
  }
  func.func @transform_4(%arg0: i32, %arg1: i32) -> (i32, i32, i32) {
    %c0_i32 = arith.constant 0 : i32
    %c0_i32_0 = arith.constant 0 : i32
    return %arg1, %arg0, %c0_i32 : i32, i32, i32
  }
}

module attributes {stable_mosaic.version = 11 : i64} {
  func.func @_ln_matmul_kernel(%arg0: i32, %arg1: i32, %arg2: memref<16x256xbf16, #tpu.memory_space<vmem>>, %arg3: memref<1x256xf32, #tpu.memory_space<vmem>>, %arg4: memref<1x256xf32, #tpu.memory_space<vmem>>, %arg5: memref<256x128xbf16, #tpu.memory_space<vmem>>, %arg6: memref<1x128xf32, #tpu.memory_space<vmem>>, %arg7: memref<16x128xf32, #tpu.memory_space<vmem>>, %arg8: memref<16x256xbf16, #tpu.memory_space<vmem>>) attributes {dimension_semantics = [#tpu.dimension_semantics<parallel>, #tpu.dimension_semantics<arbitrary>], iteration_bounds = array<i64: 1, 1>, scalar_prefetch = 0 : i64, scratch_operands = 1 : i64, tpu.core_type = #tpu.core_type<tc>, window_params = [{transform_indices = @transform_0, window_bounds = array<i64: 16, 256>}, {pipeline_mode = #tpu.pipeline_mode<synchronous>, transform_indices = @transform_1, window_bounds = array<i64: 1, 256>}, {pipeline_mode = #tpu.pipeline_mode<synchronous>, transform_indices = @transform_2, window_bounds = array<i64: 1, 256>}, {transform_indices = @transform_3, window_bounds = array<i64: 256, 128>}, {transform_indices = @transform_4, window_bounds = array<i64: 1, 128>}, {transform_indices = @transform_5, window_bounds = array<i64: 16, 128>}]} {
    %c0_i32 = arith.constant 0 : i32
    %0 = arith.cmpi eq, %arg1, %c0_i32 : i32
    %1 = arith.extui %0 : i1 to i32
    %c0_i32_0 = arith.constant 0 : i32
    %2 = arith.cmpi ne, %1, %c0_i32_0 : i32
    scf.if %2 {
      %c0_8 = arith.constant 0 : index
      %c0_9 = arith.constant 0 : index
      %10 = vector.load %arg2[%c0_8, %c0_9] : memref<16x256xbf16, #tpu.memory_space<vmem>>, vector<16x256xbf16>
      %11 = arith.extf %10 : vector<16x256xbf16> to vector<16x256xf32>
      %cst_10 = arith.constant dense<0.000000e+00> : vector<16xf32>
      %12 = vector.multi_reduction <add>, %11, %cst_10 [1] : vector<16x256xf32> to vector<16xf32>
      %13 = vector.shape_cast %12 : vector<16xf32> to vector<16x1xf32>
      %cst_11 = arith.constant 2.560000e+02 : f32
      %14 = vector.broadcast %cst_11 : f32 to vector<16x1xf32>
      %15 = arith.divf %13, %14 : vector<16x1xf32>
      %16 = vector.broadcast %15 : vector<16x1xf32> to vector<16x256xf32>
      %17 = arith.subf %11, %16 : vector<16x256xf32>
      %18 = arith.mulf %17, %17 : vector<16x256xf32>
      %cst_12 = arith.constant dense<0.000000e+00> : vector<16xf32>
      %19 = vector.multi_reduction <add>, %18, %cst_12 [1] : vector<16x256xf32> to vector<16xf32>
      %20 = vector.shape_cast %19 : vector<16xf32> to vector<16x1xf32>
      %cst_13 = arith.constant 2.560000e+02 : f32
      %21 = vector.broadcast %cst_13 : f32 to vector<16x1xf32>
      %22 = arith.divf %20, %21 : vector<16x1xf32>
      %cst_14 = arith.constant 9.99999974E-6 : f32
      %23 = vector.broadcast %cst_14 : f32 to vector<16x1xf32>
      %24 = arith.addf %22, %23 : vector<16x1xf32>
      %25 = math.rsqrt %24 : vector<16x1xf32>
      %26 = vector.broadcast %25 : vector<16x1xf32> to vector<16x256xf32>
      %27 = arith.mulf %17, %26 : vector<16x256xf32>
      %c0_15 = arith.constant 0 : index
      %c0_16 = arith.constant 0 : index
      %28 = vector.load %arg3[%c0_15, %c0_16] : memref<1x256xf32, #tpu.memory_space<vmem>>, vector<1x256xf32>
      %29 = vector.broadcast %28 : vector<1x256xf32> to vector<16x256xf32>
      %30 = arith.mulf %27, %29 : vector<16x256xf32>
      %c0_17 = arith.constant 0 : index
      %c0_18 = arith.constant 0 : index
      %31 = vector.load %arg4[%c0_17, %c0_18] : memref<1x256xf32, #tpu.memory_space<vmem>>, vector<1x256xf32>
      %32 = vector.broadcast %31 : vector<1x256xf32> to vector<16x256xf32>
      %33 = arith.addf %30, %32 : vector<16x256xf32>
      %34 = arith.truncf %33 : vector<16x256xf32> to vector<16x256xbf16>
      %c0_19 = arith.constant 0 : index
      %c0_20 = arith.constant 0 : index
      %35 = vector.load %arg8[%c0_19, %c0_20] : memref<16x256xbf16, #tpu.memory_space<vmem>>, vector<16x256xbf16>
      tpu.vector_store %arg8[%c0_19, %c0_20], %34 {strides = array<i32>} : memref<16x256xbf16, #tpu.memory_space<vmem>>, vector<16x256xbf16>,
    } else {
    }
    %c0 = arith.constant 0 : index
    %c0_1 = arith.constant 0 : index
    %3 = vector.load %arg8[%c0, %c0_1] : memref<16x256xbf16, #tpu.memory_space<vmem>>, vector<16x256xbf16>
    %c0_2 = arith.constant 0 : index
    %c0_3 = arith.constant 0 : index
    %4 = vector.load %arg5[%c0_2, %c0_3] : memref<256x128xbf16, #tpu.memory_space<vmem>>, vector<256x128xbf16>
    %cst = arith.constant dense<0.000000e+00> : vector<16x128xf32>
    %5 = tpu.matmul %3, %4, %cst {dimension_numbers = #tpu.dot_dimension_numbers<[1], [0], [0], [1], [0, 0, 1, 1], [], []>} : vector<16x256xbf16>, vector<256x128xbf16>, vector<16x128xf32> -> vector<16x128xf32>
    %c0_4 = arith.constant 0 : index
    %c0_5 = arith.constant 0 : index
    %6 = vector.load %arg6[%c0_4, %c0_5] : memref<1x128xf32, #tpu.memory_space<vmem>>, vector<1x128xf32>
    %7 = vector.broadcast %6 : vector<1x128xf32> to vector<16x128xf32>
    %8 = arith.addf %5, %7 : vector<16x128xf32>
    %c0_6 = arith.constant 0 : index
    %c0_7 = arith.constant 0 : index
    %9 = vector.load %arg7[%c0_6, %c0_7] : memref<16x128xf32, #tpu.memory_space<vmem>>, vector<16x128xf32>
    tpu.vector_store %arg7[%c0_6, %c0_7], %8 {strides = array<i32>} : memref<16x128xf32, #tpu.memory_space<vmem>>, vector<16x128xf32>,
    return
  }
  func.func @transform_0(%arg0: i32, %arg1: i32) -> (i32, i32) {
    %c0_i32 = arith.constant 0 : i32
    %c0_i32_0 = arith.constant 0 : i32
    return %arg0, %c0_i32 : i32, i32
  }
  func.func @transform_1(%arg0: i32, %arg1: i32) -> (i32, i32) {
    %c0_i32 = arith.constant 0 : i32
    %c0_i32_0 = arith.constant 0 : i32
    %c0_i32_1 = arith.constant 0 : i32
    return %c0_i32, %c0_i32_0 : i32, i32
  }
  func.func @transform_2(%arg0: i32, %arg1: i32) -> (i32, i32) {
    %c0_i32 = arith.constant 0 : i32
    %c0_i32_0 = arith.constant 0 : i32
    %c0_i32_1 = arith.constant 0 : i32
    return %c0_i32, %c0_i32_0 : i32, i32
  }
  func.func @transform_3(%arg0: i32, %arg1: i32) -> (i32, i32) {
    %c0_i32 = arith.constant 0 : i32
    %c0_i32_0 = arith.constant 0 : i32
    return %c0_i32, %arg1 : i32, i32
  }
  func.func @transform_4(%arg0: i32, %arg1: i32) -> (i32, i32) {
    %c0_i32 = arith.constant 0 : i32
    %c0_i32_0 = arith.constant 0 : i32
    return %c0_i32, %arg1 : i32, i32
  }
  func.func @transform_5(%arg0: i32, %arg1: i32) -> (i32, i32) {
    %c0_i32 = arith.constant 0 : i32
    return %arg0, %arg1 : i32, i32
  }
}

</mosaic_0001>

<bundles_post_ra>
// kernel: encoder_decoder_forward.41
= control target key start
LH: loop header
LB: loop body
LE: loop exit
PB: predicated region body
PF: predicated region fallthrough
CT: control target
= control target key end

     0   :  { %s841_s15 = smov 0   ;;  %s843_s16 = smov 0   ;;  %s916_s0 = inlined_call_operand.vmem [shape: bf16[2,16,128], index: 0, kind: input, shape index: {}]   ;;  %s917_s1 = inlined_call_operand.vmem [shape: bf16[2,128,256], index: 1, kind: input, shape index: {}]   ;;  %s918_s2 = inlined_call_operand.vmem [shape: f32[1,256], index: 2, kind: input, shape index: {}]   ;;  %s919_s3 = inlined_call_operand.vmem [shape: bf16[16,256], index: 3, kind: input, shape index: {}]   ;;  %s920_s4 = inlined_call_operand.vmem [shape: bf16[16,256], index: 4, kind: output, shape index: {}]  }
   0x1   :  { %s845_s17 = smov 0  }
   0x2 LB: > { %s26_s18 = sadd.s32 1, %s808_s16  ;;  %p705_p0 = scmp.ge.s32.totalorder %s812_s17, 1  ;;  %s812_s17 = sphi %s845_s17, %s14_s17   ;;  %s808_s16 = sphi %s843_s16, %s922_s16   ;;  %s804_s15 = sphi %s841_s15, %s921_s15  }
   0x3   : > { %p27_p1 = scmp.ge.s32.totalorder %s26_s18, 2  ;;  %p236_p2 = scmp.lt.s32.totalorder %s812_s17, 3 }
   0x5   : > { %s924_s18 = smov (%p27_p1, %s26_s18), 0  ;;  %p237_p3 = pnand %p705_p0, %p236_p2 }
   0x6   : > { %p295_p4 = scmp.lt.s32.totalorder (!%p237_p3), %s804_s15, 1  ;;  %p710_p5 = scmp.ne.s32.totalorder (!%p237_p3), %s804_s15, 0 }
   0x7   : > { %240 = sbr.rel (%p237_p3) target bundleno = 287 (0x11f), region = 36 }
   0xe   : > { %s296_s19 = scalar_select %p295_p4, %s804_s15, 1 }
   0xf   : > { %347 = sbr.rel (%p710_p5) target bundleno = 22 (0x16), region = 40  ;;  %v814_v0 = vmov (!%p710_p5), 0.0  }
  0x10   : > { %s735_s20 = sshll.u32 %s296_s19, 3  ;;  %s736_s21 = sshll.u32 %s296_s19, 7  ;;  %348 = vst [vmem:[#allocation2] sm:$0xff] (!%p710_p5), %v814_v0  ;;  %349 = vst [vmem:[#allocation2 + $0x8] sm:$0xff] (!%p710_p5), %v814_v0 }
  0x11   : > { %s866_s24 = scalar_lea.vmem %s916_s0, %s735_s20  ;;  %s871_s27 = scalar_lea.vmem %s917_s1, %s736_s21  ;;  %350 = vst [vmem:[#allocation2 + $0x10] sm:$0xff] (!%p710_p5), %v814_v0  ;;  %351 = vst [vmem:[#allocation2 + $0x18] sm:$0xff] (!%p710_p5), %v814_v0 }
  0x16 PF: > { %v765_v1 = vld [vmem:[%s871_s27 + $0x4] ss:$8 sps:$4 sm:$0xff]   ;;  %v767_v2 = vld [vmem:[%s871_s27] ss:$8 sps:$4 sm:$0xff]   ;;  %v815_v3 = vmov 0   ;;  %p728_p6 = scmp.ne.s32.totalorder %s804_s15, 1 }
  0x17   : > { %492 = vmatprep.mubr.bf16.mxu0 %v815_v3  ;;  %460 = vmatprep.subr.bf16.mxu0 %v765_v1  ;;  %v768_v4 = vld [vmem:[%s871_s27 + $0x14] ss:$8 sps:$4 sm:$0xff]   ;;  %v770_v5 = vld [vmem:[%s871_s27 + $0x10] ss:$8 sps:$4 sm:$0xff]   ;;  %v771_v6 = vld [vmem:[%s871_s27 + $0x24] ss:$8 sps:$4 sm:$0xff]   ;;  %v521_v31 = vlaneseq (!%p728_p6) }
  0x18   : > { %461 = vmatpush1.bf16.msra.mxu0 %v767_v2  ;;  %v773_v7 = vld [vmem:[%s871_s27 + $0x20] ss:$8 sps:$4 sm:$0xff]   ;;  %v774_v8 = vld [vmem:[%s871_s27 + $0x34] ss:$8 sps:$4 sm:$0xff]   ;;  %v776_v9 = vld [vmem:[%s871_s27 + $0x30] ss:$8 sps:$4 sm:$0xff]  }
  0x19   : > { %462 = vmatprep.subr.bf16.mxu0 %v768_v4  ;;  %v777_v10 = vld [vmem:[%s871_s27 + $0x44] ss:$8 sps:$4 sm:$0xff]   ;;  %v779_v11 = vld [vmem:[%s871_s27 + $0x40] ss:$8 sps:$4 sm:$0xff]   ;;  %v780_v12 = vld [vmem:[%s871_s27 + $0x54] ss:$8 sps:$4 sm:$0xff]  }
  0x1a   : > { %v782_v13 = vld [vmem:[%s871_s27 + $0x50] ss:$8 sps:$4 sm:$0xff]   ;;  %v783_v14 = vld [vmem:[%s871_s27 + $0x64] ss:$8 sps:$4 sm:$0xff]   ;;  %v785_v15 = vld [vmem:[%s871_s27 + $0x60] ss:$8 sps:$4 sm:$0xff]  }
  0x1b   : > { %v786_v16 = vld [vmem:[%s871_s27 + $0x74] ss:$8 sps:$4 sm:$0xff]   ;;  %v788_v17 = vld [vmem:[%s871_s27 + $0x70] ss:$8 sps:$4 sm:$0xff]   ;;  %v789_v18 = vld [vmem:[%s866_s24] sm:$0xff]   ;;  %v522_v32 = vshrl.u32 (!%p728_p6), %v521_v31, 7 }
  0x1c   : > { %463 = vmatpush1.bf16.msra.mxu0 %v770_v5  ;;  %v352_v19 = vld [vmem:[#allocation2] sm:$0xff]  ;;  %v353_v20 = vld [vmem:[#allocation2 + $0x8] sm:$0xff]  ;;  %v354_v22 = vld [vmem:[#allocation2 + $0x10] sm:$0xff] }
  0x1d   : > { %464 = vmatprep.subr.bf16.mxu0 %v771_v6  ;;  %v355_v25 = vld [vmem:[#allocation2 + $0x18] sm:$0xff]  ;;  %v535_v33 = vld [vmem:[%s919_s3] sm:$0xff] (!%p728_p6)  ;;  %v536_v35 = vld [vmem:[%s919_s3 + $0x8] sm:$0xff] (!%p728_p6)  ;;  %v523_v37 = vsub.s32 (!%p728_p6), 0, %v522_v32  ;;  %v527_v38 = vsub.s32 (!%p728_p6), 1, %v522_v32 }
  0x1e   : > { %v519_v34 = vld [vmem:[%s918_s2] sm:$0x3] (!%p728_p6)  ;;  %v537_v40 = vunpack.c.l.bf16 (!%p728_p6), %v535_v33  ;;  %v538_v41 = vunpack.c.h.bf16 (!%p728_p6), %v535_v33  ;;  %v539_v46 = vunpack.c.l.bf16 (!%p728_p6), %v536_v35  ;;  %v540_v47 = vunpack.c.h.bf16 (!%p728_p6), %v536_v35 }
  0x1f   : > { %v524_v44 = vrot.slane (!%p728_p6), %v519_v34, %v523_v37  ;;  %v528_v45 = vrot.slane (!%p728_p6), %v519_v34, %v527_v38 }
  0x20   : > { %465 = vmatpush1.bf16.msra.mxu0 %v773_v7 }
  0x21   : > { %466 = vmatprep.subr.bf16.mxu0 %v774_v8 }
  0x24   : > { %467 = vmatpush1.bf16.msra.mxu0 %v776_v9 }
  0x25   : > { %468 = vmatprep.subr.bf16.mxu0 %v777_v10 }
  0x28   : > { %469 = vmatpush1.bf16.msra.mxu0 %v779_v11 }
  0x29   : > { %470 = vmatprep.subr.bf16.mxu0 %v780_v12 }
  0x2c   : > { %471 = vmatpush1.bf16.msra.mxu0 %v782_v13 }
  0x2d   : > { %472 = vmatprep.subr.bf16.mxu0 %v783_v14 }
  0x30   : > { %473 = vmatpush1.bf16.msra.mxu0 %v785_v15 }
  0x31   : > { %474 = vmatprep.subr.bf16.mxu0 %v786_v16 }
  0x34   : > { %475 = vmatpush1.bf16.msra.mxu0 %v788_v17 }
  0x37   : > { %493 = vmatmul.mubr.bf16.vlgmr.msra.gmra.mrb[0].mxu0 %v789_v18 }
 0x10a   : > { %v494_v21 = vpop.f32.mrb[0].mxu0  ;;  %514 = sbr.rel (%p728_p6) target bundleno = 287 (0x11f), region = 44 }
 0x10b   : > { %v503_v23 = vadd.f32 %v494_v21, %v352_v19  ;;  %v496_v24 = vpop.f32.mrb[1].mxu0 }
 0x10c   : > { %v504_v26 = vadd.f32 %v496_v24, %v353_v20  ;;  %v498_v27 = vpop.f32.mrb[2].mxu0 }
 0x10d   : > { %507 = vst [vmem:[#allocation2] sm:$0xff] %v503_v23  ;;  %v505_v28 = vadd.f32 %v498_v27, %v354_v22  ;;  %v500_v29 = vpop.f32.mrb[3].mxu0 }
 0x10e   : > { %508 = vst [vmem:[#allocation2 + $0x8] sm:$0xff] %v504_v26  ;;  %v506_v30 = vadd.f32 %v500_v29, %v355_v25 }
 0x10f   : > { %509 = vst [vmem:[#allocation2 + $0x10] sm:$0xff] %v505_v28 }
 0x110   : > { %510 = vst [vmem:[#allocation2 + $0x18] sm:$0xff] %v506_v30 }
 0x114   : > { %v515_v36 = vld [vmem:[#allocation2] sm:$0xff] }
 0x115   : > { %v516_v39 = vld [vmem:[#allocation2 + $0x8] sm:$0xff]  ;;  %v531_v48 = vadd.f32 %v524_v44, %v515_v36 }
 0x116   : > { %v517_v42 = vld [vmem:[#allocation2 + $0x10] sm:$0xff]  ;;  %v532_v49 = vadd.f32 %v528_v45, %v516_v39 }
 0x117   : > { %v518_v43 = vld [vmem:[#allocation2 + $0x18] sm:$0xff]  ;;  %v533_v50 = vadd.f32 %v524_v44, %v517_v42  ;;  %v541_v52 = vadd.f32 %v537_v40, %v531_v48 }
 0x118   : > { %v534_v51 = vadd.f32 %v528_v45, %v518_v43  ;;  %v542_v53 = vadd.f32 %v538_v41, %v532_v49 }
 0x119   : > { %v543_v54 = vadd.f32 %v539_v46, %v533_v50 }
 0x11a   : > { %v544_v55 = vadd.f32 %v540_v47, %v534_v51  ;;  %v737_v56 = vpack.c.bf16 %v542_v53, %v541_v52 }
 0x11c   : > { %v738_v57 = vpack.c.bf16 %v544_v55, %v543_v54  ;;  %557 = vst [vmem:[%s920_s4] sm:$0xff] %v737_v56 }
 0x11e   : > { %558 = vst [vmem:[%s920_s4 + $0x8] sm:$0xff] %v738_v57 }
 0x11f PF: > { %s14_s17 = sadd.s32 1, %s812_s17   ;;  %s921_s15 = smov %s808_s16 }
 0x120   : > { %p11_p7 = scmp.ge.s32.totalorder %s14_s17, 4   ;;  %s922_s16 = smov %s924_s18 }
 0x122   :  { %13 = sbr.rel (!%p11_p7) target bundleno = 2 (0x2), region = 83 }

// kernel: encoder_decoder_forward.42
= control target key start
LH: loop header
LB: loop body
LE: loop exit
PB: predicated region body
PF: predicated region fallthrough
CT: control target
= control target key end

     0   :  { %s821_s18 = smov 0   ;;  %s823_s19 = smov 0   ;;  %s900_s0 = inlined_call_operand.vmem [shape: bf16[16,256], index: 0, kind: input, shape index: {}]   ;;  %s901_s1 = inlined_call_operand.vmem [shape: f32[1,256], index: 1, kind: input, shape index: {}]   ;;  %s902_s2 = inlined_call_operand.vmem [shape: f32[1,256], index: 2, kind: input, shape index: {}]   ;;  %s903_s3 = inlined_call_operand.vmem [shape: bf16[2,256,128], index: 3, kind: input, shape index: {}]   ;;  %s904_s4 = inlined_call_operand.vmem [shape: f32[2,1,128], index: 4, kind: input, shape index: {}]   ;;  %s905_s5 = inlined_call_operand.vmem [shape: bf16[2,16,128], index: 5, kind: output, shape index: {}]  }
   0x1   :  { %s825_s20 = smov 0  }
   0x2 LB: > { %s24_s21 = sadd.s32 1, %s785_s19  ;;  %p665_p0 = scmp.ge.s32.totalorder %s789_s20, 1  ;;  %s789_s20 = sphi %s825_s20, %s15_s20   ;;  %s785_s19 = sphi %s823_s19, %s907_s19   ;;  %s781_s18 = sphi %s821_s18, %s906_s18  }
   0x3   : > { %p25_p1 = scmp.ge.s32.totalorder %s24_s21, 2  ;;  %p221_p2 = scmp.lt.s32.totalorder %s789_s20, 3 }
   0x5   : > { %s909_s21 = smov (%p25_p1, %s24_s21), 0  ;;  %p222_p3 = pnand %p665_p0, %p221_p2 }
   0x6   : > { %p269_p4 = scmp.lt.s32.totalorder (!%p222_p3), %s781_s18, 1  ;;  %p670_p5 = scmp.ne.s32.totalorder (!%p222_p3), %s781_s18, 0 }
   0x7   : > { %225 = sbr.rel (%p222_p3) target bundleno = 595 (0x253), region = 40 }
   0xe   : > { %s839_s22 = scalar_select %p269_p4, %s781_s18, 1 }
   0xf   : > { %291 = sbr.rel (%p670_p5) target bundleno = 340 (0x154), region = 44  ;;  %v292_v0 = vld [vmem:[%s900_s0] sm:$0xff] (!%p670_p5)  ;;  %v293_v1 = vld [vmem:[%s900_s0 + $0x8] sm:$0xff] (!%p670_p5)  ;;  %v333_v25 = vlaneseq (!%p670_p5) }
  0x10   : > { %s692_s23 = sshll.u32 %s839_s22, 7  ;;  %s276_s26 = scalar_lea.vmem %s904_s4, %s839_s22  ;;  %v294_v2 = vunpack.c.l.bf16 (!%p670_p5), %v292_v0  ;;  %v295_v3 = vunpack.c.h.bf16 (!%p670_p5), %v292_v0  ;;  %v296_v4 = vunpack.c.l.bf16 (!%p670_p5), %v293_v1  ;;  %v297_v5 = vunpack.c.h.bf16 (!%p670_p5), %v293_v1  ;;  %v331_v32 = vld [vmem:[%s901_s1] sm:$0x3] (!%p670_p5) }
  0x11   : > { %s849_s29 = scalar_lea.vmem %s903_s3, %s692_s23  ;;  %s693_s30 = sshll.u32 %s839_s22, 3  ;;  %v334_v29 = vshrl.u32 (!%p670_p5), %v333_v25, 7  ;;  %v347_v36 = vld [vmem:[%s902_s2] sm:$0x3] (!%p670_p5) }
  0x12   : > { %s855_s8 = scalar_lea.vmem %s905_s5, %s693_s30  ;;  %v298_v6 = vadd.f32 (!%p670_p5), %v295_v3, %v294_v2  ;;  %v301_v7 = vadd.f32 (!%p670_p5), %v297_v5, %v296_v4 }
  0x13   : > { %v335_v30 = vsub.s32 (!%p670_p5), 0, %v334_v29  ;;  %v339_v31 = vsub.s32 (!%p670_p5), 1, %v334_v29 }
  0x14   : > { %299 = vadd.xlane.f32.xlu0 (!%p670_p5), %v298_v6 }
  0x15   : > { %v336_v34 = vrot.slane (!%p670_p5), %v331_v32, %v335_v30  ;;  %v340_v35 = vrot.slane (!%p670_p5), %v331_v32, %v339_v31  ;;  %v352_v40 = vrot.slane (!%p670_p5), %v347_v36, %v335_v30  ;;  %v356_v41 = vrot.slane (!%p670_p5), %v347_v36, %v339_v31 }
  0x18   : > { %302 = vadd.xlane.f32.xlu0 %v301_v7 }
  0xa1   : > { %v300_v8 = vpop.xlane.xlu0 %299 }
  0xa2   : > { %v305_v9 = vmul.f32 0.00390625, %v300_v8 }
  0xa4   : > { %v307_v10 = vsub.f32 %v294_v2, %v305_v9  ;;  %v308_v11 = vsub.f32 %v295_v3, %v305_v9 }
  0xa5   : > { %v303_v12 = vpop.xlane.xlu0 %302 }
  0xa6   : > { %v306_v13 = vmul.f32 0.00390625, %v303_v12  ;;  %v311_v14 = vmul.f32 %v307_v10, %v307_v10  ;;  %v312_v15 = vmul.f32 %v308_v11, %v308_v11 }
  0xa8   : > { %v309_v16 = vsub.f32 %v296_v4, %v306_v13  ;;  %v310_v17 = vsub.f32 %v297_v5, %v306_v13  ;;  %v315_v18 = vadd.f32 %v312_v15, %v311_v14 }
  0xaa   : > { %316 = vadd.xlane.f32.xlu1 %v315_v18  ;;  %v313_v19 = vmul.f32 %v309_v16, %v309_v16  ;;  %v314_v20 = vmul.f32 %v310_v17, %v310_v17 }
  0xac   : > { %v318_v21 = vadd.f32 %v314_v20, %v313_v19 }
  0xae   : > { %319 = vadd.xlane.f32.xlu1 %v318_v21 }
 0x137   : > { %v317_v22 = vpop.xlane.xlu1 %316 }
 0x138   : > { %v321_v23 = vmul.f32 0.00390625, %v317_v22 }
 0x13a   : > { %v323_v24 = vadd.f32 1e-05, %v321_v23 }
 0x13b   : > { %v320_v26 = vpop.xlane.xlu1 %319 }
 0x13c   : > { %747 = vrsqrt.f32 %v323_v24  ;;  %v322_v27 = vmul.f32 0.00390625, %v320_v26 }
 0x13e   : > { %v324_v28 = vadd.f32 1e-05, %v322_v27 }
 0x140   : > { %749 = vrsqrt.f32 %v324_v28 }
 0x146   : > { %v748_v33 = vpop.eup %747 }
 0x147   : > { %v327_v37 = vmul.f32 %v748_v33, %v307_v10  ;;  %v328_v38 = vmul.f32 %v748_v33, %v308_v11 }
 0x149   : > { %v343_v42 = vmul.f32 %v336_v34, %v327_v37  ;;  %v344_v43 = vmul.f32 %v340_v35, %v328_v38 }
 0x14a   : > { %v750_v39 = vpop.eup %749 }
 0x14b   : > { %v329_v44 = vmul.f32 %v750_v39, %v309_v16  ;;  %v330_v45 = vmul.f32 %v750_v39, %v310_v17  ;;  %v359_v48 = vadd.f32 %v352_v40, %v343_v42  ;;  %v360_v49 = vadd.f32 %v356_v41, %v344_v43 }
 0x14d   : > { %v345_v46 = vmul.f32 %v336_v34, %v329_v44  ;;  %v346_v47 = vmul.f32 %v340_v35, %v330_v45 }
 0x14f   : > { %v361_v50 = vadd.f32 %v352_v40, %v345_v46  ;;  %v362_v51 = vadd.f32 %v356_v41, %v346_v47 }
 0x151   : > { %v363_v52 = vpack.c.bf16 %v361_v50, %v359_v48  ;;  %v364_v53 = vpack.c.bf16 %v362_v51, %v360_v49 }
 0x153   : > { %365 = vst [vmem:[#allocation2] sm:$0xff] %v363_v52  ;;  %366 = vst [vmem:[#allocation2 + $0x8] sm:$0xff] %v364_v53 }
 0x154 PF: > { %v751_v54 = vld [vmem:[%s849_s29 + $0x40] sm:$0xff]   ;;  %v753_v56 = vld [vmem:[%s849_s29 + $0x48] sm:$0xff]   ;;  %v755_v58 = vld [vmem:[%s849_s29 + $0x50] sm:$0xff]  }
 0x155   : > { %v752_v55 = vld [vmem:[%s849_s29] sm:$0xff]   ;;  %701 = vmatprep.subr.bf16.mxu0 %v751_v54  ;;  %v754_v57 = vld [vmem:[%s849_s29 + $0x8] sm:$0xff]   ;;  %v756_v59 = vld [vmem:[%s849_s29 + $0x10] sm:$0xff]  }
 0x156   : > { %702 = vmatpush3.bf16.msra.mxu0 %v752_v55  ;;  %v757_v60 = vld [vmem:[%s849_s29 + $0x58] sm:$0xff]   ;;  %v759_v62 = vld [vmem:[%s849_s29 + $0x60] sm:$0xff]   ;;  %v761_v0 = vld [vmem:[%s849_s29 + $0x68] sm:$0xff]  }
 0x157   : > { %703 = vmatprep.subr.bf16.mxu0 %v753_v56  ;;  %v758_v61 = vld [vmem:[%s849_s29 + $0x18] sm:$0xff]   ;;  %v760_v63 = vld [vmem:[%s849_s29 + $0x20] sm:$0xff]   ;;  %v762_v2 = vld [vmem:[%s849_s29 + $0x28] sm:$0xff]  }
 0x158   : > { %v763_v3 = vld [vmem:[%s849_s29 + $0x70] sm:$0xff]   ;;  %v765_v5 = vld [vmem:[%s849_s29 + $0x78] sm:$0xff]   ;;  %v671_v12 = vld [vmem:[%s276_s26] ss:$0 sm:$0xff] }
 0x159   : > { %v764_v4 = vld [vmem:[%s849_s29 + $0x30] sm:$0xff]   ;;  %v766_v6 = vld [vmem:[%s849_s29 + $0x38] sm:$0xff]  }
 0x15a   : > { %704 = vmatpush3.bf16.msra.mxu0 %v754_v57  ;;  %v368_v1 = vld [vmem:[#allocation2 + $0x8] sm:$0xff]  ;;  %v367_v7 = vld [vmem:[#allocation2] sm:$0xff] }
 0x15b   : > { %705 = vmatprep.subr.bf16.mxu0 %v755_v58  ;;  %536 = vmatprep.mubr.bf16.mxu0 %v368_v1 }
 0x15e   : > { %706 = vmatpush3.bf16.msra.mxu0 %v756_v59 }
 0x15f   : > { %707 = vmatprep.subr.bf16.mxu0 %v757_v60 }
 0x162   : > { %708 = vmatpush3.bf16.msra.mxu0 %v758_v61 }
 0x163   : > { %709 = vmatprep.subr.bf16.mxu0 %v759_v62 }
 0x166   : > { %710 = vmatpush3.bf16.msra.mxu0 %v760_v63 }
 0x167   : > { %711 = vmatprep.subr.bf16.mxu0 %v761_v0 }
 0x16a   : > { %712 = vmatpush3.bf16.msra.mxu0 %v762_v2 }
 0x16b   : > { %713 = vmatprep.subr.bf16.mxu0 %v763_v3 }
 0x16e   : > { %714 = vmatpush3.bf16.msra.mxu0 %v764_v4 }
 0x16f   : > { %715 = vmatprep.subr.bf16.mxu0 %v765_v5 }
 0x172   : > { %716 = vmatpush3.bf16.msra.mxu0 %v766_v6 }
 0x175   : > { %537 = vmatmul.mubr.bf16.vlgmr.msra.gmra.mrb[0].mxu0 %v367_v7 }
 0x248   : > { %v717_v8 = vpop.f32.mrb[0].mxu0 }
 0x249   : > { %v718_v9 = vpop.f32.mrb[1].mxu0 }
 0x24a   : > { %v719_v10 = vadd.f32 %v718_v9, %v717_v8  ;;  %v720_v11 = vpop.f32.mrb[2].mxu0 }
 0x24b   : > { %v721_v13 = vpop.f32.mrb[3].mxu0 }
 0x24c   : > { %v722_v14 = vadd.f32 %v721_v13, %v720_v11  ;;  %v539_v15 = vadd.f32 %v719_v10, %v671_v12 }
 0x24e   : > { %v542_v16 = vadd.f32 %v722_v14, %v671_v12 }
 0x250   : > { %v699_v17 = vpack.c.bf16 %v542_v16, %v539_v15 }
 0x252   : > { %700 = vst [vmem:[%s855_s8] sm:$0xff] %v699_v17  }
 0x253 PF: > { %s15_s20 = sadd.s32 1, %s789_s20   ;;  %s906_s18 = smov %s785_s19 }
 0x254   : > { %p12_p6 = scmp.ge.s32.totalorder %s15_s20, 4   ;;  %s907_s19 = smov %s909_s21 }
 0x256   :  { %14 = sbr.rel (!%p12_p6) target bundleno = 2 (0x2), region = 80 }

// kernel: encoder_decoder_forward.39
= control target key start
LH: loop header
LB: loop body
LE: loop exit
PB: predicated region body
PF: predicated region fallthrough
CT: control target
= control target key end

     0   :  { %10 = vsyncpa [#allocation4], 0  ;;  %s1118_s0 = inlined_call_operand.vmem [shape: bf16[16,256], index: 0, kind: input, shape index: {}]   ;;  %s1119_s1 = inlined_call_operand.vmem [shape: f32[1,256], index: 1, kind: input, shape index: {}]   ;;  %s1120_s2 = inlined_call_operand.vmem [shape: f32[1,256], index: 2, kind: input, shape index: {}]   ;;  %s1121_s3 = inlined_call_operand.hbm [shape: bf16[6,256,128], index: 3, kind: input, shape index: {}]   ;;  %s1122_s4 = inlined_call_operand.vmem [shape: f32[6,1,128], index: 4, kind: input, shape index: {}]   ;;  %s1123_s5 = inlined_call_operand.vmem [shape: bf16[6,16,128], index: 5, kind: output, shape index: {}]  }
   0x1   :  { %12 = vsyncpa [#allocation4 + $0x1], 0  ;;  %s948_s18 = smov 0   ;;  %s950_s19 = smov 0  }
   0x2   :  { %s952_s20 = smov 0   ;;  %s954_s21 = smov 0  }
   0x3   :  { %s956_s22 = smov 0   ;;  %s958_s23 = smov 0  }
   0x4 LB: > { %s691_s24 = sadd.s32 4294967295, %s913_s23   ;;  %s27_s25 = sadd.s32 1, %s909_s22  ;;  %s913_s23 = sphi %s958_s23, %s18_s23   ;;  %s909_s22 = sphi %s956_s22, %s1131_s22   ;;  %s905_s21 = sphi %s954_s21, %s1130_s21   ;;  %s901_s20 = sphi %s952_s20, %s1129_s20   ;;  %s897_s19 = sphi %s950_s19, %s1128_s19   ;;  %s893_s18 = sphi %s948_s18, %s1127_s18  }
   0x5   : > { %p28_p0 = scmp.ge.s32.totalorder %s27_s25, 6  ;;  %s105_s26 = sadd.s32 1, %s901_s20 }
   0x6   : > { %p112_p1 = scmp.ne.s32.totalorder %s901_s20, %s897_s19  ;;  %p113_p2 = scmp.eq.s32.totalorder %s913_s23, 0 }
   0x7   : > { %s1133_s25 = smov (%p28_p0, %s27_s25), 0  ;;  %p118_p4 = scmp.ne.s32.totalorder %s897_s19, %s893_s18 }
   0x8   : > { %p984_p3 = por %p113_p2, %p112_p1  ;;  %s102_s28 = ssub.s32 %s909_s22, %s1133_s25 }
   0x9   : > { %p119_p5 = scmp.eq.s32.totalorder %s691_s24, 0  ;;  %p103_p6 = scmp.eq.s32.totalorder %s102_s28, 0 }
   0xa   : > { %p762_p8 = scmp.lt.s32.totalorder %s913_s23, 6  ;;  %s212_s6 = sand.u32 1, %s901_s20  }
   0xb   : > { %p991_p7 = por %p119_p5, %p118_p4  ;;  %s725_s7 = sshll.u32 %s909_s22, 11 }
   0xc   : > { %s997_s30 = scalar_select %p103_p6, %s901_s20, %s105_s26  }
   0xd   : > { %s696_s8 = sshll.u32 %s212_s6, 7  ;;  %s1004_s11 = scalar_lea.hbm %s1121_s3, %s725_s7 }
   0xe   : > { %s216_s12 = scalar_lea.vmem [#allocation3], %s696_s8  ;;  %p1008_p9 = pnand %p762_p8, %p984_p3 }
   0xf   : > { %s223_s13 = sshll.u32 %s216_s12, 4  ;;  %s1014_s15 = scalar_lea.sflag [#allocation4], %s212_s6  ;;  %s1012_s13 = int_to_ptr.vmem [resolvable:$true] %s223_s13 }
  0x10   : > { %s833_s16 = scalar_lea.hbm %s1004_s11, 2048  ;;  %p835_p11 = pneg %p1008_p9 }
  0x11   : > { %p834_p10 = scmp.ne.s32.totalorder %s1004_s11, %s833_s16  ;;  %s838_s24 = scalar_lea.hbm %s1121_s3, 12288 }
  0x12   : > { %p839_p0 = scmp.lt.u32.totalorder %s1004_s11, %s1121_s3  ;;  %p840_p1 = scmp.lt.u32.totalorder %s838_s24, %s833_s16 }
  0x13   : > { %p836_p12 = pnand %p835_p11, %p834_p10  ;;  %p842_p3 = scmp.lt.u32.totalorder %s833_s16, %s1004_s11 }
  0x14   : > { %p841_p2 = por %p840_p1, %p839_p0 }
  0x15   : > { %p837_p13 = pneg %p836_p12 }
  0x16   : > { %p843_p4 = por %p842_p3, %p841_p2 }
  0x18   : > { %p844_p5 = pnand %p843_p4, %p837_p13 }
  0x1a   : > { %847 = shalt.err (!%p844_p5)
}
  0x1b   : > { %s848_s28 = scalar_lea.vmem %s1012_s13, 2048  ;;  %s915_s6 = smov [#allocation3]  }
  0x1c   : > { %p849_p6 = scmp.ne.s32.totalorder %s1012_s13, %s848_s28  ;;  %s853_s7 = sshll.u32 %s915_s6, 4  ;;  %s854_s7 = int_to_ptr.vmem [resolvable:$false] %s853_s7 }
  0x1d   : > { %s855_s8 = scalar_lea.vmem %s854_s7, 4096  ;;  %p856_p12 = scmp.lt.s32.totalorder %s1012_s13, %s854_s7 }
  0x1e   : > { %p851_p8 = pnand %p849_p6, %p835_p11  ;;  %p857_p0 = scmp.lt.s32.totalorder %s855_s8, %s848_s28 }
  0x20   : > { %p852_p10 = pneg %p851_p8  ;;  %p858_p1 = por %p857_p0, %p856_p12 }
  0x22   : > { %p859_p2 = pnand %p858_p1, %p852_p10 }
  0x24   : > { %862 = shalt.err (!%p859_p2)
}
  0x25   : > { %s916_s9 = smov 64   ;;  %s917_s10 = smov 4  }
  0x26   : > { %761 = dma.hbm_to_vmem [thread:$0]  (!%p1008_p9), %s1004_s11, 2048, %s1012_s13, %s1014_s15, %s916_s9, %s916_s9, %s917_s10  }
  0x27   : > { %p699_p11 = scmp.ge.s32.totalorder %s913_s23, 1  ;;  %p237_p13 = scmp.lt.s32.totalorder %s913_s23, 7 }
  0x29   : > { %p238_p3 = pnand %p699_p11, %p237_p13 }
  0x2a   : > { %s243_s12 = sand.u32 (!%p238_p3), 1, %s897_s19  }
  0x2b   : > { %241 = sbr.rel (%p238_p3) target bundleno = 633 (0x279), region = 40  ;;  %s700_s16 = sshll.u32 (!%p238_p3), %s243_s12, 7 }
  0x2c   : > { %s244_s17 = scalar_lea.sflag (!%p238_p3), [#allocation4], %s243_s12  ;;  %s1045_s18 = scalar_lea.vmem (!%p238_p3), [#allocation3], %s700_s16 }
  0x32   : > { %888 = dma.done.wait (%p991_p7), %s244_s17, 2048  }
  0x33   : > { %890 = vsyncadd (%p991_p7), %s244_s17, 4294965248  ;;  %p294_p4 = scmp.lt.s32.totalorder %s905_s21, 5  ;;  %p703_p9 = scmp.ne.s32.totalorder %s905_s21, 0 }
  0x34   : > { %v312_v0 = vld [vmem:[%s1118_s0] sm:$0xff] (!%p703_p9)  ;;  %v313_v1 = vld [vmem:[%s1118_s0 + $0x8] sm:$0xff] (!%p703_p9)  ;;  %v353_v25 = vlaneseq (!%p703_p9) }
  0x35   : > { %s1053_s11 = scalar_select %p294_p4, %s905_s21, 5 }
  0x36   : > { %311 = sbr.rel (%p703_p9) target bundleno = 378 (0x17a), region = 48  ;;  %v314_v2 = vunpack.c.l.bf16 (!%p703_p9), %v312_v0  ;;  %v315_v3 = vunpack.c.h.bf16 (!%p703_p9), %v312_v0  ;;  %v316_v4 = vunpack.c.l.bf16 (!%p703_p9), %v313_v1  ;;  %v317_v5 = vunpack.c.h.bf16 (!%p703_p9), %v313_v1  ;;  %v351_v32 = vld [vmem:[%s1119_s1] sm:$0x3] (!%p703_p9) }
  0x37   : > { %s296_s15 = scalar_lea.vmem %s1122_s4, %s1053_s11  ;;  %s726_s24 = sshll.u32 %s1053_s11, 3  ;;  %v354_v29 = vshrl.u32 (!%p703_p9), %v353_v25, 7  ;;  %v367_v36 = vld [vmem:[%s1120_s2] sm:$0x3] (!%p703_p9) }
  0x38   : > { %s1063_s28 = scalar_lea.vmem %s1123_s5, %s726_s24  ;;  %v318_v6 = vadd.f32 (!%p703_p9), %v315_v3, %v314_v2  ;;  %v321_v7 = vadd.f32 (!%p703_p9), %v317_v5, %v316_v4 }
  0x39   : > { %v355_v30 = vsub.s32 (!%p703_p9), 0, %v354_v29  ;;  %v359_v31 = vsub.s32 (!%p703_p9), 1, %v354_v29 }
  0x3a   : > { %319 = vadd.xlane.f32.xlu0 (!%p703_p9), %v318_v6 }
  0x3b   : > { %v356_v34 = vrot.slane (!%p703_p9), %v351_v32, %v355_v30  ;;  %v360_v35 = vrot.slane (!%p703_p9), %v351_v32, %v359_v31  ;;  %v372_v40 = vrot.slane (!%p703_p9), %v367_v36, %v355_v30  ;;  %v376_v41 = vrot.slane (!%p703_p9), %v367_v36, %v359_v31 }
  0x3e   : > { %322 = vadd.xlane.f32.xlu0 %v321_v7 }
  0xc7   : > { %v320_v8 = vpop.xlane.xlu0 %319 }
  0xc8   : > { %v325_v9 = vmul.f32 0.00390625, %v320_v8 }
  0xca   : > { %v327_v10 = vsub.f32 %v314_v2, %v325_v9  ;;  %v328_v11 = vsub.f32 %v315_v3, %v325_v9 }
  0xcb   : > { %v323_v12 = vpop.xlane.xlu0 %322 }
  0xcc   : > { %v326_v13 = vmul.f32 0.00390625, %v323_v12  ;;  %v331_v14 = vmul.f32 %v327_v10, %v327_v10  ;;  %v332_v15 = vmul.f32 %v328_v11, %v328_v11 }
  0xce   : > { %v329_v16 = vsub.f32 %v316_v4, %v326_v13  ;;  %v330_v17 = vsub.f32 %v317_v5, %v326_v13  ;;  %v335_v18 = vadd.f32 %v332_v15, %v331_v14 }
  0xd0   : > { %336 = vadd.xlane.f32.xlu1 %v335_v18  ;;  %v333_v19 = vmul.f32 %v329_v16, %v329_v16  ;;  %v334_v20 = vmul.f32 %v330_v17, %v330_v17 }
  0xd2   : > { %v338_v21 = vadd.f32 %v334_v20, %v333_v19 }
  0xd4   : > { %339 = vadd.xlane.f32.xlu1 %v338_v21 }
 0x15d   : > { %v337_v22 = vpop.xlane.xlu1 %336 }
 0x15e   : > { %v341_v23 = vmul.f32 0.00390625, %v337_v22 }
 0x160   : > { %v343_v24 = vadd.f32 1e-05, %v341_v23 }
 0x161   : > { %v340_v26 = vpop.xlane.xlu1 %339 }
 0x162   : > { %813 = vrsqrt.f32 %v343_v24  ;;  %v342_v27 = vmul.f32 0.00390625, %v340_v26 }
 0x164   : > { %v344_v28 = vadd.f32 1e-05, %v342_v27 }
 0x166   : > { %815 = vrsqrt.f32 %v344_v28 }
 0x16c   : > { %v814_v33 = vpop.eup %813 }
 0x16d   : > { %v347_v37 = vmul.f32 %v814_v33, %v327_v10  ;;  %v348_v38 = vmul.f32 %v814_v33, %v328_v11 }
 0x16f   : > { %v363_v42 = vmul.f32 %v356_v34, %v347_v37  ;;  %v364_v43 = vmul.f32 %v360_v35, %v348_v38 }
 0x170   : > { %v816_v39 = vpop.eup %815 }
 0x171   : > { %v349_v44 = vmul.f32 %v816_v39, %v329_v16  ;;  %v350_v45 = vmul.f32 %v816_v39, %v330_v17  ;;  %v379_v48 = vadd.f32 %v372_v40, %v363_v42  ;;  %v380_v49 = vadd.f32 %v376_v41, %v364_v43 }
 0x173   : > { %v365_v46 = vmul.f32 %v356_v34, %v349_v44  ;;  %v366_v47 = vmul.f32 %v360_v35, %v350_v45 }
 0x175   : > { %v381_v50 = vadd.f32 %v372_v40, %v365_v46  ;;  %v382_v51 = vadd.f32 %v376_v41, %v366_v47 }
 0x177   : > { %v383_v52 = vpack.c.bf16 %v381_v50, %v379_v48  ;;  %v384_v53 = vpack.c.bf16 %v382_v51, %v380_v49 }
 0x179   : > { %385 = vst [vmem:[#allocation2] sm:$0xff] %v383_v52  ;;  %386 = vst [vmem:[#allocation2 + $0x8] sm:$0xff] %v384_v53 }
 0x17a PF: > { %v817_v54 = vld [vmem:[%s1045_s18 + $0x40] sm:$0xff]   ;;  %v819_v56 = vld [vmem:[%s1045_s18 + $0x48] sm:$0xff]   ;;  %v821_v58 = vld [vmem:[%s1045_s18 + $0x50] sm:$0xff]  }
 0x17b   : > { %v818_v55 = vld [vmem:[%s1045_s18] sm:$0xff]   ;;  %734 = vmatprep.subr.bf16.mxu0 %v817_v54  ;;  %v820_v57 = vld [vmem:[%s1045_s18 + $0x8] sm:$0xff]   ;;  %v822_v59 = vld [vmem:[%s1045_s18 + $0x10] sm:$0xff]  }
 0x17c   : > { %735 = vmatpush3.bf16.msra.mxu0 %v818_v55  ;;  %v823_v60 = vld [vmem:[%s1045_s18 + $0x58] sm:$0xff]   ;;  %v825_v62 = vld [vmem:[%s1045_s18 + $0x60] sm:$0xff]   ;;  %v827_v0 = vld [vmem:[%s1045_s18 + $0x68] sm:$0xff]  }
 0x17d   : > { %736 = vmatprep.subr.bf16.mxu0 %v819_v56  ;;  %v824_v61 = vld [vmem:[%s1045_s18 + $0x18] sm:$0xff]   ;;  %v826_v63 = vld [vmem:[%s1045_s18 + $0x20] sm:$0xff]   ;;  %v828_v2 = vld [vmem:[%s1045_s18 + $0x28] sm:$0xff]  }
 0x17e   : > { %v829_v3 = vld [vmem:[%s1045_s18 + $0x70] sm:$0xff]   ;;  %v831_v5 = vld [vmem:[%s1045_s18 + $0x78] sm:$0xff]  }
 0x17f   : > { %v830_v4 = vld [vmem:[%s1045_s18 + $0x30] sm:$0xff]   ;;  %v832_v6 = vld [vmem:[%s1045_s18 + $0x38] sm:$0xff]  }
 0x180   : > { %737 = vmatpush3.bf16.msra.mxu0 %v820_v57  ;;  %v388_v1 = vld [vmem:[#allocation2 + $0x8] sm:$0xff]  ;;  %v387_v7 = vld [vmem:[#allocation2] sm:$0xff] }
 0x181   : > { %738 = vmatprep.subr.bf16.mxu0 %v821_v58  ;;  %556 = vmatprep.mubr.bf16.mxu0 %v388_v1  ;;  %v704_v12 = vld [vmem:[%s296_s15] ss:$0 sm:$0xff] }
 0x184   : > { %739 = vmatpush3.bf16.msra.mxu0 %v822_v59 }
 0x185   : > { %740 = vmatprep.subr.bf16.mxu0 %v823_v60 }
 0x188   : > { %741 = vmatpush3.bf16.msra.mxu0 %v824_v61 }
 0x189   : > { %742 = vmatprep.subr.bf16.mxu0 %v825_v62 }
 0x18c   : > { %743 = vmatpush3.bf16.msra.mxu0 %v826_v63 }
 0x18d   : > { %744 = vmatprep.subr.bf16.mxu0 %v827_v0 }
 0x190   : > { %745 = vmatpush3.bf16.msra.mxu0 %v828_v2 }
 0x191   : > { %746 = vmatprep.subr.bf16.mxu0 %v829_v3 }
 0x194   : > { %747 = vmatpush3.bf16.msra.mxu0 %v830_v4 }
 0x195   : > { %748 = vmatprep.subr.bf16.mxu0 %v831_v5 }
 0x198   : > { %749 = vmatpush3.bf16.msra.mxu0 %v832_v6 }
 0x19b   : > { %557 = vmatmul.mubr.bf16.vlgmr.msra.gmra.mrb[0].mxu0 %v387_v7 }
 0x26e   : > { %v750_v8 = vpop.f32.mrb[0].mxu0 }
 0x26f   : > { %v751_v9 = vpop.f32.mrb[1].mxu0 }
 0x270   : > { %v752_v10 = vadd.f32 %v751_v9, %v750_v8  ;;  %v753_v11 = vpop.f32.mrb[2].mxu0 }
 0x271   : > { %v754_v13 = vpop.f32.mrb[3].mxu0 }
 0x272   : > { %v755_v14 = vadd.f32 %v754_v13, %v753_v11  ;;  %v559_v15 = vadd.f32 %v752_v10, %v704_v12 }
 0x274   : > { %v562_v16 = vadd.f32 %v755_v14, %v704_v12 }
 0x276   : > { %v732_v17 = vpack.c.bf16 %v562_v16, %v559_v15 }
 0x278   : > { %733 = vst [vmem:[%s1063_s28] sm:$0xff] %v732_v17  }
 0x279 PF: > { %s18_s23 = sadd.s32 1, %s913_s23   ;;  %s1127_s18 = smov %s897_s19 }
 0x27a   : > { %p15_p7 = scmp.ge.s32.totalorder %s18_s23, 8   ;;  %s1128_s19 = smov %s901_s20 }
 0x27b   : > { %s1129_s20 = smov %s997_s30  ;;  %s1130_s21 = smov %s909_s22 }
 0x27c   : > { %s1131_s22 = smov %s1133_s25  ;;  %17 = sbr.rel (!%p15_p7) target bundleno = 4 (0x4), region = 90 }
 0x283   :  { %605 = vsyncpa [#allocation4], 1 }
 0x284   :  { %607 = vsyncpa [#allocation4 + $0x1], 1 }

// kernel: encoder_decoder_forward.40
= control target key start
LH: loop header
LB: loop body
LE: loop exit
PB: predicated region body
PF: predicated region fallthrough
CT: control target
= control target key end

     0   :  { %s718_s15 = smov 0   ;;  %s720_s16 = smov 0   ;;  %s796_s0 = inlined_call_operand.vmem [shape: bf16[6,16,128], index: 0, kind: input, shape index: {}, may-alias: {0,1,2}]   ;;  %s797_s1 = inlined_call_operand.vmem [shape: bf16[6,16,128], index: 1, kind: input, shape index: {}, may-alias: {0,1,2}]   ;;  %s798_s2 = inlined_call_operand.vmem [shape: bf16[6,16,128], index: 2, kind: input, shape index: {}, may-alias: {0,1,2}]   ;;  %s799_s3 = inlined_call_operand.vmem [shape: f32[2,1,8], index: 3, kind: input, shape index: {}]   ;;  %s800_s4 = inlined_call_operand.vmem [shape: bf16[2,16,128], index: 4, kind: output, shape index: {}]  }
   0x1   :  { %s722_s17 = smov 0   ;;  %s724_s18 = smov 0  }
   0x2   :  { %s726_s19 = smov 0  }
   0x3 LB: > { %s23_s20 = sadd.s32 1, %s681_s17  ;;  %s26_s21 = sadd.s32 1, %s685_s18  ;;  %s689_s19 = sphi %s726_s19, %s14_s19   ;;  %s685_s18 = sphi %s724_s18, %s804_s18   ;;  %s681_s17 = sphi %s722_s17, %s803_s17   ;;  %s677_s16 = sphi %s720_s16, %s802_s16   ;;  %s673_s15 = sphi %s718_s15, %s801_s15  }
   0x4   : > { %p24_p0 = scmp.ge.s32.totalorder %s23_s20, 2  ;;  %p576_p1 = scmp.ge.s32.totalorder %s689_s19, 1 }
   0x5   : > { %p227_p2 = scmp.lt.s32.totalorder %s689_s19, 5 }
   0x6   : > { %s806_s20 = smov (%p24_p0, %s23_s20), 0  ;;  %s808_s21 = smov (!%p24_p0, %s26_s21), %s685_s18 }
   0x7   : > { %p228_p3 = pnand %p576_p1, %p227_p2  ;;  %p28_p4 = scmp.ge.s32.totalorder %s808_s21, 2 }
   0x8   : > { %p282_p5 = scmp.lt.s32.totalorder (!%p228_p3), %s677_s16, 1  ;;  %s288_s22 = sadd.s32 (!%p228_p3), 2, %s673_s15  ;;  %v691_v0 = vmov (!%p228_p3), 0.0   ;;  %vm692_vm0 = vmmov (!%p228_p3), 0   ;;  %v373_v6 = vlaneseq (!%p228_p3)  ;;  %vm379_vm2 = vcmask (!%p228_p3), 64512  }
   0x9   : > { %s810_s21 = smov (%p28_p4, %s808_s21), 0  ;;  %231 = sbr.rel (%p228_p3) target bundleno = 622 (0x26e), region = 36 }
   0xa   : > { %593 = vmatprep.subr.bf16.mxu0 (!%p228_p3), %v691_v0  ;;  %p289_p6 = scmp.lt.s32.totalorder (!%p228_p3), %s288_s22, 5  ;;  %595 = vmatprep.mubr.msk.bf16.mxu0 (!%p228_p3), %vm692_vm0, %v691_v0  ;;  %p280_p7 = scmp.lt.s32.totalorder (!%p228_p3), %s673_s15, 5  ;;  %v374_v7 = vshrl.u32 (!%p228_p3), %v373_v6, 7  ;;  %v376_v8 = vand.u32 (!%p228_p3), 127, %v373_v6  ;;  %vm393_vm3 = vcmask (!%p228_p3), 1043456  }
   0xb   : > { %599 = vmatprep.subr.bf16.mxu1 (!%p228_p3), %v691_v0  ;;  %601 = vmatprep.mubr.msk.bf16.mxu1 (!%p228_p3), %vm692_vm0, %v691_v0  ;;  %s298_s13 = sadd.s32 (!%p228_p3), 4, %s673_s15  ;;  %p311_p9 = scmp.lt.s32.totalorder (!%p228_p3), %s673_s15, 1 }
   0xc   : > { %vm377_vm1 = vcmp.le.s32.totalorder (!%p228_p3), %v376_v8, %v374_v7  ;;  %p299_p8 = scmp.lt.s32.totalorder (!%p228_p3), %s298_s13, 5 }
  0x10   : > { %s812_s16 = smov (!%p282_p5, %s677_s16), 1  ;;  %s814_s22 = smov (!%p289_p6, %s288_s22), 5 }
  0x11   : > { %s281_s23 = scalar_select %p280_p7, %s673_s15, 5 }
  0x12   : > { %s579_s24 = sshll.u32 %s814_s22, 1  ;;  %s310_s12 = scalar_lea.vmem %s799_s3, %s812_s16 }
  0x13   : > { %s294_s25 = sadd.s32 %s579_s24, %s812_s16  ;;  %s577_s26 = sshll.u32 %s281_s23, 1  ;;  %v585_v9 = vld [vmem:[%s310_s12] ss:$0 sm:$0xff] }
  0x14   : > { %s580_s27 = sshll.u32 %s294_s25, 2  ;;  %s285_s28 = sadd.s32 %s577_s26, %s812_s16 }
  0x15   : > { %s296_s5 = scalar_lea.vmem %s797_s1, %s580_s27  ;;  %s578_s6 = sshll.u32 %s285_s28, 2 }
  0x16   : > { %v324_v1 = vld [vmem:[%s296_s5] sm:$0xf]  ;;  %s287_s9 = scalar_lea.vmem %s796_s0, %s578_s6  ;;  %s816_s13 = smov (!%p299_p8, %s298_s13), 5 }
  0x17   : > { %594 = vmatpush3.bf16.xpose.msra.mxu0 %v324_v1  ;;  %v320_v2 = vld [vmem:[%s287_s9] sm:$0xf]  ;;  %s581_s14 = sshll.u32 %s816_s13, 1  ;;  %s818_s15 = smov (!%p311_p9, %s673_s15), 1 }
  0x18   : > { %v321_v3 = vunpack.c.l.bf16 %v320_v2  ;;  %s304_s22 = sadd.s32 %s581_s14, %s812_s16  ;;  %s583_s27 = sshll.u32 %s818_s15, 1 }
  0x19   : > { %s582_s23 = sshll.u32 %s304_s22, 2  ;;  %s316_s28 = sadd.s32 %s583_s27, %s812_s16 }
  0x1a   : > { %v322_v4 = vmul.f32 0.088388346, %v321_v3  ;;  %s306_s26 = scalar_lea.vmem %s798_s2, %s582_s23  ;;  %s584_s29 = sshll.u32 %s316_s28, 2 }
  0x1b   : > { %v325_v17 = vld [vmem:[%s306_s26] sm:$0xf]  ;;  %s318_s6 = scalar_lea.vmem %s800_s4, %s584_s29 }
  0x1c   : > { %v323_v5 = vpack.c.bf16 %v322_v4, %v322_v4  ;;  %v395_v18 = vsel %vm393_vm3, %v325_v17, 0 }
  0x1d   : > { %600 = vmatpush3.bf16.msra.mxu1 %v395_v18 }
  0x1e   : > { %596 = vmatmul.mubr.bf16.vlgmr.msra.gmra.mrb[0].mxu0 %v323_v5 }
  0xf1   : > { %v367_v10 = vpop.f32.mrb[0].mxu0 }
  0xf2   : > { %v368_v11 = vadd.f32 %v585_v9, %v367_v10  ;;  %v597_v12 = vpop.f32.mrb[1].mxu0 }
  0xf3   : > { %v370_v13 = vpop.f32.mrb[2].mxu0 }
  0xf4   : > { %v598_v14 = vpop.f32.mrb[3].mxu0  ;;  %v378_v15 = vsel %vm377_vm1, %v368_v11, -1e+09 }
  0xf5   : > { %v380_v16 = vsel %vm379_vm2, %v378_v15, -inf }
  0xf6   : > { %381 = vmax.xlane.f32.xlu0 %v380_v16 }
 0x183   : > { %v382_v19 = vpop.xlane.xlu0 %381 }
 0x184   : > { %v383_v20 = vsub.f32 %v378_v15, %v382_v19 }
 0x186   : > { %v384_v21 = vmul.f32 1.442695, %v383_v20 }
 0x188   : > { %647 = vpow2.f32 %v384_v21 }
 0x192   : > { %v648_v22 = vpop.eup %647 }
 0x193   : > { %v386_v23 = vsel %vm379_vm2, %v648_v22, 0.0  ;;  %v389_v24 = vpack.c.bf16 %v648_v22, %v648_v22 }
 0x194   : > { %387 = vadd.xlane.f32.xlu0 %v386_v23 }
 0x195   : > { %602 = vmatmul.mubr.msk.bf16.vlgmr.msra.gmra.mrb[0].mxu1 %vm379_vm2, %v389_v24 }
 0x221   : > { %v388_v25 = vpop.xlane.xlu0 %387 }
 0x222   : > { %649 = vrcp.f32 %v388_v25 }
 0x22c   : > { %v650_v26 = vpop.eup %649 }
 0x268   : > { %v431_v27 = vpop.f32.mrb[0].mxu1 }
 0x269   : > { %v438_v28 = vmul.f32 %v650_v26, %v431_v27  ;;  %v603_v29 = vpop.f32.mrb[1].mxu1 }
 0x26a   : > { %v434_v30 = vpop.f32.mrb[2].mxu1 }
 0x26b   : > { %v439_v31 = vpack.c.bf16 %v438_v28, %v438_v28  ;;  %v604_v32 = vpop.f32.mrb[3].mxu1 }
 0x26d   : > { %440 = vst [vmem:[%s318_s6] sm:$0xf] %v439_v31 }
 0x26e PF: > { %s14_s19 = sadd.s32 1, %s689_s19   ;;  %s801_s15 = smov %s681_s17 }
 0x26f   : > { %p11_p10 = scmp.ge.s32.totalorder %s14_s19, 6   ;;  %s802_s16 = smov %s685_s18 }
 0x270   : > { %s803_s17 = smov %s806_s20  ;;  %s804_s18 = smov %s810_s21 }
 0x271   :  { %13 = sbr.rel (!%p11_p10) target bundleno = 3 (0x3), region = 75 }

// kernel: encoder_decoder_forward.30
= control target key start
LH: loop header
LB: loop body
LE: loop exit
PB: predicated region body
PF: predicated region fallthrough
CT: control target
= control target key end

     0   :  { %s712_s15 = smov 0   ;;  %s714_s16 = smov 0   ;;  %s790_s0 = inlined_call_operand.vmem [shape: bf16[6,16,128], index: 0, kind: input, shape index: {}, may-alias: {0,1,2}]   ;;  %s791_s1 = inlined_call_operand.vmem [shape: bf16[6,16,128], index: 1, kind: input, shape index: {}, may-alias: {0,1,2}]   ;;  %s792_s2 = inlined_call_operand.vmem [shape: bf16[6,16,128], index: 2, kind: input, shape index: {}, may-alias: {0,1,2}]   ;;  %s793_s3 = inlined_call_operand.vmem [shape: f32[2,1,8], index: 3, kind: input, shape index: {}]   ;;  %s794_s4 = inlined_call_operand.vmem [shape: bf16[2,16,128], index: 4, kind: output, shape index: {}]  }
   0x1   :  { %s716_s17 = smov 0   ;;  %s718_s18 = smov 0  }
   0x2   :  { %s720_s19 = smov 0  }
   0x3 LB: > { %s23_s20 = sadd.s32 1, %s675_s17  ;;  %s26_s21 = sadd.s32 1, %s679_s18  ;;  %s683_s19 = sphi %s720_s19, %s14_s19   ;;  %s679_s18 = sphi %s718_s18, %s798_s18   ;;  %s675_s17 = sphi %s716_s17, %s797_s17   ;;  %s671_s16 = sphi %s714_s16, %s796_s16   ;;  %s667_s15 = sphi %s712_s15, %s795_s15  }
   0x4   : > { %p24_p0 = scmp.ge.s32.totalorder %s23_s20, 2  ;;  %p570_p1 = scmp.ge.s32.totalorder %s683_s19, 1 }
   0x5   : > { %p227_p2 = scmp.lt.s32.totalorder %s683_s19, 5 }
   0x6   : > { %s800_s20 = smov (%p24_p0, %s23_s20), 0  ;;  %s802_s21 = smov (!%p24_p0, %s26_s21), %s679_s18 }
   0x7   : > { %p228_p3 = pnand %p570_p1, %p227_p2  ;;  %p28_p4 = scmp.ge.s32.totalorder %s802_s21, 2 }
   0x8   : > { %p282_p5 = scmp.lt.s32.totalorder (!%p228_p3), %s671_s16, 1  ;;  %s288_s22 = sadd.s32 (!%p228_p3), 2, %s667_s15  ;;  %v685_v0 = vmov (!%p228_p3), 0.0   ;;  %vm686_vm0 = vmmov (!%p228_p3), 0   ;;  %vm373_vm1 = vcmask (!%p228_p3), 64512   ;;  %vm387_vm2 = vcmask (!%p228_p3), 1043456  }
   0x9   : > { %s804_s21 = smov (%p28_p4, %s802_s21), 0  ;;  %231 = sbr.rel (%p228_p3) target bundleno = 621 (0x26d), region = 36 }
   0xa   : > { %587 = vmatprep.subr.bf16.mxu0 (!%p228_p3), %v685_v0  ;;  %p289_p6 = scmp.lt.s32.totalorder (!%p228_p3), %s288_s22, 5  ;;  %589 = vmatprep.mubr.msk.bf16.mxu0 (!%p228_p3), %vm686_vm0, %v685_v0  ;;  %p280_p7 = scmp.lt.s32.totalorder (!%p228_p3), %s667_s15, 5 }
   0xb   : > { %593 = vmatprep.subr.bf16.mxu1 (!%p228_p3), %v685_v0  ;;  %595 = vmatprep.mubr.msk.bf16.mxu1 (!%p228_p3), %vm686_vm0, %v685_v0  ;;  %s298_s13 = sadd.s32 (!%p228_p3), 4, %s667_s15  ;;  %p311_p9 = scmp.lt.s32.totalorder (!%p228_p3), %s667_s15, 1 }
   0xc   : > { %p299_p8 = scmp.lt.s32.totalorder (!%p228_p3), %s298_s13, 5 }
  0x10   : > { %s806_s16 = smov (!%p282_p5, %s671_s16), 1  ;;  %s808_s22 = smov (!%p289_p6, %s288_s22), 5 }
  0x11   : > { %s281_s23 = scalar_select %p280_p7, %s667_s15, 5 }
  0x12   : > { %s573_s24 = sshll.u32 %s808_s22, 1  ;;  %s310_s12 = scalar_lea.vmem %s793_s3, %s806_s16 }
  0x13   : > { %s294_s25 = sadd.s32 %s573_s24, %s806_s16  ;;  %s571_s26 = sshll.u32 %s281_s23, 1  ;;  %v579_v6 = vld [vmem:[%s310_s12] ss:$0 sm:$0xff] }
  0x14   : > { %s574_s27 = sshll.u32 %s294_s25, 2  ;;  %s285_s28 = sadd.s32 %s571_s26, %s806_s16 }
  0x15   : > { %s296_s5 = scalar_lea.vmem %s791_s1, %s574_s27  ;;  %s572_s6 = sshll.u32 %s285_s28, 2 }
  0x16   : > { %v324_v1 = vld [vmem:[%s296_s5] sm:$0xf]  ;;  %s287_s9 = scalar_lea.vmem %s790_s0, %s572_s6  ;;  %s810_s13 = smov (!%p299_p8, %s298_s13), 5 }
  0x17   : > { %588 = vmatpush3.bf16.xpose.msra.mxu0 %v324_v1  ;;  %v320_v2 = vld [vmem:[%s287_s9] sm:$0xf]  ;;  %s575_s14 = sshll.u32 %s810_s13, 1  ;;  %s812_s15 = smov (!%p311_p9, %s667_s15), 1 }
  0x18   : > { %v321_v3 = vunpack.c.l.bf16 %v320_v2  ;;  %s304_s22 = sadd.s32 %s575_s14, %s806_s16  ;;  %s577_s27 = sshll.u32 %s812_s15, 1 }
  0x19   : > { %s576_s23 = sshll.u32 %s304_s22, 2  ;;  %s316_s28 = sadd.s32 %s577_s27, %s806_s16 }
  0x1a   : > { %v322_v4 = vmul.f32 0.088388346, %v321_v3  ;;  %s306_s26 = scalar_lea.vmem %s792_s2, %s576_s23  ;;  %s578_s29 = sshll.u32 %s316_s28, 2 }
  0x1b   : > { %v325_v13 = vld [vmem:[%s306_s26] sm:$0xf]  ;;  %s318_s6 = scalar_lea.vmem %s794_s4, %s578_s29 }
  0x1c   : > { %v323_v5 = vpack.c.bf16 %v322_v4, %v322_v4  ;;  %v389_v14 = vsel %vm387_vm2, %v325_v13, 0 }
  0x1d   : > { %594 = vmatpush3.bf16.msra.mxu1 %v389_v14 }
  0x1e   : > { %590 = vmatmul.mubr.bf16.vlgmr.msra.gmra.mrb[0].mxu0 %v323_v5 }
  0xf1   : > { %v367_v7 = vpop.f32.mrb[0].mxu0 }
  0xf2   : > { %v368_v8 = vadd.f32 %v579_v6, %v367_v7  ;;  %v591_v9 = vpop.f32.mrb[1].mxu0 }
  0xf3   : > { %v370_v10 = vpop.f32.mrb[2].mxu0 }
  0xf4   : > { %v592_v11 = vpop.f32.mrb[3].mxu0  ;;  %v374_v12 = vsel %vm373_vm1, %v368_v8, -inf }
  0xf5   : > { %375 = vmax.xlane.f32.xlu0 %v374_v12 }
 0x182   : > { %v376_v15 = vpop.xlane.xlu0 %375 }
 0x183   : > { %v377_v16 = vsub.f32 %v368_v8, %v376_v15 }
 0x185   : > { %v378_v17 = vmul.f32 1.442695, %v377_v16 }
 0x187   : > { %641 = vpow2.f32 %v378_v17 }
 0x191   : > { %v642_v18 = vpop.eup %641 }
 0x192   : > { %v380_v19 = vsel %vm373_vm1, %v642_v18, 0.0  ;;  %v383_v20 = vpack.c.bf16 %v642_v18, %v642_v18 }
 0x193   : > { %381 = vadd.xlane.f32.xlu0 %v380_v19 }
 0x194   : > { %596 = vmatmul.mubr.msk.bf16.vlgmr.msra.gmra.mrb[0].mxu1 %vm373_vm1, %v383_v20 }
 0x220   : > { %v382_v21 = vpop.xlane.xlu0 %381 }
 0x221   : > { %643 = vrcp.f32 %v382_v21 }
 0x22b   : > { %v644_v22 = vpop.eup %643 }
 0x267   : > { %v425_v23 = vpop.f32.mrb[0].mxu1 }
 0x268   : > { %v432_v24 = vmul.f32 %v644_v22, %v425_v23  ;;  %v597_v25 = vpop.f32.mrb[1].mxu1 }
 0x269   : > { %v428_v26 = vpop.f32.mrb[2].mxu1 }
 0x26a   : > { %v433_v27 = vpack.c.bf16 %v432_v24, %v432_v24  ;;  %v598_v28 = vpop.f32.mrb[3].mxu1 }
 0x26c   : > { %434 = vst [vmem:[%s318_s6] sm:$0xf] %v433_v27 }
 0x26d PF: > { %s14_s19 = sadd.s32 1, %s683_s19   ;;  %s795_s15 = smov %s675_s17 }
 0x26e   : > { %p11_p10 = scmp.ge.s32.totalorder %s14_s19, 6   ;;  %s796_s16 = smov %s679_s18 }
 0x26f   : > { %s797_s17 = smov %s800_s20  ;;  %s798_s18 = smov %s804_s21 }
 0x270   :  { %13 = sbr.rel (!%p11_p10) target bundleno = 3 (0x3), region = 75 }

// kernel: encoder_decoder_forward.29
= control target key start
LH: loop header
LB: loop body
LE: loop exit
PB: predicated region body
PF: predicated region fallthrough
CT: control target
= control target key end

     0   :  { %s821_s18 = smov 0   ;;  %s823_s19 = smov 0   ;;  %s900_s0 = inlined_call_operand.vmem [shape: bf16[16,256], index: 0, kind: input, shape index: {}]   ;;  %s901_s1 = inlined_call_operand.vmem [shape: f32[1,256], index: 1, kind: input, shape index: {}]   ;;  %s902_s2 = inlined_call_operand.vmem [shape: f32[1,256], index: 2, kind: input, shape index: {}]   ;;  %s903_s3 = inlined_call_operand.vmem [shape: bf16[6,256,128], index: 3, kind: input, shape index: {}]   ;;  %s904_s4 = inlined_call_operand.vmem [shape: f32[6,1,128], index: 4, kind: input, shape index: {}]   ;;  %s905_s5 = inlined_call_operand.vmem [shape: bf16[6,16,128], index: 5, kind: output, shape index: {}]  }
   0x1   :  { %s825_s20 = smov 0  }
   0x2 LB: > { %s24_s21 = sadd.s32 1, %s785_s19  ;;  %p665_p0 = scmp.ge.s32.totalorder %s789_s20, 1  ;;  %s789_s20 = sphi %s825_s20, %s15_s20   ;;  %s785_s19 = sphi %s823_s19, %s907_s19   ;;  %s781_s18 = sphi %s821_s18, %s906_s18  }
   0x3   : > { %p25_p1 = scmp.ge.s32.totalorder %s24_s21, 6  ;;  %p221_p2 = scmp.lt.s32.totalorder %s789_s20, 7 }
   0x5   : > { %s909_s21 = smov (%p25_p1, %s24_s21), 0  ;;  %p222_p3 = pnand %p665_p0, %p221_p2 }
   0x6   : > { %p269_p4 = scmp.lt.s32.totalorder (!%p222_p3), %s781_s18, 5  ;;  %p670_p5 = scmp.ne.s32.totalorder (!%p222_p3), %s781_s18, 0 }
   0x7   : > { %225 = sbr.rel (%p222_p3) target bundleno = 595 (0x253), region = 40 }
   0xe   : > { %s839_s22 = scalar_select %p269_p4, %s781_s18, 5 }
   0xf   : > { %291 = sbr.rel (%p670_p5) target bundleno = 340 (0x154), region = 44  ;;  %v292_v0 = vld [vmem:[%s900_s0] sm:$0xff] (!%p670_p5)  ;;  %v293_v1 = vld [vmem:[%s900_s0 + $0x8] sm:$0xff] (!%p670_p5)  ;;  %v333_v25 = vlaneseq (!%p670_p5) }
  0x10   : > { %s692_s23 = sshll.u32 %s839_s22, 7  ;;  %s276_s26 = scalar_lea.vmem %s904_s4, %s839_s22  ;;  %v294_v2 = vunpack.c.l.bf16 (!%p670_p5), %v292_v0  ;;  %v295_v3 = vunpack.c.h.bf16 (!%p670_p5), %v292_v0  ;;  %v296_v4 = vunpack.c.l.bf16 (!%p670_p5), %v293_v1  ;;  %v297_v5 = vunpack.c.h.bf16 (!%p670_p5), %v293_v1  ;;  %v331_v32 = vld [vmem:[%s901_s1] sm:$0x3] (!%p670_p5) }
  0x11   : > { %s849_s29 = scalar_lea.vmem %s903_s3, %s692_s23  ;;  %s693_s30 = sshll.u32 %s839_s22, 3  ;;  %v334_v29 = vshrl.u32 (!%p670_p5), %v333_v25, 7  ;;  %v347_v36 = vld [vmem:[%s902_s2] sm:$0x3] (!%p670_p5) }
  0x12   : > { %s855_s8 = scalar_lea.vmem %s905_s5, %s693_s30  ;;  %v298_v6 = vadd.f32 (!%p670_p5), %v295_v3, %v294_v2  ;;  %v301_v7 = vadd.f32 (!%p670_p5), %v297_v5, %v296_v4 }
  0x13   : > { %v335_v30 = vsub.s32 (!%p670_p5), 0, %v334_v29  ;;  %v339_v31 = vsub.s32 (!%p670_p5), 1, %v334_v29 }
  0x14   : > { %299 = vadd.xlane.f32.xlu0 (!%p670_p5), %v298_v6 }
  0x15   : > { %v336_v34 = vrot.slane (!%p670_p5), %v331_v32, %v335_v30  ;;  %v340_v35 = vrot.slane (!%p670_p5), %v331_v32, %v339_v31  ;;  %v352_v40 = vrot.slane (!%p670_p5), %v347_v36, %v335_v30  ;;  %v356_v41 = vrot.slane (!%p670_p5), %v347_v36, %v339_v31 }
  0x18   : > { %302 = vadd.xlane.f32.xlu0 %v301_v7 }
  0xa1   : > { %v300_v8 = vpop.xlane.xlu0 %299 }
  0xa2   : > { %v305_v9 = vmul.f32 0.00390625, %v300_v8 }
  0xa4   : > { %v307_v10 = vsub.f32 %v294_v2, %v305_v9  ;;  %v308_v11 = vsub.f32 %v295_v3, %v305_v9 }
  0xa5   : > { %v303_v12 = vpop.xlane.xlu0 %302 }
  0xa6   : > { %v306_v13 = vmul.f32 0.00390625, %v303_v12  ;;  %v311_v14 = vmul.f32 %v307_v10, %v307_v10  ;;  %v312_v15 = vmul.f32 %v308_v11, %v308_v11 }
  0xa8   : > { %v309_v16 = vsub.f32 %v296_v4, %v306_v13  ;;  %v310_v17 = vsub.f32 %v297_v5, %v306_v13  ;;  %v315_v18 = vadd.f32 %v312_v15, %v311_v14 }
  0xaa   : > { %316 = vadd.xlane.f32.xlu1 %v315_v18  ;;  %v313_v19 = vmul.f32 %v309_v16, %v309_v16  ;;  %v314_v20 = vmul.f32 %v310_v17, %v310_v17 }
  0xac   : > { %v318_v21 = vadd.f32 %v314_v20, %v313_v19 }
  0xae   : > { %319 = vadd.xlane.f32.xlu1 %v318_v21 }
 0x137   : > { %v317_v22 = vpop.xlane.xlu1 %316 }
 0x138   : > { %v321_v23 = vmul.f32 0.00390625, %v317_v22 }
 0x13a   : > { %v323_v24 = vadd.f32 1e-05, %v321_v23 }
 0x13b   : > { %v320_v26 = vpop.xlane.xlu1 %319 }
 0x13c   : > { %747 = vrsqrt.f32 %v323_v24  ;;  %v322_v27 = vmul.f32 0.00390625, %v320_v26 }
 0x13e   : > { %v324_v28 = vadd.f32 1e-05, %v322_v27 }
 0x140   : > { %749 = vrsqrt.f32 %v324_v28 }
 0x146   : > { %v748_v33 = vpop.eup %747 }
 0x147   : > { %v327_v37 = vmul.f32 %v748_v33, %v307_v10  ;;  %v328_v38 = vmul.f32 %v748_v33, %v308_v11 }
 0x149   : > { %v343_v42 = vmul.f32 %v336_v34, %v327_v37  ;;  %v344_v43 = vmul.f32 %v340_v35, %v328_v38 }
 0x14a   : > { %v750_v39 = vpop.eup %749 }
 0x14b   : > { %v329_v44 = vmul.f32 %v750_v39, %v309_v16  ;;  %v330_v45 = vmul.f32 %v750_v39, %v310_v17  ;;  %v359_v48 = vadd.f32 %v352_v40, %v343_v42  ;;  %v360_v49 = vadd.f32 %v356_v41, %v344_v43 }
 0x14d   : > { %v345_v46 = vmul.f32 %v336_v34, %v329_v44  ;;  %v346_v47 = vmul.f32 %v340_v35, %v330_v45 }
 0x14f   : > { %v361_v50 = vadd.f32 %v352_v40, %v345_v46  ;;  %v362_v51 = vadd.f32 %v356_v41, %v346_v47 }
 0x151   : > { %v363_v52 = vpack.c.bf16 %v361_v50, %v359_v48  ;;  %v364_v53 = vpack.c.bf16 %v362_v51, %v360_v49 }
 0x153   : > { %365 = vst [vmem:[#allocation2] sm:$0xff] %v363_v52  ;;  %366 = vst [vmem:[#allocation2 + $0x8] sm:$0xff] %v364_v53 }
 0x154 PF: > { %v751_v54 = vld [vmem:[%s849_s29 + $0x40] sm:$0xff]   ;;  %v753_v56 = vld [vmem:[%s849_s29 + $0x48] sm:$0xff]   ;;  %v755_v58 = vld [vmem:[%s849_s29 + $0x50] sm:$0xff]  }
 0x155   : > { %v752_v55 = vld [vmem:[%s849_s29] sm:$0xff]   ;;  %701 = vmatprep.subr.bf16.mxu0 %v751_v54  ;;  %v754_v57 = vld [vmem:[%s849_s29 + $0x8] sm:$0xff]   ;;  %v756_v59 = vld [vmem:[%s849_s29 + $0x10] sm:$0xff]  }
 0x156   : > { %702 = vmatpush3.bf16.msra.mxu0 %v752_v55  ;;  %v757_v60 = vld [vmem:[%s849_s29 + $0x58] sm:$0xff]   ;;  %v759_v62 = vld [vmem:[%s849_s29 + $0x60] sm:$0xff]   ;;  %v761_v0 = vld [vmem:[%s849_s29 + $0x68] sm:$0xff]  }
 0x157   : > { %703 = vmatprep.subr.bf16.mxu0 %v753_v56  ;;  %v758_v61 = vld [vmem:[%s849_s29 + $0x18] sm:$0xff]   ;;  %v760_v63 = vld [vmem:[%s849_s29 + $0x20] sm:$0xff]   ;;  %v762_v2 = vld [vmem:[%s849_s29 + $0x28] sm:$0xff]  }
 0x158   : > { %v763_v3 = vld [vmem:[%s849_s29 + $0x70] sm:$0xff]   ;;  %v765_v5 = vld [vmem:[%s849_s29 + $0x78] sm:$0xff]   ;;  %v671_v12 = vld [vmem:[%s276_s26] ss:$0 sm:$0xff] }
 0x159   : > { %v764_v4 = vld [vmem:[%s849_s29 + $0x30] sm:$0xff]   ;;  %v766_v6 = vld [vmem:[%s849_s29 + $0x38] sm:$0xff]  }
 0x15a   : > { %704 = vmatpush3.bf16.msra.mxu0 %v754_v57  ;;  %v368_v1 = vld [vmem:[#allocation2 + $0x8] sm:$0xff]  ;;  %v367_v7 = vld [vmem:[#allocation2] sm:$0xff] }
 0x15b   : > { %705 = vmatprep.subr.bf16.mxu0 %v755_v58  ;;  %536 = vmatprep.mubr.bf16.mxu0 %v368_v1 }
 0x15e   : > { %706 = vmatpush3.bf16.msra.mxu0 %v756_v59 }
 0x15f   : > { %707 = vmatprep.subr.bf16.mxu0 %v757_v60 }
 0x162   : > { %708 = vmatpush3.bf16.msra.mxu0 %v758_v61 }
 0x163   : > { %709 = vmatprep.subr.bf16.mxu0 %v759_v62 }
 0x166   : > { %710 = vmatpush3.bf16.msra.mxu0 %v760_v63 }
 0x167   : > { %711 = vmatprep.subr.bf16.mxu0 %v761_v0 }
 0x16a   : > { %712 = vmatpush3.bf16.msra.mxu0 %v762_v2 }
 0x16b   : > { %713 = vmatprep.subr.bf16.mxu0 %v763_v3 }
 0x16e   : > { %714 = vmatpush3.bf16.msra.mxu0 %v764_v4 }
 0x16f   : > { %715 = vmatprep.subr.bf16.mxu0 %v765_v5 }
 0x172   : > { %716 = vmatpush3.bf16.msra.mxu0 %v766_v6 }
 0x175   : > { %537 = vmatmul.mubr.bf16.vlgmr.msra.gmra.mrb[0].mxu0 %v367_v7 }
 0x248   : > { %v717_v8 = vpop.f32.mrb[0].mxu0 }
 0x249   : > { %v718_v9 = vpop.f32.mrb[1].mxu0 }
 0x24a   : > { %v719_v10 = vadd.f32 %v718_v9, %v717_v8  ;;  %v720_v11 = vpop.f32.mrb[2].mxu0 }
 0x24b   : > { %v721_v13 = vpop.f32.mrb[3].mxu0 }
 0x24c   : > { %v722_v14 = vadd.f32 %v721_v13, %v720_v11  ;;  %v539_v15 = vadd.f32 %v719_v10, %v671_v12 }
 0x24e   : > { %v542_v16 = vadd.f32 %v722_v14, %v671_v12 }
 0x250   : > { %v699_v17 = vpack.c.bf16 %v542_v16, %v539_v15 }
 0x252   : > { %700 = vst [vmem:[%s855_s8] sm:$0xff] %v699_v17  }
 0x253 PF: > { %s15_s20 = sadd.s32 1, %s789_s20   ;;  %s906_s18 = smov %s785_s19 }
 0x254   : > { %p12_p6 = scmp.ge.s32.totalorder %s15_s20, 8   ;;  %s907_s19 = smov %s909_s21 }
 0x256   :  { %14 = sbr.rel (!%p12_p6) target bundleno = 2 (0x2), region = 80 }

// kernel: encoder_decoder_forward.32
= control target key start
LH: loop header
LB: loop body
LE: loop exit
PB: predicated region body
PF: predicated region fallthrough
CT: control target
= control target key end

     0   :  { %s1184_s18 = smov 0   ;;  %s1186_s19 = smov 0   ;;  %s1389_s0 = inlined_call_operand.vmem [shape: bf16[16,256], index: 0, kind: input, shape index: {}]   ;;  %s1390_s1 = inlined_call_operand.vmem [shape: f32[1,256], index: 1, kind: input, shape index: {}]   ;;  %s1391_s2 = inlined_call_operand.vmem [shape: f32[1,256], index: 2, kind: input, shape index: {}]   ;;  %s1392_s3 = inlined_call_operand.vmem [shape: bf16[256,512], index: 3, kind: input, shape index: {}]   ;;  %s1393_s4 = inlined_call_operand.vmem [shape: f32[1,512], index: 4, kind: input, shape index: {}]   ;;  %s1394_s5 = inlined_call_operand.vmem [shape: bf16[16,512], index: 5, kind: output, shape index: {}]  }
   0x1   :  { %s1188_s20 = smov 0   ;;  %s1190_s21 = smov 0  }
   0x2   :  { %s1192_s22 = smov 0  }
   0x3 LB: > { %s24_s23 = sadd.s32 1, %s1148_s21  ;;  %s958_s24 = sadd.s32 4294967295, %s1152_s22   ;;  %s1152_s22 = sphi %s1192_s22, %s15_s22   ;;  %s1148_s21 = sphi %s1190_s21, %s1399_s21   ;;  %s1144_s20 = sphi %s1188_s20, %s1398_s20   ;;  %s1140_s19 = sphi %s1186_s19, %s1397_s19   ;;  %s1136_s18 = sphi %s1184_s18, %s1396_s18  }
   0x4   : > { %p25_p0 = scmp.ge.s32.totalorder %s24_s23, 2  ;;  %p109_p1 = scmp.ne.s32.totalorder %s1140_s19, %s1136_s18 }
   0x5   : > { %p110_p2 = scmp.eq.s32.totalorder %s1152_s22, 0  ;;  %p167_p4 = scmp.eq.s32.totalorder %s958_s24, 1 }
   0x6   : > { %s1401_s23 = smov (%p25_p0, %s24_s23), 0  ;;  %s102_s26 = sadd.s32 1, %s1140_s19 }
   0x7   : > { %p111_p3 = por %p110_p2, %p109_p1  ;;  %s99_s25 = ssub.s32 %s1148_s21, %s1401_s23 }
   0x8   : > { %p100_p5 = scmp.eq.s32.totalorder %s99_s25, 0  ;;  %p1219_p6 = por %p167_p4, %p109_p1 }
   0x9   : > { %p962_p7 = scmp.ge.s32.totalorder %s1152_s22, 2 }
   0xa   : > { %s1224_s28 = scalar_select %p100_p5, %s1140_s19, %s102_s26  }
   0xb   : > { %205 = sbr.rel (%p962_p7) target bundleno = 38 (0x26), region = 28 }
  0x12   : > { %208 = sbr.rel (!%p111_p3) target bundleno = 38 (0x26), region = 32  ;;  %s210_s29 = sand.u32 (%p111_p3), 1, %s1140_s19  }
  0x13   : > { %s1010_s30 = sshll.u32 (%p111_p3), %s1148_s21, 3  ;;  %s963_s6 = sshll.u32 (%p111_p3), %s210_s29, 8 }
  0x14   : > { %s1232_s9 = scalar_lea.vmem (%p111_p3), %s1392_s3, %s1010_s30  ;;  %s1237_s10 = scalar_lea.vmem (%p111_p3), [#allocation3], %s963_s6 }
  0x15   : > { %v305_v0 = vld [vmem:[%s1232_s9] sm:$0xff] (%p111_p3)  ;;  %v307_v1 = vld [vmem:[%s1232_s9 + $0x10] sm:$0xff] (%p111_p3) }
  0x16   : > { %v309_v2 = vld [vmem:[%s1232_s9 + $0x20] sm:$0xff] (%p111_p3)  ;;  %306 = vst [vmem:[%s1237_s10] sm:$0xff] (%p111_p3), %v305_v0  ;;  %308 = vst [vmem:[%s1237_s10 + $0x8] sm:$0xff] (%p111_p3), %v307_v1  ;;  %v311_v3 = vld [vmem:[%s1232_s9 + $0x30] sm:$0xff] (%p111_p3) }
  0x17   : > { %310 = vst [vmem:[%s1237_s10 + $0x10] sm:$0xff] (%p111_p3), %v309_v2  ;;  %v313_v4 = vld [vmem:[%s1232_s9 + $0x40] sm:$0xff] (%p111_p3)  ;;  %v315_v5 = vld [vmem:[%s1232_s9 + $0x50] sm:$0xff] (%p111_p3)  ;;  %312 = vst [vmem:[%s1237_s10 + $0x18] sm:$0xff] (%p111_p3), %v311_v3 }
  0x18   : > { %314 = vst [vmem:[%s1237_s10 + $0x20] sm:$0xff] (%p111_p3), %v313_v4  ;;  %316 = vst [vmem:[%s1237_s10 + $0x28] sm:$0xff] (%p111_p3), %v315_v5  ;;  %v317_v6 = vld [vmem:[%s1232_s9 + $0x60] sm:$0xff] (%p111_p3)  ;;  %v319_v7 = vld [vmem:[%s1232_s9 + $0x70] sm:$0xff] (%p111_p3) }
  0x19   : > { %v321_v8 = vld [vmem:[%s1232_s9 + $0x80] sm:$0xff]  ;;  %318 = vst [vmem:[%s1237_s10 + $0x30] sm:$0xff] %v317_v6  ;;  %320 = vst [vmem:[%s1237_s10 + $0x38] sm:$0xff] %v319_v7  ;;  %v323_v9 = vld [vmem:[%s1232_s9 + $0x90] sm:$0xff] }
  0x1a   : > { %322 = vst [vmem:[%s1237_s10 + $0x40] sm:$0xff] %v321_v8  ;;  %v325_v10 = vld [vmem:[%s1232_s9 + $0xa0] sm:$0xff]  ;;  %v327_v11 = vld [vmem:[%s1232_s9 + $0xb0] sm:$0xff]  ;;  %324 = vst [vmem:[%s1237_s10 + $0x48] sm:$0xff] %v323_v9 }
  0x1b   : > { %326 = vst [vmem:[%s1237_s10 + $0x50] sm:$0xff] %v325_v10  ;;  %328 = vst [vmem:[%s1237_s10 + $0x58] sm:$0xff] %v327_v11  ;;  %v329_v12 = vld [vmem:[%s1232_s9 + $0xc0] sm:$0xff]  ;;  %v331_v13 = vld [vmem:[%s1232_s9 + $0xd0] sm:$0xff] }
  0x1c   : > { %v333_v14 = vld [vmem:[%s1232_s9 + $0xe0] sm:$0xff]  ;;  %330 = vst [vmem:[%s1237_s10 + $0x60] sm:$0xff] %v329_v12  ;;  %332 = vst [vmem:[%s1237_s10 + $0x68] sm:$0xff] %v331_v13  ;;  %v335_v15 = vld [vmem:[%s1232_s9 + $0xf0] sm:$0xff] }
  0x1d   : > { %334 = vst [vmem:[%s1237_s10 + $0x70] sm:$0xff] %v333_v14  ;;  %v337_v16 = vld [vmem:[%s1232_s9 + $0x100] sm:$0xff]  ;;  %v339_v17 = vld [vmem:[%s1232_s9 + $0x110] sm:$0xff]  ;;  %336 = vst [vmem:[%s1237_s10 + $0x78] sm:$0xff] %v335_v15 }
  0x1e   : > { %338 = vst [vmem:[%s1237_s10 + $0x80] sm:$0xff] %v337_v16  ;;  %340 = vst [vmem:[%s1237_s10 + $0x88] sm:$0xff] %v339_v17  ;;  %v341_v18 = vld [vmem:[%s1232_s9 + $0x120] sm:$0xff]  ;;  %v343_v19 = vld [vmem:[%s1232_s9 + $0x130] sm:$0xff] }
  0x1f   : > { %v345_v20 = vld [vmem:[%s1232_s9 + $0x140] sm:$0xff]  ;;  %342 = vst [vmem:[%s1237_s10 + $0x90] sm:$0xff] %v341_v18  ;;  %344 = vst [vmem:[%s1237_s10 + $0x98] sm:$0xff] %v343_v19  ;;  %v347_v21 = vld [vmem:[%s1232_s9 + $0x150] sm:$0xff] }
  0x20   : > { %346 = vst [vmem:[%s1237_s10 + $0xa0] sm:$0xff] %v345_v20  ;;  %v349_v22 = vld [vmem:[%s1232_s9 + $0x160] sm:$0xff]  ;;  %v351_v23 = vld [vmem:[%s1232_s9 + $0x170] sm:$0xff]  ;;  %348 = vst [vmem:[%s1237_s10 + $0xa8] sm:$0xff] %v347_v21 }
  0x21   : > { %350 = vst [vmem:[%s1237_s10 + $0xb0] sm:$0xff] %v349_v22  ;;  %352 = vst [vmem:[%s1237_s10 + $0xb8] sm:$0xff] %v351_v23  ;;  %v353_v24 = vld [vmem:[%s1232_s9 + $0x180] sm:$0xff]  ;;  %v355_v25 = vld [vmem:[%s1232_s9 + $0x190] sm:$0xff] }
  0x22   : > { %v357_v26 = vld [vmem:[%s1232_s9 + $0x1a0] sm:$0xff]  ;;  %354 = vst [vmem:[%s1237_s10 + $0xc0] sm:$0xff] %v353_v24  ;;  %356 = vst [vmem:[%s1237_s10 + $0xc8] sm:$0xff] %v355_v25  ;;  %v359_v27 = vld [vmem:[%s1232_s9 + $0x1b0] sm:$0xff] }
  0x23   : > { %358 = vst [vmem:[%s1237_s10 + $0xd0] sm:$0xff] %v357_v26  ;;  %v361_v28 = vld [vmem:[%s1232_s9 + $0x1c0] sm:$0xff]  ;;  %v363_v29 = vld [vmem:[%s1232_s9 + $0x1d0] sm:$0xff]  ;;  %360 = vst [vmem:[%s1237_s10 + $0xd8] sm:$0xff] %v359_v27 }
  0x24   : > { %362 = vst [vmem:[%s1237_s10 + $0xe0] sm:$0xff] %v361_v28  ;;  %364 = vst [vmem:[%s1237_s10 + $0xe8] sm:$0xff] %v363_v29  ;;  %v365_v30 = vld [vmem:[%s1232_s9 + $0x1e0] sm:$0xff]  ;;  %v367_v31 = vld [vmem:[%s1232_s9 + $0x1f0] sm:$0xff] }
  0x25   : > { %366 = vst [vmem:[%s1237_s10 + $0xf0] sm:$0xff] %v365_v30  ;;  %368 = vst [vmem:[%s1237_s10 + $0xf8] sm:$0xff] %v367_v31 }
  0x26 PF: > { %p966_p8 = scmp.ge.s32.totalorder %s1152_s22, 1  ;;  %p381_p9 = scmp.lt.s32.totalorder %s1152_s22, 3 }
  0x28   : > { %p382_p10 = pnand %p966_p8, %p381_p9 }
  0x29   : > { %s388_s11 = sand.u32 (!%p382_p10), 1, %s1136_s18   ;;  %s969_s12 = sshll.u32 (!%p382_p10), %s1144_s20, 1 }
  0x2a   : > { %385 = sbr.rel (%p382_p10) target bundleno = 695 (0x2b7), region = 74  ;;  %s967_s13 = sshll.u32 (!%p382_p10), %s388_s11, 8 }
  0x2b   : > { %s968_s14 = sshll.u32 (!%p382_p10), %s388_s11, 4  ;;  %p433_p11 = scmp.lt.s32.totalorder (!%p382_p10), %s969_s12, 3 }
  0x2c   : > { %s1310_s24 = scalar_lea.vmem (!%p382_p10), [#allocation3], %s967_s13  ;;  %s1312_s25 = scalar_lea.vmem (!%p382_p10), [#allocation4], %s968_s14 }
  0x2d   : > { %p970_p12 = scmp.ne.s32.totalorder (!%p382_p10), %s1144_s20, 0 }
  0x31   : > { %s1403_s12 = smov (!%p433_p11, %s969_s12), 3  ;;  %442 = sbr.rel (%p970_p12) target bundleno = 375 (0x177), region = 82 }
  0x32   : > { %s435_s17 = scalar_lea.vmem %s1393_s4, %s1403_s12  ;;  %v443_v32 = vld [vmem:[%s1389_s0] sm:$0xff] (!%p970_p12)  ;;  %v444_v33 = vld [vmem:[%s1389_s0 + $0x8] sm:$0xff] (!%p970_p12)  ;;  %v484_v57 = vlaneseq (!%p970_p12) }
  0x33   : > { %v445_v34 = vunpack.c.l.bf16 (!%p970_p12), %v443_v32  ;;  %v446_v35 = vunpack.c.h.bf16 (!%p970_p12), %v443_v32  ;;  %v447_v36 = vunpack.c.l.bf16 (!%p970_p12), %v444_v33  ;;  %v448_v37 = vunpack.c.h.bf16 (!%p970_p12), %v444_v33  ;;  %v482_v0 = vld [vmem:[%s1390_s1] sm:$0x3] (!%p970_p12) }
  0x34   : > { %v485_v61 = vshrl.u32 (!%p970_p12), %v484_v57, 7  ;;  %v498_v4 = vld [vmem:[%s1391_s2] sm:$0x3] (!%p970_p12) }
  0x35   : > { %v449_v38 = vadd.f32 (!%p970_p12), %v446_v35, %v445_v34  ;;  %v452_v39 = vadd.f32 (!%p970_p12), %v448_v37, %v447_v36 }
  0x36   : > { %v486_v62 = vsub.s32 (!%p970_p12), 0, %v485_v61  ;;  %v490_v63 = vsub.s32 (!%p970_p12), 1, %v485_v61 }
  0x37   : > { %450 = vadd.xlane.f32.xlu0 (!%p970_p12), %v449_v38 }
  0x38   : > { %v487_v2 = vrot.slane %v482_v0, %v486_v62  ;;  %v491_v3 = vrot.slane %v482_v0, %v490_v63  ;;  %v503_v8 = vrot.slane %v498_v4, %v486_v62  ;;  %v507_v9 = vrot.slane %v498_v4, %v490_v63 }
  0x3b   : > { %453 = vadd.xlane.f32.xlu0 %v452_v39 }
  0xc4   : > { %v451_v40 = vpop.xlane.xlu0 %450 }
  0xc5   : > { %v456_v41 = vmul.f32 0.00390625, %v451_v40 }
  0xc7   : > { %v458_v42 = vsub.f32 %v445_v34, %v456_v41  ;;  %v459_v43 = vsub.f32 %v446_v35, %v456_v41 }
  0xc8   : > { %v454_v44 = vpop.xlane.xlu0 %453 }
  0xc9   : > { %v457_v45 = vmul.f32 0.00390625, %v454_v44  ;;  %v462_v46 = vmul.f32 %v458_v42, %v458_v42  ;;  %v463_v47 = vmul.f32 %v459_v43, %v459_v43 }
  0xcb   : > { %v460_v48 = vsub.f32 %v447_v36, %v457_v45  ;;  %v461_v49 = vsub.f32 %v448_v37, %v457_v45  ;;  %v466_v50 = vadd.f32 %v463_v47, %v462_v46 }
  0xcd   : > { %467 = vadd.xlane.f32.xlu1 %v466_v50  ;;  %v464_v51 = vmul.f32 %v460_v48, %v460_v48  ;;  %v465_v52 = vmul.f32 %v461_v49, %v461_v49 }
  0xcf   : > { %v469_v53 = vadd.f32 %v465_v52, %v464_v51 }
  0xd1   : > { %470 = vadd.xlane.f32.xlu1 %v469_v53 }
 0x15a   : > { %v468_v54 = vpop.xlane.xlu1 %467 }
 0x15b   : > { %v472_v55 = vmul.f32 0.00390625, %v468_v54 }
 0x15d   : > { %v474_v56 = vadd.f32 1e-05, %v472_v55 }
 0x15e   : > { %v471_v58 = vpop.xlane.xlu1 %470 }
 0x15f   : > { %1054 = vrsqrt.f32 %v474_v56  ;;  %v473_v59 = vmul.f32 0.00390625, %v471_v58 }
 0x161   : > { %v475_v60 = vadd.f32 1e-05, %v473_v59 }
 0x163   : > { %1056 = vrsqrt.f32 %v475_v60 }
 0x169   : > { %v1055_v1 = vpop.eup %1054 }
 0x16a   : > { %v478_v5 = vmul.f32 %v1055_v1, %v458_v42  ;;  %v479_v6 = vmul.f32 %v1055_v1, %v459_v43 }
 0x16c   : > { %v494_v10 = vmul.f32 %v487_v2, %v478_v5  ;;  %v495_v11 = vmul.f32 %v491_v3, %v479_v6 }
 0x16d   : > { %v1057_v7 = vpop.eup %1056 }
 0x16e   : > { %v480_v12 = vmul.f32 %v1057_v7, %v460_v48  ;;  %v481_v13 = vmul.f32 %v1057_v7, %v461_v49  ;;  %v510_v16 = vadd.f32 %v503_v8, %v494_v10  ;;  %v511_v17 = vadd.f32 %v507_v9, %v495_v11 }
 0x170   : > { %v496_v14 = vmul.f32 %v487_v2, %v480_v12  ;;  %v497_v15 = vmul.f32 %v491_v3, %v481_v13 }
 0x172   : > { %v512_v18 = vadd.f32 %v503_v8, %v496_v14  ;;  %v513_v19 = vadd.f32 %v507_v9, %v497_v15 }
 0x174   : > { %v514_v20 = vpack.c.bf16 %v512_v18, %v510_v16  ;;  %v515_v21 = vpack.c.bf16 %v513_v19, %v511_v17 }
 0x176   : > { %516 = vst [vmem:[#allocation2] sm:$0xff] %v514_v20  ;;  %517 = vst [vmem:[#allocation2 + $0x8] sm:$0xff] %v515_v21 }
 0x177 PF: > { %v1058_v22 = vld [vmem:[%s1310_s24 + $0x4] ss:$8 sps:$4 sm:$0xff]   ;;  %v1060_v23 = vld [vmem:[%s1310_s24] ss:$8 sps:$4 sm:$0xff]   ;;  %v1061_v24 = vld [vmem:[%s1310_s24 + $0x14] ss:$8 sps:$4 sm:$0xff]   ;;  %v554_v56 = vlaneseq }
 0x178   : > { %724 = vmatprep.subr.bf16.mxu0 %v1058_v22  ;;  %v1063_v25 = vld [vmem:[%s1310_s24 + $0x10] ss:$8 sps:$4 sm:$0xff]   ;;  %v1064_v26 = vld [vmem:[%s1310_s24 + $0x24] ss:$8 sps:$4 sm:$0xff]   ;;  %v1066_v27 = vld [vmem:[%s1310_s24 + $0x20] ss:$8 sps:$4 sm:$0xff]  }
 0x179   : > { %725 = vmatpush1.bf16.msra.mxu0 %v1060_v23  ;;  %v1067_v28 = vld [vmem:[%s1310_s24 + $0x34] ss:$8 sps:$4 sm:$0xff]   ;;  %v1069_v29 = vld [vmem:[%s1310_s24 + $0x30] ss:$8 sps:$4 sm:$0xff]   ;;  %v1070_v30 = vld [vmem:[%s1310_s24 + $0x44] ss:$8 sps:$4 sm:$0xff]  }
 0x17a   : > { %726 = vmatprep.subr.bf16.mxu0 %v1061_v24  ;;  %v1072_v31 = vld [vmem:[%s1310_s24 + $0x40] ss:$8 sps:$4 sm:$0xff]   ;;  %v1073_v32 = vld [vmem:[%s1310_s24 + $0x54] ss:$8 sps:$4 sm:$0xff]   ;;  %v1075_v33 = vld [vmem:[%s1310_s24 + $0x50] ss:$8 sps:$4 sm:$0xff]  }
 0x17b   : > { %v1076_v34 = vld [vmem:[%s1310_s24 + $0x64] ss:$8 sps:$4 sm:$0xff]   ;;  %v1078_v36 = vld [vmem:[%s1310_s24 + $0x60] ss:$8 sps:$4 sm:$0xff]   ;;  %v1079_v37 = vld [vmem:[%s1310_s24 + $0x74] ss:$8 sps:$4 sm:$0xff]  }
 0x17c   : > { %v1081_v38 = vld [vmem:[%s1310_s24 + $0x70] ss:$8 sps:$4 sm:$0xff]   ;;  %v1082_v39 = vld [vmem:[%s1310_s24 + $0x84] ss:$8 sps:$4 sm:$0xff]   ;;  %v1084_v40 = vld [vmem:[%s1310_s24 + $0x80] ss:$8 sps:$4 sm:$0xff]  }
 0x17d   : > { %727 = vmatpush1.bf16.msra.mxu0 %v1063_v25  ;;  %v519_v35 = vld [vmem:[#allocation2 + $0x8] sm:$0xff]  ;;  %v1088_v43 = vld [vmem:[%s1310_s24 + $0xa4] ss:$8 sps:$4 sm:$0xff]   ;;  %v1090_v44 = vld [vmem:[%s1310_s24 + $0xa0] ss:$8 sps:$4 sm:$0xff]   ;;  %v555_v57 = vshrl.u32 %v554_v56, 7 }
 0x17e   : > { %728 = vmatprep.subr.bf16.mxu0 %v1064_v26  ;;  %756 = vmatprep.mubr.bf16.mxu0 %v519_v35  ;;  %v1085_v41 = vld [vmem:[%s1310_s24 + $0x94] ss:$8 sps:$4 sm:$0xff]   ;;  %v1087_v42 = vld [vmem:[%s1310_s24 + $0x90] ss:$8 sps:$4 sm:$0xff]   ;;  %v1094_v47 = vld [vmem:[%s1310_s24 + $0xc4] ss:$8 sps:$4 sm:$0xff]  }
 0x17f   : > { %v1091_v45 = vld [vmem:[%s1310_s24 + $0xb4] ss:$8 sps:$4 sm:$0xff]   ;;  %v1093_v46 = vld [vmem:[%s1310_s24 + $0xb0] ss:$8 sps:$4 sm:$0xff]   ;;  %v1096_v48 = vld [vmem:[%s1310_s24 + $0xc0] ss:$8 sps:$4 sm:$0xff]  }
 0x180   : > { %v1097_v49 = vld [vmem:[%s1310_s24 + $0xd4] ss:$8 sps:$4 sm:$0xff]   ;;  %v1099_v50 = vld [vmem:[%s1310_s24 + $0xd0] ss:$8 sps:$4 sm:$0xff]   ;;  %v1100_v51 = vld [vmem:[%s1310_s24 + $0xe4] ss:$8 sps:$4 sm:$0xff]  }
 0x181   : > { %729 = vmatpush1.bf16.msra.mxu0 %v1066_v27  ;;  %v1102_v52 = vld [vmem:[%s1310_s24 + $0xe0] ss:$8 sps:$4 sm:$0xff]   ;;  %v1103_v53 = vld [vmem:[%s1310_s24 + $0xf4] ss:$8 sps:$4 sm:$0xff]   ;;  %v1105_v54 = vld [vmem:[%s1310_s24 + $0xf0] ss:$8 sps:$4 sm:$0xff]  }
 0x182   : > { %730 = vmatprep.subr.bf16.mxu0 %v1067_v28  ;;  %v518_v55 = vld [vmem:[#allocation2] sm:$0xff]  ;;  %v556_v58 = vsub.s32 0, %v555_v57  ;;  %v560_v60 = vsub.s32 1, %v555_v57  ;;  %s1013_s12 = sshll.u32 (%p1219_p6), %s1144_s20, 3 }
 0x183   : > { %v552_v59 = vld [vmem:[%s435_s17] sm:$0x3]  ;;  %s829_s15 = scalar_lea.vmem (%p1219_p6), %s1394_s5, %s1013_s12 }
 0x184   : > { %v557_v61 = vrot.slane %v552_v59, %v556_v58  ;;  %v561_v62 = vrot.slane %v552_v59, %v560_v60 }
 0x185   : > { %731 = vmatpush1.bf16.msra.mxu0 %v1069_v29 }
 0x186   : > { %732 = vmatprep.subr.bf16.mxu0 %v1070_v30 }
 0x189   : > { %733 = vmatpush1.bf16.msra.mxu0 %v1072_v31 }
 0x18a   : > { %734 = vmatprep.subr.bf16.mxu0 %v1073_v32 }
 0x18d   : > { %735 = vmatpush1.bf16.msra.mxu0 %v1075_v33 }
 0x18e   : > { %736 = vmatprep.subr.bf16.mxu0 %v1076_v34 }
 0x191   : > { %737 = vmatpush1.bf16.msra.mxu0 %v1078_v36 }
 0x192   : > { %738 = vmatprep.subr.bf16.mxu0 %v1079_v37 }
 0x195   : > { %739 = vmatpush1.bf16.msra.mxu0 %v1081_v38 }
 0x196   : > { %740 = vmatprep.subr.bf16.mxu0 %v1082_v39 }
 0x199   : > { %741 = vmatpush1.bf16.msra.mxu0 %v1084_v40 }
 0x19a   : > { %742 = vmatprep.subr.bf16.mxu0 %v1085_v41 }
 0x19d   : > { %743 = vmatpush1.bf16.msra.mxu0 %v1087_v42 }
 0x19e   : > { %744 = vmatprep.subr.bf16.mxu0 %v1088_v43 }
 0x1a1   : > { %745 = vmatpush1.bf16.msra.mxu0 %v1090_v44 }
 0x1a2   : > { %746 = vmatprep.subr.bf16.mxu0 %v1091_v45 }
 0x1a5   : > { %747 = vmatpush1.bf16.msra.mxu0 %v1093_v46 }
 0x1a6   : > { %748 = vmatprep.subr.bf16.mxu0 %v1094_v47 }
 0x1a9   : > { %749 = vmatpush1.bf16.msra.mxu0 %v1096_v48 }
 0x1aa   : > { %750 = vmatprep.subr.bf16.mxu0 %v1097_v49 }
 0x1ad   : > { %751 = vmatpush1.bf16.msra.mxu0 %v1099_v50 }
 0x1ae   : > { %752 = vmatprep.subr.bf16.mxu0 %v1100_v51 }
 0x1b1   : > { %753 = vmatpush1.bf16.msra.mxu0 %v1102_v52 }
 0x1b2   : > { %754 = vmatprep.subr.bf16.mxu0 %v1103_v53 }
 0x1b5   : > { %755 = vmatpush1.bf16.msra.mxu0 %v1105_v54 }
 0x1b8   : > { %757 = vmatmul.mubr.bf16.vlgmr.msra.gmra.mrb[0].mxu0 %v518_v55 }
 0x28b   : > { %v758_v63 = vpop.f32.mrb[0].mxu0 }
 0x28c   : > { %v759_v0 = vadd.f32 %v758_v63, %v557_v61  ;;  %v760_v1 = vpop.f32.mrb[1].mxu0 }
 0x28d   : > { %v761_v2 = vadd.f32 %v760_v1, %v561_v62  ;;  %v762_v3 = vpop.f32.mrb[2].mxu0 }
 0x28e   : > { %v767_v4 = vmul.f32 %v759_v0, %v759_v0  ;;  %v763_v5 = vadd.f32 %v762_v3, %v557_v61  ;;  %v764_v6 = vpop.f32.mrb[3].mxu0 }
 0x28f   : > { %v768_v7 = vmul.f32 %v761_v2, %v761_v2  ;;  %v765_v8 = vadd.f32 %v764_v6, %v561_v62 }
 0x290   : > { %v771_v9 = vmul.f32 %v767_v4, %v759_v0  ;;  %v769_v10 = vmul.f32 %v763_v5, %v763_v5 }
 0x291   : > { %v772_v11 = vmul.f32 %v768_v7, %v761_v2  ;;  %v770_v12 = vmul.f32 %v765_v8, %v765_v8 }
 0x292   : > { %v775_v13 = vmul.f32 0.044715, %v771_v9  ;;  %v773_v14 = vmul.f32 %v769_v10, %v763_v5 }
 0x293   : > { %v776_v15 = vmul.f32 0.044715, %v772_v11  ;;  %v774_v16 = vmul.f32 %v770_v12, %v765_v8 }
 0x294   : > { %v779_v17 = vadd.f32 %v775_v13, %v759_v0  ;;  %v777_v18 = vmul.f32 0.044715, %v773_v14 }
 0x295   : > { %v780_v19 = vadd.f32 %v776_v15, %v761_v2  ;;  %v778_v20 = vmul.f32 0.044715, %v774_v16 }
 0x296   : > { %v783_v21 = vmul.f32 0.7978846, %v779_v17  ;;  %v781_v22 = vadd.f32 %v777_v18, %v763_v5 }
 0x297   : > { %v784_v23 = vmul.f32 0.7978846, %v780_v19  ;;  %v782_v24 = vadd.f32 %v778_v20, %v765_v8 }
 0x298   : > { %1106 = vtanh.f32 %v783_v21  ;;  %v785_v25 = vmul.f32 0.7978846, %v781_v22 }
 0x299   : > { %1108 = vtanh.f32 %v784_v23  ;;  %v786_v26 = vmul.f32 0.7978846, %v782_v24 }
 0x29a   : > { %1110 = vtanh.f32 %v785_v25 }
 0x29b   : > { %1112 = vtanh.f32 %v786_v26 }
 0x2a2   : > { %v1107_v27 = vpop.eup %1106 }
 0x2a3   : > { %v1109_v28 = vpop.eup %1108  ;;  %v791_v29 = vadd.f32 1.0, %v1107_v27 }
 0x2a4   : > { %v1111_v30 = vpop.eup %1110  ;;  %v792_v31 = vadd.f32 1.0, %v1109_v28 }
 0x2a5   : > { %v1113_v32 = vpop.eup %1112  ;;  %v795_v33 = vmul.f32 0.5, %v791_v29  ;;  %v793_v34 = vadd.f32 1.0, %v1111_v30 }
 0x2a6   : > { %v796_v35 = vmul.f32 0.5, %v792_v31  ;;  %v794_v36 = vadd.f32 1.0, %v1113_v32 }
 0x2a7   : > { %v799_v37 = vmul.f32 %v795_v33, %v759_v0  ;;  %v797_v38 = vmul.f32 0.5, %v793_v34 }
 0x2a8   : > { %v800_v39 = vmul.f32 %v796_v35, %v761_v2  ;;  %v798_v40 = vmul.f32 0.5, %v794_v36  ;;  %823 = sbr.rel (!%p1219_p6) target bundleno = 695 (0x2b7), region = 86 }
 0x2a9   : > { %v801_v41 = vmul.f32 %v797_v38, %v763_v5 }
 0x2aa   : > { %v1011_v42 = vpack.c.bf16 %v800_v39, %v799_v37  ;;  %v802_v43 = vmul.f32 %v798_v40, %v765_v8 }
 0x2ac   : > { %815 = vst [vmem:[%s1312_s25] sm:$0xff] %v1011_v42  ;;  %v1012_v44 = vpack.c.bf16 %v802_v43, %v801_v41 }
 0x2ae   : > { %816 = vst [vmem:[%s1312_s25 + $0x8] sm:$0xff] %v1012_v44 }
 0x2b3   : > { %v859_v45 = vld [vmem:[%s1312_s25] sm:$0xff] }
 0x2b4   : > { %860 = vst [vmem:[%s829_s15] sm:$0xff] %v859_v45 }
 0x2b5   : > { %v861_v46 = vld [vmem:[%s1312_s25 + $0x8] sm:$0xff] }
 0x2b6   : > { %862 = vst [vmem:[%s829_s15 + $0x10] sm:$0xff] %v861_v46 }
 0x2b7 PF: > { %s15_s22 = sadd.s32 1, %s1152_s22   ;;  %s1396_s18 = smov %s1140_s19 }
 0x2b8   : > { %p12_p13 = scmp.ge.s32.totalorder %s15_s22, 4   ;;  %s1397_s19 = smov %s1224_s28 }
 0x2b9   : > { %s1398_s20 = smov %s1148_s21  ;;  %s1399_s21 = smov %s1401_s23 }
 0x2ba   :  { %14 = sbr.rel (!%p12_p13) target bundleno = 3 (0x3), region = 161 }

// kernel: encoder_decoder_forward.33
= control target key start
LH: loop header
LB: loop body
LE: loop exit
PB: predicated region body
PF: predicated region fallthrough
CT: control target
= control target key end

     0   :  { %s1004_s1 = inlined_call_operand.vmem [shape: bf16[512,256], index: 1, kind: input, shape index: {}]   ;;  %s1005_s0 = inlined_call_operand.vmem [shape: bf16[16,512], index: 0, kind: input, shape index: {}]   ;;  %s1006_s2 = inlined_call_operand.vmem [shape: f32[1,256], index: 2, kind: input, shape index: {}]   ;;  %s1007_s3 = inlined_call_operand.vmem [shape: bf16[16,256], index: 3, kind: input, shape index: {}]   ;;  %s1008_s4 = inlined_call_operand.vmem [shape: bf16[16,256], index: 4, kind: output, shape index: {}]  }
   0x1   :  { %v658_v0 = vld [vmem:[%s1004_s1 + $0x4] ss:$8 sps:$4 sm:$0xff]   ;;  %v662_v2 = vld [vmem:[%s1004_s1] ss:$8 sps:$4 sm:$0xff]   ;;  %v664_v4 = vld [vmem:[%s1004_s1 + $0x14] ss:$8 sps:$4 sm:$0xff]  }
   0x2   :  { %v660_v1 = vld [vmem:[%s1004_s1 + $0x104] ss:$8 sps:$4 sm:$0xff]   ;;  %437 = vmatprep.subr.bf16.mxu1 %v658_v0  ;;  %v663_v3 = vld [vmem:[%s1004_s1 + $0x100] ss:$8 sps:$4 sm:$0xff]   ;;  %v666_v5 = vld [vmem:[%s1004_s1 + $0x114] ss:$8 sps:$4 sm:$0xff]  }
   0x3   :  { %480 = vmatprep.subr.bf16.mxu0 %v660_v1  ;;  %438 = vmatpush1.bf16.msra.mxu1 %v662_v2  ;;  %v668_v6 = vld [vmem:[%s1004_s1 + $0x10] ss:$8 sps:$4 sm:$0xff]   ;;  %v670_v8 = vld [vmem:[%s1004_s1 + $0x24] ss:$8 sps:$4 sm:$0xff]   ;;  %v674_v10 = vld [vmem:[%s1004_s1 + $0x20] ss:$8 sps:$4 sm:$0xff]  }
   0x4   :  { %481 = vmatpush1.bf16.msra.mxu0 %v663_v3  ;;  %439 = vmatprep.subr.bf16.mxu1 %v664_v4  ;;  %v669_v7 = vld [vmem:[%s1004_s1 + $0x110] ss:$8 sps:$4 sm:$0xff]   ;;  %v672_v9 = vld [vmem:[%s1004_s1 + $0x124] ss:$8 sps:$4 sm:$0xff]   ;;  %v675_v11 = vld [vmem:[%s1004_s1 + $0x120] ss:$8 sps:$4 sm:$0xff]   ;;  %v540_v4 = vlaneseq }
   0x5   :  { %482 = vmatprep.subr.bf16.mxu0 %v666_v5  ;;  %v676_v12 = vld [vmem:[%s1004_s1 + $0x34] ss:$8 sps:$4 sm:$0xff]   ;;  %v680_v14 = vld [vmem:[%s1004_s1 + $0x30] ss:$8 sps:$4 sm:$0xff]   ;;  %v682_v16 = vld [vmem:[%s1004_s1 + $0x44] ss:$8 sps:$4 sm:$0xff]  }
   0x6   :  { %v678_v13 = vld [vmem:[%s1004_s1 + $0x134] ss:$8 sps:$4 sm:$0xff]   ;;  %v681_v15 = vld [vmem:[%s1004_s1 + $0x130] ss:$8 sps:$4 sm:$0xff]   ;;  %v684_v17 = vld [vmem:[%s1004_s1 + $0x144] ss:$8 sps:$4 sm:$0xff]  }
   0x7   :  { %440 = vmatpush1.bf16.msra.mxu1 %v668_v6  ;;  %v686_v18 = vld [vmem:[%s1004_s1 + $0x40] ss:$8 sps:$4 sm:$0xff]   ;;  %v688_v20 = vld [vmem:[%s1004_s1 + $0x54] ss:$8 sps:$4 sm:$0xff]   ;;  %v692_v22 = vld [vmem:[%s1004_s1 + $0x50] ss:$8 sps:$4 sm:$0xff]  }
   0x8   :  { %483 = vmatpush1.bf16.msra.mxu0 %v669_v7  ;;  %441 = vmatprep.subr.bf16.mxu1 %v670_v8  ;;  %v687_v19 = vld [vmem:[%s1004_s1 + $0x140] ss:$8 sps:$4 sm:$0xff]   ;;  %v690_v21 = vld [vmem:[%s1004_s1 + $0x154] ss:$8 sps:$4 sm:$0xff]   ;;  %v693_v23 = vld [vmem:[%s1004_s1 + $0x150] ss:$8 sps:$4 sm:$0xff]  }
   0x9   :  { %484 = vmatprep.subr.bf16.mxu0 %v672_v9  ;;  %v694_v24 = vld [vmem:[%s1004_s1 + $0x64] ss:$8 sps:$4 sm:$0xff]   ;;  %v698_v26 = vld [vmem:[%s1004_s1 + $0x60] ss:$8 sps:$4 sm:$0xff]   ;;  %v700_v28 = vld [vmem:[%s1004_s1 + $0x74] ss:$8 sps:$4 sm:$0xff]  }
   0xa   :  { %v696_v25 = vld [vmem:[%s1004_s1 + $0x164] ss:$8 sps:$4 sm:$0xff]   ;;  %v699_v27 = vld [vmem:[%s1004_s1 + $0x160] ss:$8 sps:$4 sm:$0xff]   ;;  %v702_v29 = vld [vmem:[%s1004_s1 + $0x174] ss:$8 sps:$4 sm:$0xff]  }
   0xb   :  { %442 = vmatpush1.bf16.msra.mxu1 %v674_v10  ;;  %v704_v30 = vld [vmem:[%s1004_s1 + $0x70] ss:$8 sps:$4 sm:$0xff]   ;;  %v706_v32 = vld [vmem:[%s1004_s1 + $0x84] ss:$8 sps:$4 sm:$0xff]   ;;  %v710_v34 = vld [vmem:[%s1004_s1 + $0x80] ss:$8 sps:$4 sm:$0xff]  }
   0xc   :  { %485 = vmatpush1.bf16.msra.mxu0 %v675_v11  ;;  %443 = vmatprep.subr.bf16.mxu1 %v676_v12  ;;  %v705_v31 = vld [vmem:[%s1004_s1 + $0x170] ss:$8 sps:$4 sm:$0xff]   ;;  %v708_v33 = vld [vmem:[%s1004_s1 + $0x184] ss:$8 sps:$4 sm:$0xff]   ;;  %v711_v35 = vld [vmem:[%s1004_s1 + $0x180] ss:$8 sps:$4 sm:$0xff]  }
   0xd   :  { %486 = vmatprep.subr.bf16.mxu0 %v678_v13  ;;  %v712_v36 = vld [vmem:[%s1004_s1 + $0x94] ss:$8 sps:$4 sm:$0xff]   ;;  %v716_v38 = vld [vmem:[%s1004_s1 + $0x90] ss:$8 sps:$4 sm:$0xff]   ;;  %v718_v40 = vld [vmem:[%s1004_s1 + $0xa4] ss:$8 sps:$4 sm:$0xff]  }
   0xe   :  { %v714_v37 = vld [vmem:[%s1004_s1 + $0x194] ss:$8 sps:$4 sm:$0xff]   ;;  %v717_v39 = vld [vmem:[%s1004_s1 + $0x190] ss:$8 sps:$4 sm:$0xff]   ;;  %v720_v41 = vld [vmem:[%s1004_s1 + $0x1a4] ss:$8 sps:$4 sm:$0xff]  }
   0xf   :  { %444 = vmatpush1.bf16.msra.mxu1 %v680_v14  ;;  %v722_v42 = vld [vmem:[%s1004_s1 + $0xa0] ss:$8 sps:$4 sm:$0xff]   ;;  %v724_v44 = vld [vmem:[%s1004_s1 + $0xb4] ss:$8 sps:$4 sm:$0xff]   ;;  %v728_v46 = vld [vmem:[%s1004_s1 + $0xb0] ss:$8 sps:$4 sm:$0xff]  }
  0x10   :  { %487 = vmatpush1.bf16.msra.mxu0 %v681_v15  ;;  %445 = vmatprep.subr.bf16.mxu1 %v682_v16  ;;  %v723_v43 = vld [vmem:[%s1004_s1 + $0x1a0] ss:$8 sps:$4 sm:$0xff]   ;;  %v726_v45 = vld [vmem:[%s1004_s1 + $0x1b4] ss:$8 sps:$4 sm:$0xff]   ;;  %v729_v48 = vld [vmem:[%s1004_s1 + $0x1b0] ss:$8 sps:$4 sm:$0xff]  }
  0x11   :  { %488 = vmatprep.subr.bf16.mxu0 %v684_v17  ;;  %v756_v47 = vld [vmem:[%s1005_s0 + $0x4] ss:$16 sps:$4 sm:$0xff]   ;;  %v759_v51 = vld [vmem:[%s1005_s0 + $0xc] ss:$16 sps:$4 sm:$0xff]   ;;  %v734_v52 = vld [vmem:[%s1004_s1 + $0xc0] ss:$8 sps:$4 sm:$0xff]  }
  0x12   :  { %v730_v49 = vld [vmem:[%s1004_s1 + $0xc4] ss:$8 sps:$4 sm:$0xff]   ;;  %469 = vmatprep.mubr.bf16.mxu1 %v756_v47  ;;  %512 = vmatprep.mubr.bf16.mxu0 %v759_v51  ;;  %v735_v53 = vld [vmem:[%s1004_s1 + $0x1c0] ss:$8 sps:$4 sm:$0xff]   ;;  %v736_v54 = vld [vmem:[%s1004_s1 + $0xd4] ss:$8 sps:$4 sm:$0xff]  }
  0x13   :  { %446 = vmatpush1.bf16.msra.mxu1 %v686_v18  ;;  %v732_v50 = vld [vmem:[%s1004_s1 + $0x1c4] ss:$8 sps:$4 sm:$0xff]   ;;  %v738_v55 = vld [vmem:[%s1004_s1 + $0x1d4] ss:$8 sps:$4 sm:$0xff]   ;;  %v740_v56 = vld [vmem:[%s1004_s1 + $0xd0] ss:$8 sps:$4 sm:$0xff]  }
  0x14   :  { %489 = vmatpush1.bf16.msra.mxu0 %v687_v19  ;;  %447 = vmatprep.subr.bf16.mxu1 %v688_v20  ;;  %v741_v57 = vld [vmem:[%s1004_s1 + $0x1d0] ss:$8 sps:$4 sm:$0xff]   ;;  %v742_v58 = vld [vmem:[%s1004_s1 + $0xe4] ss:$8 sps:$4 sm:$0xff]   ;;  %v746_v60 = vld [vmem:[%s1004_s1 + $0xe0] ss:$8 sps:$4 sm:$0xff]  }
  0x15   :  { %490 = vmatprep.subr.bf16.mxu0 %v690_v21  ;;  %v744_v59 = vld [vmem:[%s1004_s1 + $0x1e4] ss:$8 sps:$4 sm:$0xff]   ;;  %v747_v61 = vld [vmem:[%s1004_s1 + $0x1e0] ss:$8 sps:$4 sm:$0xff]   ;;  %v748_v62 = vld [vmem:[%s1004_s1 + $0xf4] ss:$8 sps:$4 sm:$0xff]  }
  0x16   :  { %v750_v63 = vld [vmem:[%s1004_s1 + $0x1f4] ss:$8 sps:$4 sm:$0xff]   ;;  %v752_v0 = vld [vmem:[%s1004_s1 + $0xf0] ss:$8 sps:$4 sm:$0xff]   ;;  %v541_v5 = vshrl.u32 %v540_v4, 7  ;;  %v554_v9 = vld [vmem:[%s1007_s3] sm:$0xff] }
  0x17   :  { %448 = vmatpush1.bf16.msra.mxu1 %v692_v22  ;;  %v753_v1 = vld [vmem:[%s1004_s1 + $0x1f0] ss:$8 sps:$4 sm:$0xff]   ;;  %v538_v7 = vld [vmem:[%s1006_s2] sm:$0x3]  ;;  %v555_v14 = vld [vmem:[%s1007_s3 + $0x8] sm:$0xff]  ;;  %v556_v16 = vunpack.c.l.bf16 %v554_v9  ;;  %v557_v20 = vunpack.c.h.bf16 %v554_v9 }
  0x18   :  { %491 = vmatpush1.bf16.msra.mxu0 %v693_v23  ;;  %449 = vmatprep.subr.bf16.mxu1 %v694_v24  ;;  %v754_v2 = vld [vmem:[%s1005_s0] ss:$16 sps:$4 sm:$0xff]   ;;  %v757_v3 = vld [vmem:[%s1005_s0 + $0x8] ss:$16 sps:$4 sm:$0xff]   ;;  %v542_v6 = vsub.s32 0, %v541_v5  ;;  %v546_v8 = vsub.s32 1, %v541_v5 }
  0x19   :  { %492 = vmatprep.subr.bf16.mxu0 %v696_v25  ;;  %v558_v25 = vunpack.c.l.bf16 %v555_v14 }
  0x1a   :  { %v543_v10 = vrot.slane %v538_v7, %v542_v6  ;;  %v547_v13 = vrot.slane %v538_v7, %v546_v8 }
  0x1b   :  { %450 = vmatpush1.bf16.msra.mxu1 %v698_v26 }
  0x1c   :  { %493 = vmatpush1.bf16.msra.mxu0 %v699_v27  ;;  %451 = vmatprep.subr.bf16.mxu1 %v700_v28 }
  0x1d   :  { %494 = vmatprep.subr.bf16.mxu0 %v702_v29 }
  0x1f   :  { %452 = vmatpush1.bf16.msra.mxu1 %v704_v30  ;;  %v559_v30 = vunpack.c.h.bf16 %v555_v14 }
  0x20   :  { %495 = vmatpush1.bf16.msra.mxu0 %v705_v31  ;;  %453 = vmatprep.subr.bf16.mxu1 %v706_v32 }
  0x21   :  { %496 = vmatprep.subr.bf16.mxu0 %v708_v33 }
  0x23   :  { %454 = vmatpush1.bf16.msra.mxu1 %v710_v34 }
  0x24   :  { %497 = vmatpush1.bf16.msra.mxu0 %v711_v35  ;;  %455 = vmatprep.subr.bf16.mxu1 %v712_v36 }
  0x25   :  { %498 = vmatprep.subr.bf16.mxu0 %v714_v37 }
  0x27   :  { %456 = vmatpush1.bf16.msra.mxu1 %v716_v38 }
  0x28   :  { %499 = vmatpush1.bf16.msra.mxu0 %v717_v39  ;;  %457 = vmatprep.subr.bf16.mxu1 %v718_v40 }
  0x29   :  { %500 = vmatprep.subr.bf16.mxu0 %v720_v41 }
  0x2b   :  { %458 = vmatpush1.bf16.msra.mxu1 %v722_v42 }
  0x2c   :  { %501 = vmatpush1.bf16.msra.mxu0 %v723_v43  ;;  %459 = vmatprep.subr.bf16.mxu1 %v724_v44 }
  0x2d   :  { %502 = vmatprep.subr.bf16.mxu0 %v726_v45 }
  0x2f   :  { %460 = vmatpush1.bf16.msra.mxu1 %v728_v46 }
  0x30   :  { %503 = vmatpush1.bf16.msra.mxu0 %v729_v48  ;;  %461 = vmatprep.subr.bf16.mxu1 %v730_v49 }
  0x31   :  { %504 = vmatprep.subr.bf16.mxu0 %v732_v50 }
  0x33   :  { %462 = vmatpush1.bf16.msra.mxu1 %v734_v52 }
  0x34   :  { %505 = vmatpush1.bf16.msra.mxu0 %v735_v53  ;;  %463 = vmatprep.subr.bf16.mxu1 %v736_v54 }
  0x35   :  { %506 = vmatprep.subr.bf16.mxu0 %v738_v55 }
  0x37   :  { %464 = vmatpush1.bf16.msra.mxu1 %v740_v56 }
  0x38   :  { %507 = vmatpush1.bf16.msra.mxu0 %v741_v57  ;;  %465 = vmatprep.subr.bf16.mxu1 %v742_v58 }
  0x39   :  { %508 = vmatprep.subr.bf16.mxu0 %v744_v59 }
  0x3b   :  { %466 = vmatpush1.bf16.msra.mxu1 %v746_v60 }
  0x3c   :  { %509 = vmatpush1.bf16.msra.mxu0 %v747_v61  ;;  %467 = vmatprep.subr.bf16.mxu1 %v748_v62 }
  0x3d   :  { %510 = vmatprep.subr.bf16.mxu0 %v750_v63 }
  0x3f   :  { %468 = vmatpush1.bf16.msra.mxu1 %v752_v0 }
  0x40   :  { %511 = vmatpush1.bf16.msra.mxu0 %v753_v1 }
  0x42   :  { %470 = vmatmul.mubr.bf16.vlgmr.msra.gmra.mrb[0].mxu1 %v754_v2 }
  0x43   :  { %513 = vmatmul.mubr.bf16.vlgmr.msra.gmra.mrb[0].mxu0 %v757_v3 }
 0x115   :  { %v471_v11 = vpop.f32.mrb[0].mxu1 }
 0x116   :  { %v514_v12 = vpop.f32.mrb[0].mxu0  ;;  %v473_v17 = vpop.f32.mrb[1].mxu1 }
 0x117   :  { %v515_v15 = vadd.f32 %v514_v12, %v471_v11  ;;  %v516_v18 = vpop.f32.mrb[1].mxu0  ;;  %v475_v21 = vpop.f32.mrb[2].mxu1 }
 0x118   :  { %v517_v19 = vadd.f32 %v516_v18, %v473_v17  ;;  %v518_v22 = vpop.f32.mrb[2].mxu0  ;;  %v477_v26 = vpop.f32.mrb[3].mxu1 }
 0x119   :  { %v550_v23 = vadd.f32 %v543_v10, %v515_v15  ;;  %v519_v24 = vadd.f32 %v518_v22, %v475_v21  ;;  %v520_v27 = vpop.f32.mrb[3].mxu0 }
 0x11a   :  { %v551_v28 = vadd.f32 %v547_v13, %v517_v19  ;;  %v521_v29 = vadd.f32 %v520_v27, %v477_v26 }
 0x11b   :  { %v560_v31 = vadd.f32 %v556_v16, %v550_v23  ;;  %v552_v32 = vadd.f32 %v543_v10, %v519_v24 }
 0x11c   :  { %v561_v33 = vadd.f32 %v557_v20, %v551_v28  ;;  %v553_v34 = vadd.f32 %v547_v13, %v521_v29 }
 0x11d   :  { %v562_v35 = vadd.f32 %v558_v25, %v552_v32 }
 0x11e   :  { %v652_v36 = vpack.c.bf16 %v561_v33, %v560_v31  ;;  %v563_v37 = vadd.f32 %v559_v30, %v553_v34 }
 0x120   :  { %576 = vst [vmem:[%s1008_s4] sm:$0xff] %v652_v36  ;;  %v653_v38 = vpack.c.bf16 %v563_v37, %v562_v35 }
 0x122   :  { %577 = vst [vmem:[%s1008_s4 + $0x8] sm:$0xff] %v653_v38 }

// kernel: encoder_decoder_forward.43
= control target key start
LH: loop header
LB: loop body
LE: loop exit
PB: predicated region body
PF: predicated region fallthrough
CT: control target
= control target key end

     0   :  { %s821_s18 = smov 0   ;;  %s823_s19 = smov 0   ;;  %s900_s0 = inlined_call_operand.vmem [shape: bf16[16,256], index: 0, kind: input, shape index: {}]   ;;  %s901_s1 = inlined_call_operand.vmem [shape: f32[1,256], index: 1, kind: input, shape index: {}]   ;;  %s902_s2 = inlined_call_operand.vmem [shape: f32[1,256], index: 2, kind: input, shape index: {}]   ;;  %s903_s3 = inlined_call_operand.vmem [shape: bf16[4,256,128], index: 3, kind: input, shape index: {}]   ;;  %s904_s4 = inlined_call_operand.vmem [shape: f32[4,1,128], index: 4, kind: input, shape index: {}]   ;;  %s905_s5 = inlined_call_operand.vmem [shape: bf16[4,16,128], index: 5, kind: output, shape index: {}]  }
   0x1   :  { %s825_s20 = smov 0  }
   0x2 LB: > { %s24_s21 = sadd.s32 1, %s785_s19  ;;  %p665_p0 = scmp.ge.s32.totalorder %s789_s20, 1  ;;  %s789_s20 = sphi %s825_s20, %s15_s20   ;;  %s785_s19 = sphi %s823_s19, %s907_s19   ;;  %s781_s18 = sphi %s821_s18, %s906_s18  }
   0x3   : > { %p25_p1 = scmp.ge.s32.totalorder %s24_s21, 4  ;;  %p221_p2 = scmp.lt.s32.totalorder %s789_s20, 5 }
   0x5   : > { %s909_s21 = smov (%p25_p1, %s24_s21), 0  ;;  %p222_p3 = pnand %p665_p0, %p221_p2 }
   0x6   : > { %p269_p4 = scmp.lt.s32.totalorder (!%p222_p3), %s781_s18, 3  ;;  %p670_p5 = scmp.ne.s32.totalorder (!%p222_p3), %s781_s18, 0 }
   0x7   : > { %225 = sbr.rel (%p222_p3) target bundleno = 595 (0x253), region = 40 }
   0xe   : > { %s839_s22 = scalar_select %p269_p4, %s781_s18, 3 }
   0xf   : > { %291 = sbr.rel (%p670_p5) target bundleno = 340 (0x154), region = 44  ;;  %v292_v0 = vld [vmem:[%s900_s0] sm:$0xff] (!%p670_p5)  ;;  %v293_v1 = vld [vmem:[%s900_s0 + $0x8] sm:$0xff] (!%p670_p5)  ;;  %v333_v25 = vlaneseq (!%p670_p5) }
  0x10   : > { %s692_s23 = sshll.u32 %s839_s22, 7  ;;  %s276_s26 = scalar_lea.vmem %s904_s4, %s839_s22  ;;  %v294_v2 = vunpack.c.l.bf16 (!%p670_p5), %v292_v0  ;;  %v295_v3 = vunpack.c.h.bf16 (!%p670_p5), %v292_v0  ;;  %v296_v4 = vunpack.c.l.bf16 (!%p670_p5), %v293_v1  ;;  %v297_v5 = vunpack.c.h.bf16 (!%p670_p5), %v293_v1  ;;  %v331_v32 = vld [vmem:[%s901_s1] sm:$0x3] (!%p670_p5) }
  0x11   : > { %s849_s29 = scalar_lea.vmem %s903_s3, %s692_s23  ;;  %s693_s30 = sshll.u32 %s839_s22, 3  ;;  %v334_v29 = vshrl.u32 (!%p670_p5), %v333_v25, 7  ;;  %v347_v36 = vld [vmem:[%s902_s2] sm:$0x3] (!%p670_p5) }
  0x12   : > { %s855_s8 = scalar_lea.vmem %s905_s5, %s693_s30  ;;  %v298_v6 = vadd.f32 (!%p670_p5), %v295_v3, %v294_v2  ;;  %v301_v7 = vadd.f32 (!%p670_p5), %v297_v5, %v296_v4 }
  0x13   : > { %v335_v30 = vsub.s32 (!%p670_p5), 0, %v334_v29  ;;  %v339_v31 = vsub.s32 (!%p670_p5), 1, %v334_v29 }
  0x14   : > { %299 = vadd.xlane.f32.xlu0 (!%p670_p5), %v298_v6 }
  0x15   : > { %v336_v34 = vrot.slane (!%p670_p5), %v331_v32, %v335_v30  ;;  %v340_v35 = vrot.slane (!%p670_p5), %v331_v32, %v339_v31  ;;  %v352_v40 = vrot.slane (!%p670_p5), %v347_v36, %v335_v30  ;;  %v356_v41 = vrot.slane (!%p670_p5), %v347_v36, %v339_v31 }
  0x18   : > { %302 = vadd.xlane.f32.xlu0 %v301_v7 }
  0xa1   : > { %v300_v8 = vpop.xlane.xlu0 %299 }
  0xa2   : > { %v305_v9 = vmul.f32 0.00390625, %v300_v8 }
  0xa4   : > { %v307_v10 = vsub.f32 %v294_v2, %v305_v9  ;;  %v308_v11 = vsub.f32 %v295_v3, %v305_v9 }
  0xa5   : > { %v303_v12 = vpop.xlane.xlu0 %302 }
  0xa6   : > { %v306_v13 = vmul.f32 0.00390625, %v303_v12  ;;  %v311_v14 = vmul.f32 %v307_v10, %v307_v10  ;;  %v312_v15 = vmul.f32 %v308_v11, %v308_v11 }
  0xa8   : > { %v309_v16 = vsub.f32 %v296_v4, %v306_v13  ;;  %v310_v17 = vsub.f32 %v297_v5, %v306_v13  ;;  %v315_v18 = vadd.f32 %v312_v15, %v311_v14 }
  0xaa   : > { %316 = vadd.xlane.f32.xlu1 %v315_v18  ;;  %v313_v19 = vmul.f32 %v309_v16, %v309_v16  ;;  %v314_v20 = vmul.f32 %v310_v17, %v310_v17 }
  0xac   : > { %v318_v21 = vadd.f32 %v314_v20, %v313_v19 }
  0xae   : > { %319 = vadd.xlane.f32.xlu1 %v318_v21 }
 0x137   : > { %v317_v22 = vpop.xlane.xlu1 %316 }
 0x138   : > { %v321_v23 = vmul.f32 0.00390625, %v317_v22 }
 0x13a   : > { %v323_v24 = vadd.f32 1e-05, %v321_v23 }
 0x13b   : > { %v320_v26 = vpop.xlane.xlu1 %319 }
 0x13c   : > { %747 = vrsqrt.f32 %v323_v24  ;;  %v322_v27 = vmul.f32 0.00390625, %v320_v26 }
 0x13e   : > { %v324_v28 = vadd.f32 1e-05, %v322_v27 }
 0x140   : > { %749 = vrsqrt.f32 %v324_v28 }
 0x146   : > { %v748_v33 = vpop.eup %747 }
 0x147   : > { %v327_v37 = vmul.f32 %v748_v33, %v307_v10  ;;  %v328_v38 = vmul.f32 %v748_v33, %v308_v11 }
 0x149   : > { %v343_v42 = vmul.f32 %v336_v34, %v327_v37  ;;  %v344_v43 = vmul.f32 %v340_v35, %v328_v38 }
 0x14a   : > { %v750_v39 = vpop.eup %749 }
 0x14b   : > { %v329_v44 = vmul.f32 %v750_v39, %v309_v16  ;;  %v330_v45 = vmul.f32 %v750_v39, %v310_v17  ;;  %v359_v48 = vadd.f32 %v352_v40, %v343_v42  ;;  %v360_v49 = vadd.f32 %v356_v41, %v344_v43 }
 0x14d   : > { %v345_v46 = vmul.f32 %v336_v34, %v329_v44  ;;  %v346_v47 = vmul.f32 %v340_v35, %v330_v45 }
 0x14f   : > { %v361_v50 = vadd.f32 %v352_v40, %v345_v46  ;;  %v362_v51 = vadd.f32 %v356_v41, %v346_v47 }
 0x151   : > { %v363_v52 = vpack.c.bf16 %v361_v50, %v359_v48  ;;  %v364_v53 = vpack.c.bf16 %v362_v51, %v360_v49 }
 0x153   : > { %365 = vst [vmem:[#allocation2] sm:$0xff] %v363_v52  ;;  %366 = vst [vmem:[#allocation2 + $0x8] sm:$0xff] %v364_v53 }
 0x154 PF: > { %v751_v54 = vld [vmem:[%s849_s29 + $0x40] sm:$0xff]   ;;  %v753_v56 = vld [vmem:[%s849_s29 + $0x48] sm:$0xff]   ;;  %v755_v58 = vld [vmem:[%s849_s29 + $0x50] sm:$0xff]  }
 0x155   : > { %v752_v55 = vld [vmem:[%s849_s29] sm:$0xff]   ;;  %701 = vmatprep.subr.bf16.mxu0 %v751_v54  ;;  %v754_v57 = vld [vmem:[%s849_s29 + $0x8] sm:$0xff]   ;;  %v756_v59 = vld [vmem:[%s849_s29 + $0x10] sm:$0xff]  }
 0x156   : > { %702 = vmatpush3.bf16.msra.mxu0 %v752_v55  ;;  %v757_v60 = vld [vmem:[%s849_s29 + $0x58] sm:$0xff]   ;;  %v759_v62 = vld [vmem:[%s849_s29 + $0x60] sm:$0xff]   ;;  %v761_v0 = vld [vmem:[%s849_s29 + $0x68] sm:$0xff]  }
 0x157   : > { %703 = vmatprep.subr.bf16.mxu0 %v753_v56  ;;  %v758_v61 = vld [vmem:[%s849_s29 + $0x18] sm:$0xff]   ;;  %v760_v63 = vld [vmem:[%s849_s29 + $0x20] sm:$0xff]   ;;  %v762_v2 = vld [vmem:[%s849_s29 + $0x28] sm:$0xff]  }
 0x158   : > { %v763_v3 = vld [vmem:[%s849_s29 + $0x70] sm:$0xff]   ;;  %v765_v5 = vld [vmem:[%s849_s29 + $0x78] sm:$0xff]   ;;  %v671_v12 = vld [vmem:[%s276_s26] ss:$0 sm:$0xff] }
 0x159   : > { %v764_v4 = vld [vmem:[%s849_s29 + $0x30] sm:$0xff]   ;;  %v766_v6 = vld [vmem:[%s849_s29 + $0x38] sm:$0xff]  }
 0x15a   : > { %704 = vmatpush3.bf16.msra.mxu0 %v754_v57  ;;  %v368_v1 = vld [vmem:[#allocation2 + $0x8] sm:$0xff]  ;;  %v367_v7 = vld [vmem:[#allocation2] sm:$0xff] }
 0x15b   : > { %705 = vmatprep.subr.bf16.mxu0 %v755_v58  ;;  %536 = vmatprep.mubr.bf16.mxu0 %v368_v1 }
 0x15e   : > { %706 = vmatpush3.bf16.msra.mxu0 %v756_v59 }
 0x15f   : > { %707 = vmatprep.subr.bf16.mxu0 %v757_v60 }
 0x162   : > { %708 = vmatpush3.bf16.msra.mxu0 %v758_v61 }
 0x163   : > { %709 = vmatprep.subr.bf16.mxu0 %v759_v62 }
 0x166   : > { %710 = vmatpush3.bf16.msra.mxu0 %v760_v63 }
 0x167   : > { %711 = vmatprep.subr.bf16.mxu0 %v761_v0 }
 0x16a   : > { %712 = vmatpush3.bf16.msra.mxu0 %v762_v2 }
 0x16b   : > { %713 = vmatprep.subr.bf16.mxu0 %v763_v3 }
 0x16e   : > { %714 = vmatpush3.bf16.msra.mxu0 %v764_v4 }
 0x16f   : > { %715 = vmatprep.subr.bf16.mxu0 %v765_v5 }
 0x172   : > { %716 = vmatpush3.bf16.msra.mxu0 %v766_v6 }
 0x175   : > { %537 = vmatmul.mubr.bf16.vlgmr.msra.gmra.mrb[0].mxu0 %v367_v7 }
 0x248   : > { %v717_v8 = vpop.f32.mrb[0].mxu0 }
 0x249   : > { %v718_v9 = vpop.f32.mrb[1].mxu0 }
 0x24a   : > { %v719_v10 = vadd.f32 %v718_v9, %v717_v8  ;;  %v720_v11 = vpop.f32.mrb[2].mxu0 }
 0x24b   : > { %v721_v13 = vpop.f32.mrb[3].mxu0 }
 0x24c   : > { %v722_v14 = vadd.f32 %v721_v13, %v720_v11  ;;  %v539_v15 = vadd.f32 %v719_v10, %v671_v12 }
 0x24e   : > { %v542_v16 = vadd.f32 %v722_v14, %v671_v12 }
 0x250   : > { %v699_v17 = vpack.c.bf16 %v542_v16, %v539_v15 }
 0x252   : > { %700 = vst [vmem:[%s855_s8] sm:$0xff] %v699_v17  }
 0x253 PF: > { %s15_s20 = sadd.s32 1, %s789_s20   ;;  %s906_s18 = smov %s785_s19 }
 0x254   : > { %p12_p6 = scmp.ge.s32.totalorder %s15_s20, 6   ;;  %s907_s19 = smov %s909_s21 }
 0x256   :  { %14 = sbr.rel (!%p12_p6) target bundleno = 2 (0x2), region = 80 }

// kernel: encoder_decoder_forward.44
= control target key start
LH: loop header
LB: loop body
LE: loop exit
PB: predicated region body
PF: predicated region fallthrough
CT: control target
= control target key end

     0   :  { %s705_s15 = smov 0   ;;  %s707_s16 = smov 0   ;;  %s788_s0 = inlined_call_operand.vmem [shape: bf16[2,16,128], index: 0, kind: input, shape index: {}]   ;;  %s789_s1 = inlined_call_operand.vmem [shape: bf16[4,16,128], index: 1, kind: input, shape index: {}, may-alias: {1,2}]   ;;  %s790_s2 = inlined_call_operand.vmem [shape: bf16[4,16,128], index: 2, kind: input, shape index: {}, may-alias: {1,2}]   ;;  %s791_s3 = inlined_call_operand.vmem [shape: f32[2,1,8], index: 3, kind: input, shape index: {}]   ;;  %s792_s4 = inlined_call_operand.vmem [shape: bf16[2,16,128], index: 4, kind: output, shape index: {}]  }
   0x1   :  { %s709_s17 = smov 0   ;;  %s711_s18 = smov 0  }
   0x2   :  { %s713_s19 = smov 0  }
   0x3 LB: > { %s23_s20 = sadd.s32 1, %s668_s17  ;;  %s26_s21 = sadd.s32 1, %s672_s18  ;;  %s676_s19 = sphi %s713_s19, %s14_s19   ;;  %s672_s18 = sphi %s711_s18, %s796_s18   ;;  %s668_s17 = sphi %s709_s17, %s795_s17   ;;  %s664_s16 = sphi %s707_s16, %s794_s16   ;;  %s660_s15 = sphi %s705_s15, %s793_s15  }
   0x4   : > { %p24_p0 = scmp.ge.s32.totalorder %s23_s20, 2  ;;  %p563_p1 = scmp.ge.s32.totalorder %s676_s19, 1 }
   0x5   : > { %p223_p2 = scmp.lt.s32.totalorder %s676_s19, 5 }
   0x6   : > { %s798_s20 = smov (%p24_p0, %s23_s20), 0  ;;  %s800_s21 = smov (!%p24_p0, %s26_s21), %s672_s18 }
   0x7   : > { %p224_p3 = pnand %p563_p1, %p223_p2  ;;  %p28_p4 = scmp.ge.s32.totalorder %s800_s21, 2 }
   0x8   : > { %p277_p5 = scmp.lt.s32.totalorder (!%p224_p3), %s664_s16, 1  ;;  %p283_p6 = scmp.lt.s32.totalorder (!%p224_p3), %s660_s15, 3  ;;  %v678_v0 = vmov (!%p224_p3), 0.0   ;;  %vm679_vm0 = vmmov (!%p224_p3), 0   ;;  %vm366_vm1 = vcmask (!%p224_p3), 64512   ;;  %vm380_vm2 = vcmask (!%p224_p3), 1043456  }
   0x9   : > { %s802_s21 = smov (%p28_p4, %s800_s21), 0  ;;  %227 = sbr.rel (%p224_p3) target bundleno = 622 (0x26e), region = 36 }
   0xa   : > { %580 = vmatprep.subr.bf16.mxu0 (!%p224_p3), %v678_v0  ;;  %582 = vmatprep.mubr.msk.bf16.mxu0 (!%p224_p3), %vm679_vm0, %v678_v0  ;;  %p275_p7 = scmp.lt.s32.totalorder (!%p224_p3), %s660_s15, 1  ;;  %s291_s13 = sadd.s32 (!%p224_p3), 2, %s660_s15 }
   0xb   : > { %586 = vmatprep.subr.bf16.mxu1 (!%p224_p3), %v678_v0  ;;  %588 = vmatprep.mubr.msk.bf16.mxu1 (!%p224_p3), %vm679_vm0, %v678_v0  ;;  %p292_p8 = scmp.lt.s32.totalorder (!%p224_p3), %s291_s13, 3 }
  0x10   : > { %s804_s16 = smov (!%p277_p5, %s664_s16), 1  ;;  %s806_s13 = smov (!%p292_p8, %s291_s13), 3 }
  0x11   : > { %s284_s22 = scalar_select %p283_p6, %s660_s15, 3 }
  0x12   : > { %s276_s23 = scalar_select %p275_p7, %s660_s15, 1 }
  0x13   : > { %s566_s24 = sshll.u32 %s284_s22, 1  ;;  %s303_s12 = scalar_lea.vmem %s791_s3, %s804_s16 }
  0x14   : > { %s288_s25 = sadd.s32 %s566_s24, %s804_s16  ;;  %s564_s26 = sshll.u32 %s276_s23, 1  ;;  %v572_v6 = vld [vmem:[%s303_s12] ss:$0 sm:$0xff] }
  0x15   : > { %s567_s27 = sshll.u32 %s288_s25, 2  ;;  %s745_s28 = sadd.s32 %s564_s26, %s804_s16 }
  0x16   : > { %s290_s5 = scalar_lea.vmem %s789_s1, %s567_s27  ;;  %s565_s6 = sshll.u32 %s745_s28, 2 }
  0x17   : > { %v317_v1 = vld [vmem:[%s290_s5] sm:$0xf]  ;;  %s282_s9 = scalar_lea.vmem %s788_s0, %s565_s6  ;;  %s568_s14 = sshll.u32 %s806_s13, 1 }
  0x18   : > { %581 = vmatpush3.bf16.xpose.msra.mxu0 %v317_v1  ;;  %v313_v2 = vld [vmem:[%s282_s9] sm:$0xf]  ;;  %s297_s22 = sadd.s32 %s568_s14, %s804_s16  ;;  %s311_s27 = scalar_lea.vmem %s792_s4, %s565_s6 }
  0x19   : > { %v314_v3 = vunpack.c.l.bf16 %v313_v2  ;;  %s569_s23 = sshll.u32 %s297_s22, 2 }
  0x1a   : > { %s299_s26 = scalar_lea.vmem %s790_s2, %s569_s23 }
  0x1b   : > { %v315_v4 = vmul.f32 0.088388346, %v314_v3  ;;  %v318_v13 = vld [vmem:[%s299_s26] sm:$0xf] }
  0x1c   : > { %v382_v14 = vsel %vm380_vm2, %v318_v13, 0 }
  0x1d   : > { %v316_v5 = vpack.c.bf16 %v315_v4, %v315_v4  ;;  %587 = vmatpush3.bf16.msra.mxu1 %v382_v14 }
  0x1f   : > { %583 = vmatmul.mubr.bf16.vlgmr.msra.gmra.mrb[0].mxu0 %v316_v5 }
  0xf2   : > { %v360_v7 = vpop.f32.mrb[0].mxu0 }
  0xf3   : > { %v361_v8 = vadd.f32 %v572_v6, %v360_v7  ;;  %v584_v9 = vpop.f32.mrb[1].mxu0 }
  0xf4   : > { %v363_v10 = vpop.f32.mrb[2].mxu0 }
  0xf5   : > { %v585_v11 = vpop.f32.mrb[3].mxu0  ;;  %v367_v12 = vsel %vm366_vm1, %v361_v8, -inf }
  0xf6   : > { %368 = vmax.xlane.f32.xlu0 %v367_v12 }
 0x183   : > { %v369_v15 = vpop.xlane.xlu0 %368 }
 0x184   : > { %v370_v16 = vsub.f32 %v361_v8, %v369_v15 }
 0x186   : > { %v371_v17 = vmul.f32 1.442695, %v370_v16 }
 0x188   : > { %634 = vpow2.f32 %v371_v17 }
 0x192   : > { %v635_v18 = vpop.eup %634 }
 0x193   : > { %v373_v19 = vsel %vm366_vm1, %v635_v18, 0.0  ;;  %v376_v20 = vpack.c.bf16 %v635_v18, %v635_v18 }
 0x194   : > { %374 = vadd.xlane.f32.xlu0 %v373_v19 }
 0x195   : > { %589 = vmatmul.mubr.msk.bf16.vlgmr.msra.gmra.mrb[0].mxu1 %vm366_vm1, %v376_v20 }
 0x221   : > { %v375_v21 = vpop.xlane.xlu0 %374 }
 0x222   : > { %636 = vrcp.f32 %v375_v21 }
 0x22c   : > { %v637_v22 = vpop.eup %636 }
 0x268   : > { %v418_v23 = vpop.f32.mrb[0].mxu1 }
 0x269   : > { %v425_v24 = vmul.f32 %v637_v22, %v418_v23  ;;  %v590_v25 = vpop.f32.mrb[1].mxu1 }
 0x26a   : > { %v421_v26 = vpop.f32.mrb[2].mxu1 }
 0x26b   : > { %v426_v27 = vpack.c.bf16 %v425_v24, %v425_v24  ;;  %v591_v28 = vpop.f32.mrb[3].mxu1 }
 0x26d   : > { %427 = vst [vmem:[%s311_s27] sm:$0xf] %v426_v27 }
 0x26e PF: > { %s14_s19 = sadd.s32 1, %s676_s19   ;;  %s793_s15 = smov %s668_s17 }
 0x26f   : > { %p11_p9 = scmp.ge.s32.totalorder %s14_s19, 6   ;;  %s794_s16 = smov %s672_s18 }
 0x270   : > { %s795_s17 = smov %s798_s20  ;;  %s796_s18 = smov %s802_s21 }
 0x271   :  { %13 = sbr.rel (!%p11_p9) target bundleno = 3 (0x3), region = 75 }

// kernel: encoder_decoder_forward.57
= control target key start
LH: loop header
LB: loop body
LE: loop exit
PB: predicated region body
PF: predicated region fallthrough
CT: control target
= control target key end

     0   :  { %s491_s0 = inlined_call_operand.vmem [shape: bf16[16,256], index: 0, kind: input, shape index: {}]   ;;  %s492_s1 = inlined_call_operand.vmem [shape: f32[1,256], index: 1, kind: input, shape index: {}]   ;;  %s493_s2 = inlined_call_operand.vmem [shape: f32[1,256], index: 2, kind: input, shape index: {}]   ;;  %s494_s3 = inlined_call_operand.vmem [shape: bf16[256,128], index: 3, kind: input, shape index: {}]   ;;  %s495_s4 = inlined_call_operand.vmem [shape: f32[1,128], index: 4, kind: input, shape index: {}]   ;;  %s496_s5 = inlined_call_operand.hbm [shape: f32[16,128], index: 5, kind: output, shape index: {}]  }
   0x1   :  { %v26_v0 = vld [vmem:[%s491_s0] sm:$0xff]  ;;  %v27_v1 = vld [vmem:[%s491_s0 + $0x8] sm:$0xff] }
   0x2   :  { %v28_v2 = vunpack.c.l.bf16 %v26_v0  ;;  %v29_v3 = vunpack.c.h.bf16 %v26_v0  ;;  %v30_v4 = vunpack.c.l.bf16 %v27_v1  ;;  %v31_v5 = vunpack.c.h.bf16 %v27_v1 }
   0x4   :  { %v32_v6 = vadd.f32 %v29_v3, %v28_v2  ;;  %v35_v7 = vadd.f32 %v31_v5, %v30_v4 }
   0x6   :  { %33 = vadd.xlane.f32.xlu0 %v32_v6 }
   0xa   :  { %36 = vadd.xlane.f32.xlu0 %v35_v7 }
   0xb   :  { %10 = vsyncpa [#allocation4], 0  ;;  %v339_v8 = vld [vmem:[%s494_s3 + $0x40] sm:$0xff]   ;;  %v341_v24 = vld [vmem:[%s494_s3 + $0x48] sm:$0xff]   ;;  %v67_v42 = vlaneseq  ;;  %s383_s30 = smov [#allocation3]  }
   0xc   :  { %v340_v9 = vld [vmem:[%s494_s3] sm:$0xff]   ;;  %314 = vmatprep.subr.bf16.mxu0 %v339_v8  ;;  %v342_v25 = vld [vmem:[%s494_s3 + $0x8] sm:$0xff]   ;;  %v343_v26 = vld [vmem:[%s494_s3 + $0x50] sm:$0xff]   ;;  %s286_s6 = sshll.u32 %s383_s30, 4  ;;  %s287_s6 = int_to_ptr.vmem [resolvable:$true] %s286_s6 }
   0xd   :  { %315 = vmatpush3.bf16.msra.mxu0 %v340_v9  ;;  %v344_v27 = vld [vmem:[%s494_s3 + $0x10] sm:$0xff]   ;;  %v345_v28 = vld [vmem:[%s494_s3 + $0x58] sm:$0xff]   ;;  %v347_v30 = vld [vmem:[%s494_s3 + $0x60] sm:$0xff]   ;;  %v68_v45 = vshrl.u32 %v67_v42, 7  ;;  %s359_s7 = scalar_lea.vmem %s287_s6, 256  ;;  %p364_p1 = scmp.lt.s32.totalorder %s287_s6, %s287_s6 }
   0xe   :  { %316 = vmatprep.subr.bf16.mxu0 %v341_v24  ;;  %v346_v29 = vld [vmem:[%s494_s3 + $0x18] sm:$0xff]   ;;  %v348_v31 = vld [vmem:[%s494_s3 + $0x20] sm:$0xff]   ;;  %v349_v32 = vld [vmem:[%s494_s3 + $0x68] sm:$0xff]   ;;  %p360_p0 = scmp.ne.s32.totalorder %s287_s6, %s359_s7  ;;  %p365_p2 = scmp.lt.s32.totalorder %s359_s7, %s359_s7 }
   0xf   :  { %v350_v33 = vld [vmem:[%s494_s3 + $0x28] sm:$0xff]   ;;  %v351_v34 = vld [vmem:[%s494_s3 + $0x70] sm:$0xff]   ;;  %v353_v36 = vld [vmem:[%s494_s3 + $0x78] sm:$0xff]   ;;  %v69_v46 = vsub.s32 0, %v68_v45  ;;  %v73_v47 = vsub.s32 1, %v68_v45 }
  0x10   :  { %v352_v35 = vld [vmem:[%s494_s3 + $0x30] sm:$0xff]   ;;  %v354_v37 = vld [vmem:[%s494_s3 + $0x38] sm:$0xff]   ;;  %v65_v48 = vld [vmem:[%s492_s1] sm:$0x3]  ;;  %p366_p3 = por %p365_p2, %p364_p1 }
  0x11   :  { %317 = vmatpush3.bf16.msra.mxu0 %v342_v25  ;;  %v70_v51 = vrot.slane %v65_v48, %v69_v46  ;;  %v74_v52 = vrot.slane %v65_v48, %v73_v47  ;;  %v81_v53 = vld [vmem:[%s493_s2] sm:$0x3] }
  0x12   :  { %318 = vmatprep.subr.bf16.mxu0 %v343_v26  ;;  %v86_v56 = vrot.slane %v81_v53, %v69_v46  ;;  %v90_v57 = vrot.slane %v81_v53, %v73_v47  ;;  %v297_v7 = vld [vmem:[%s495_s4] ss:$0 sm:$0xff]  ;;  %p367_p4 = pnand %p366_p3, %p360_p0 }
  0x15   :  { %319 = vmatpush3.bf16.msra.mxu0 %v344_v27 }
  0x16   :  { %320 = vmatprep.subr.bf16.mxu0 %v345_v28 }
  0x19   :  { %321 = vmatpush3.bf16.msra.mxu0 %v346_v29 }
  0x1a   :  { %322 = vmatprep.subr.bf16.mxu0 %v347_v30 }
  0x1d   :  { %323 = vmatpush3.bf16.msra.mxu0 %v348_v31 }
  0x1e   :  { %324 = vmatprep.subr.bf16.mxu0 %v349_v32 }
  0x21   :  { %325 = vmatpush3.bf16.msra.mxu0 %v350_v33 }
  0x22   :  { %326 = vmatprep.subr.bf16.mxu0 %v351_v34 }
  0x25   :  { %327 = vmatpush3.bf16.msra.mxu0 %v352_v35 }
  0x26   :  { %328 = vmatprep.subr.bf16.mxu0 %v353_v36 }
  0x29   :  { %329 = vmatpush3.bf16.msra.mxu0 %v354_v37 }
  0x93   :  { %v34_v10 = vpop.xlane.xlu0 %33 }
  0x94   :  { %v39_v11 = vmul.f32 0.00390625, %v34_v10 }
  0x96   :  { %v41_v12 = vsub.f32 %v28_v2, %v39_v11  ;;  %v42_v13 = vsub.f32 %v29_v3, %v39_v11 }
  0x97   :  { %v37_v14 = vpop.xlane.xlu0 %36 }
  0x98   :  { %v40_v15 = vmul.f32 0.00390625, %v37_v14  ;;  %v45_v16 = vmul.f32 %v41_v12, %v41_v12  ;;  %v46_v17 = vmul.f32 %v42_v13, %v42_v13 }
  0x9a   :  { %v43_v18 = vsub.f32 %v30_v4, %v40_v15  ;;  %v44_v19 = vsub.f32 %v31_v5, %v40_v15  ;;  %v49_v20 = vadd.f32 %v46_v17, %v45_v16 }
  0x9c   :  { %50 = vadd.xlane.f32.xlu1 %v49_v20  ;;  %v47_v21 = vmul.f32 %v43_v18, %v43_v18  ;;  %v48_v22 = vmul.f32 %v44_v19, %v44_v19 }
  0x9e   :  { %v52_v23 = vadd.f32 %v48_v22, %v47_v21 }
  0xa0   :  { %53 = vadd.xlane.f32.xlu1 %v52_v23 }
 0x129   :  { %v51_v38 = vpop.xlane.xlu1 %50 }
 0x12a   :  { %v55_v39 = vmul.f32 0.00390625, %v51_v38 }
 0x12c   :  { %v57_v40 = vadd.f32 1e-05, %v55_v39 }
 0x12d   :  { %v54_v41 = vpop.xlane.xlu1 %53 }
 0x12e   :  { %355 = vrsqrt.f32 %v57_v40  ;;  %v56_v43 = vmul.f32 0.00390625, %v54_v41 }
 0x130   :  { %v58_v44 = vadd.f32 1e-05, %v56_v43 }
 0x132   :  { %357 = vrsqrt.f32 %v58_v44 }
 0x138   :  { %v356_v49 = vpop.eup %355 }
 0x139   :  { %v62_v50 = vmul.f32 %v356_v49, %v42_v13  ;;  %v61_v54 = vmul.f32 %v356_v49, %v41_v12 }
 0x13b   :  { %v78_v59 = vmul.f32 %v74_v52, %v62_v50  ;;  %v77_v61 = vmul.f32 %v70_v51, %v61_v54 }
 0x13c   :  { %v358_v55 = vpop.eup %357 }
 0x13d   :  { %v64_v58 = vmul.f32 %v358_v55, %v44_v19  ;;  %v63_v60 = vmul.f32 %v358_v55, %v43_v18  ;;  %v94_v0 = vadd.f32 %v90_v57, %v78_v59  ;;  %v93_v2 = vadd.f32 %v86_v56, %v77_v61 }
 0x13f   :  { %v80_v62 = vmul.f32 %v74_v52, %v64_v58  ;;  %v79_v63 = vmul.f32 %v70_v51, %v63_v60 }
 0x141   :  { %v96_v1 = vadd.f32 %v90_v57, %v80_v62  ;;  %v95_v3 = vadd.f32 %v86_v56, %v79_v63 }
 0x143   :  { %v98_v4 = vpack.c.bf16 %v96_v1, %v94_v0  ;;  %v97_v5 = vpack.c.bf16 %v95_v3, %v93_v2 }
 0x145   :  { %270 = vmatprep.mubr.bf16.mxu0 %v98_v4 }
 0x146   :  { %271 = vmatmul.mubr.bf16.vlgmr.msra.gmra.mrb[0].mxu0 %v97_v5 }
 0x219   :  { %v330_v6 = vpop.f32.mrb[0].mxu0 }
 0x21a   :  { %v331_v8 = vpop.f32.mrb[1].mxu0 }
 0x21b   :  { %v332_v9 = vadd.f32 %v331_v8, %v330_v6  ;;  %v333_v10 = vpop.f32.mrb[2].mxu0 }
 0x21c   :  { %v334_v11 = vpop.f32.mrb[3].mxu0 }
 0x21d   :  { %v273_v12 = vadd.f32 %v332_v9, %v297_v7  ;;  %v335_v13 = vadd.f32 %v334_v11, %v333_v10 }
 0x21f   :  { %279 = vst [vmem:[#allocation3] sm:$0xff] %v273_v12  ;;  %v276_v14 = vadd.f32 %v335_v13, %v297_v7 }
 0x221   :  { %280 = vst [vmem:[#allocation3 + $0x8] sm:$0xff] %v276_v14 }
 0x222   :  { %370 = shalt.err (!%p367_p4)
}
 0x223   :  { %s371_s9 = scalar_lea.hbm %s496_s5, 256 }
 0x224   :  { %p372_p5 = scmp.ne.s32.totalorder %s496_s5, %s371_s9  ;;  %p375_p6 = scmp.lt.u32.totalorder %s371_s9, %s496_s5 }
 0x226   :  { %p377_p7 = pnand %p375_p6, %p372_p5 }
 0x228   :  { %380 = shalt.err (!%p377_p7)
}
 0x229   :  { %s384_s14 = smov 128   ;;  %s385_s15 = smov 8  }
 0x22a   :  { %292 = dma.vmem_to_hbm [thread:$0]  %s287_s6, 256, %s496_s5, [#allocation4], %s384_s14, %s384_s14, %s385_s15  }
 0x22b   :  { %381 = dma.done.wait [#allocation4], 256  }
 0x22c   :  { %382 = vsyncadd [#allocation4], 4294967040 }
 0x22d   :  { %296 = vsyncpa [#allocation4], 1 }

</bundles_post_ra>
